<compile_context>
chip_gen: v5e
topology: v5e:2x2
jax: 0.10.0
libtpu: 0.0.40
codegen_flags: <defaults>
</compile_context>

<pallas_src>
import functools

import jax
import jax.numpy as jnp
from jax.experimental import pallas as pl
from jax.experimental.pallas import tpu as pltpu

VMEM_SPEC = pl.BlockSpec(memory_space=pltpu.MemorySpace.VMEM)
SMEM_SPEC = pl.BlockSpec(memory_space=pltpu.MemorySpace.SMEM)

EPS_MSG = 1e-7   # GENConv message eps
EPS_LN = 1e-5    # torch.nn.LayerNorm default eps
LANE = 128


def _round_up(v, m):
    return ((v + m - 1) // m) * m


# ----------------------------- fused Pallas kernel ---------------------------

def _fused_graph_kernel(node_in_ref, node_w_ref, node_b_ref,
                        edge_in_ref, edge_w_ref, edge_b_ref,
                        src_ref, dst_ref,
                        w1_ref, b1_ref, g1_ref, be1_ref, w2_ref, b2_ref,
                        t_ref, o_ref, *, d2_real, dp):
    # ---- fused encoders (block-diagonal weights => one matmul per item type) ----
    x = jnp.maximum(
        jnp.dot(node_in_ref[...], node_w_ref[...],
                preferred_element_type=jnp.float32) + node_b_ref[...], 0.0)     # (Np, Dp)
    ea = jnp.maximum(
        jnp.dot(edge_in_ref[...], edge_w_ref[...],
                preferred_element_type=jnp.float32) + edge_b_ref[...], 0.0)     # (Ep, Dp)

    e_pad = ea.shape[0]
    n_pad = x.shape[0]

    # one-hot gather/scatter operators built in-kernel (bf16: exact 0/1).
    # Padded edges carry id -1 -> all-zero row/column -> contribute nothing.
    src_g = (jax.lax.broadcasted_iota(jnp.int32, (e_pad, n_pad), 1)
             == src_ref[...]).astype(jnp.bfloat16)                              # (Ep, Np)
    dst_s = (jax.lax.broadcasted_iota(jnp.int32, (n_pad, e_pad), 0)
             == dst_ref[...]).astype(jnp.bfloat16)                              # (Np, Ep)

    inv_d2 = 1.0 / float(d2_real)

    def genconv(h, l):
        # message: m_e = relu(x[src_e] + edge_attr_e) + eps (gather via bf16 one-hot matmul)
        x_j = jnp.dot(src_g, h.astype(jnp.bfloat16),
                      preferred_element_type=jnp.float32)                       # (Ep, Dp)
        m = jnp.maximum(x_j + ea, 0.0) + EPS_MSG
        tm = t_ref[l] * m
        # overflow guard: per-column constant shift leaves the softmax ratio unchanged
        tm = tm - jnp.max(tm, axis=0, keepdims=True)
        em = jnp.exp(tm)
        # fused factored softmax aggregation:
        #   [num | den] = dst^T @ [em*m | em]  (single MXU pass over the (N,E) operand)
        packed = jnp.concatenate([em * m, em], axis=-1).astype(jnp.bfloat16)    # (Ep, 2*Dp)
        nd = jnp.dot(dst_s, packed, preferred_element_type=jnp.float32)         # (Np, 2*Dp)
        num = nd[:, :dp]
        den = nd[:, dp:]
        aggr = num * pl.reciprocal(jnp.maximum(den, 1e-12), approx=True)        # 0 for isolated dst
        hh = aggr + h
        # MLP: Linear(D,2D) -> LayerNorm (over real 2D cols) -> ReLU -> Linear(2D,D)
        h1 = jnp.dot(hh, w1_ref[l], preferred_element_type=jnp.float32) + b1_ref[l]
        mu = jnp.sum(h1, axis=-1, keepdims=True) * inv_d2
        var = jnp.sum(h1 * h1, axis=-1, keepdims=True) * inv_d2 - mu * mu
        h1 = (h1 - mu) * jax.lax.rsqrt(var + EPS_LN) * g1_ref[l] + be1_ref[l]
        h1 = jnp.maximum(h1, 0.0)
        return jnp.dot(h1, w2_ref[l], preferred_element_type=jnp.float32) + b2_ref[l]

    # residual / ReLU epilogues fused in-kernel (dropout p=0 -> identity)
    x1 = jnp.maximum(genconv(x, 0), 0.0)
    x2 = jnp.maximum(genconv(x1, 1) + x1, 0.0)
    x3 = jnp.maximum(genconv(x2, 2) + x2 + x1, 0.0)
    o_ref[...] = x3


# ----------------------------- parameters ------------------------------------

def _linear_params(key, fan_in, fan_out):
    kw, kb = jax.random.split(key)
    bound = 1.0 / (fan_in ** 0.5)
    w = jax.random.uniform(kw, (fan_in, fan_out), jnp.float32, -bound, bound)
    b = jax.random.uniform(kb, (fan_out,), jnp.float32, -bound, bound)
    return w, b


def _genconv_params(key, d):
    k1, k2 = jax.random.split(key)
    w1, b1 = _linear_params(k1, d, 2 * d)
    w2, b2 = _linear_params(k2, 2 * d, d)
    return dict(w1=w1, b1=b1,
                g1=jnp.ones((2 * d,), jnp.float32),
                be1=jnp.zeros((2 * d,), jnp.float32),
                w2=w2, b2=b2,
                t=jnp.ones((1,), jnp.float32))      # learn_t=True, init t=1.0


def init_params(key, face_feat, edge_feat, grid_feat, hidden_dim):
    # GENConv requires input_dim == hidden_dim here, so each encoder maps to
    # hidden_dim // 2 before concatenation.
    half = hidden_dim // 2
    ks = jax.random.split(key, 7)
    p = {}
    p['face_w'], p['face_b'] = _linear_params(ks[0], face_feat, half)
    p['face_grid_w'], p['face_grid_b'] = _linear_params(ks[1], grid_feat, half)
    p['edge_w'], p['edge_b'] = _linear_params(ks[2], edge_feat, half)
    p['edge_grid_w'], p['edge_grid_b'] = _linear_params(ks[3], grid_feat, half)
    p['conv1'] = _genconv_params(ks[4], hidden_dim)
    p['conv2'] = _genconv_params(ks[5], hidden_dim)
    p['conv3'] = _genconv_params(ks[6], hidden_dim)
    return p


# ----------------------- one-time parameter packing ---------------------------

def prepare_packed_params(params, face_feat, edge_feat, grid_feat, hidden):
    """Pad/stack all weights ONCE (parameter-only; outside the per-call path)."""
    half = hidden // 2
    dp = _round_up(hidden, LANE)
    d2p = _round_up(2 * hidden, LANE)
    kn = _round_up(face_feat + grid_feat, LANE)
    ke = _round_up(edge_feat + grid_feat, LANE)

    node_w = jnp.zeros((kn, dp), jnp.float32)
    node_w = node_w.at[:face_feat, :half].set(params['face_w'])
    node_w = node_w.at[face_feat:face_feat + grid_feat, half:hidden].set(params['face_grid_w'])
    node_b = jnp.zeros((1, dp), jnp.float32)
    node_b = node_b.at[0, :half].set(params['face_b'])
    node_b = node_b.at[0, half:hidden].set(params['face_grid_b'])

    edge_w = jnp.zeros((ke, dp), jnp.float32)
    edge_w = edge_w.at[:edge_feat, :half].set(params['edge_w'])
    edge_w = edge_w.at[edge_feat:edge_feat + grid_feat, half:hidden].set(params['edge_grid_w'])
    edge_b = jnp.zeros((1, dp), jnp.float32)
    edge_b = edge_b.at[0, :half].set(params['edge_b'])
    edge_b = edge_b.at[0, half:hidden].set(params['edge_grid_b'])

    def pad_conv(p):
        w1 = jnp.zeros((dp, d2p), jnp.float32).at[:hidden, :2 * hidden].set(p['w1'])
        b1 = jnp.zeros((1, d2p), jnp.float32).at[0, :2 * hidden].set(p['b1'])
        g1 = jnp.zeros((1, d2p), jnp.float32).at[0, :2 * hidden].set(p['g1'])
        be1 = jnp.zeros((1, d2p), jnp.float32).at[0, :2 * hidden].set(p['be1'])
        w2 = jnp.zeros((d2p, dp), jnp.float32).at[:2 * hidden, :hidden].set(p['w2'])
        b2 = jnp.zeros((1, dp), jnp.float32).at[0, :hidden].set(p['b2'])
        return w1, b1, g1, be1, w2, b2

    convs = [pad_conv(params['conv%d' % i]) for i in (1, 2, 3)]
    packed = dict(
        node_w=node_w, node_b=node_b, edge_w=edge_w, edge_b=edge_b,
        w1=jnp.stack([c[0] for c in convs]),
        b1=jnp.stack([c[1] for c in convs]),
        g1=jnp.stack([c[2] for c in convs]),
        be1=jnp.stack([c[3] for c in convs]),
        w2=jnp.stack([c[4] for c in convs]),
        b2=jnp.stack([c[5] for c in convs]),
        t=jnp.concatenate([params['conv%d' % i]['t'] for i in (1, 2, 3)]).astype(jnp.float32),
    )
    return packed


# ----------------------------- forward pass -----------------------------------

def graph_network_forward(packed, x, edge_index, edge_attr, face_grid, edge_grid,
                          *, hidden):
    n = x.shape[0]
    e = edge_attr.shape[0]
    n_pad = _round_up(max(n, 8), LANE)   # lane dim of src_g
    e_pad = _round_up(max(e, 8), LANE)   # lane dim of dst_s
    dp = _round_up(hidden, LANE)
    kn = packed['node_w'].shape[0]
    ke = packed['edge_w'].shape[0]

    # per-call (data-dependent) packing only: concat + zero-pad rows/cols
    node_in = jnp.concatenate([x, face_grid.reshape(n, -1)], axis=-1)
    node_in = jnp.pad(node_in, ((0, n_pad - n), (0, kn - node_in.shape[1])))
    edge_in = jnp.concatenate([edge_attr, edge_grid.reshape(e, -1)], axis=-1)
    edge_in = jnp.pad(edge_in, ((0, e_pad - e), (0, ke - edge_in.shape[1])))

    # int32 edge endpoints; padded edges get id -1 (matches nothing in-kernel)
    src_col = jnp.pad(edge_index[0].astype(jnp.int32), (0, e_pad - e),
                      constant_values=-1).reshape(e_pad, 1)
    dst_row = jnp.pad(edge_index[1].astype(jnp.int32), (0, e_pad - e),
                      constant_values=-1).reshape(1, e_pad)

    out = pl.pallas_call(
        functools.partial(_fused_graph_kernel, d2_real=2 * hidden, dp=dp),
        out_shape=jax.ShapeDtypeStruct((n_pad, dp), jnp.float32),
        in_specs=[VMEM_SPEC] * 14 + [SMEM_SPEC],
        out_specs=VMEM_SPEC,
        compiler_params=pltpu.CompilerParams(vmem_limit_bytes=32 * 1024 * 1024),
    )(node_in, packed['node_w'], packed['node_b'],
      edge_in, packed['edge_w'], packed['edge_b'],
      src_col, dst_row,
      packed['w1'], packed['b1'], packed['g1'], packed['be1'],
      packed['w2'], packed['b2'], packed['t'])
    return out[:n, :hidden]


# --------------------------- pure-JAX reference --------------------------------

def _genconv_ref(x, edge_index, edge_attr, p):
    src, dst = edge_index[0], edge_index[1]
    m = jnp.maximum(x[src] + edge_attr, 0.0) + EPS_MSG
    em = jnp.exp(p['t'][0] * m)
    denom = jax.ops.segment_sum(em, dst, num_segments=x.shape[0])
    alpha = em / denom[dst]
    aggr = jax.ops.segment_sum(alpha * m, dst, num_segments=x.shape[0])
    h = aggr + x
    h1 = h @ p['w1'] + p['b1']
    mu = h1.mean(-1, keepdims=True)
    var = ((h1 - mu) ** 2).mean(-1, keepdims=True)
    h1 = (h1 - mu) / jnp.sqrt(var + EPS_LN) * p['g1'] + p['be1']
    h1 = jnp.maximum(h1, 0.0)
    return h1 @ p['w2'] + p['b2']


def _forward_ref(params, x, edge_index, edge_attr, face_grid, edge_grid):
    n, e = x.shape[0], edge_attr.shape[0]
    fe = jnp.maximum(x @ params['face_w'] + params['face_b'], 0.0)
    fg = jnp.maximum(face_grid.reshape(n, -1) @ params['face_grid_w'] + params['face_grid_b'], 0.0)
    xe = jnp.concatenate([fe, fg], axis=-1)
    ee = jnp.maximum(edge_attr @ params['edge_w'] + params['edge_b'], 0.0)
    eg = jnp.maximum(edge_grid.reshape(e, -1) @ params['edge_grid_w'] + params['edge_grid_b'], 0.0)
    eenc = jnp.concatenate([ee, eg], axis=-1)
    x1 = jnp.maximum(_genconv_ref(xe, edge_index, eenc, params['conv1']), 0.0)
    x2 = jnp.maximum(_genconv_ref(x1, edge_index, eenc, params['conv2']) + x1, 0.0)
    x3 = jnp.maximum(_genconv_ref(x2, edge_index, eenc, params['conv3']) + x2 + x1, 0.0)
    return x3


# --------------------------------- main -----------------------------------------

if __name__ == "__main__":
    key = jax.random.PRNGKey(0)
    N, E = 16, 40                 # nodes (faces), edges
    FACE_FEAT, EDGE_FEAT = 7, 6
    C, H, W = 3, 8, 8             # NCHW grids
    HIDDEN = 32                   # input_dim == hidden_dim (required by GENConv dims)

    k_x, k_fg, k_ea, k_eg, k_src, k_dst, k_p = jax.random.split(key, 7)
    x = jax.random.normal(k_x, (N, FACE_FEAT), jnp.float32)
    face_grid = jax.random.normal(k_fg, (N, C, H, W), jnp.float32)
    edge_attr = jax.random.normal(k_ea, (E, EDGE_FEAT), jnp.float32)
    edge_grid = jax.random.normal(k_eg, (E, C, H, W), jnp.float32)
    edge_index = jnp.stack([
        jax.random.randint(k_src, (E,), 0, N),
        jax.random.randint(k_dst, (E,), 0, N),
    ]).astype(jnp.int32)

    params = init_params(k_p, FACE_FEAT, EDGE_FEAT, C * H * W, HIDDEN)
    packed = prepare_packed_params(params, FACE_FEAT, EDGE_FEAT, C * H * W, HIDDEN)

    fwd = jax.jit(graph_network_forward, static_argnames=('hidden',))
    out = fwd(packed, x, edge_index, edge_attr, face_grid, edge_grid, hidden=HIDDEN)
    out = jax.block_until_ready(out)

    ref = _forward_ref(params, x, edge_index, edge_attr, face_grid, edge_grid)
    assert out.shape == (N, HIDDEN)
    assert jnp.allclose(out, ref, atol=5e-2, rtol=5e-2), float(jnp.max(jnp.abs(out - ref)))

    print("KERNEL_OK")
</pallas_src>

<mosaic_0001>
module attributes {stable_mosaic.version = 11 : i64} {
  func.func @_fused_graph_kernel(%arg0: memref<128x256xf32, #tpu.memory_space<vmem>>, %arg1: memref<256x128xf32, #tpu.memory_space<vmem>>, %arg2: memref<1x128xf32, #tpu.memory_space<vmem>>, %arg3: memref<128x256xf32, #tpu.memory_space<vmem>>, %arg4: memref<256x128xf32, #tpu.memory_space<vmem>>, %arg5: memref<1x128xf32, #tpu.memory_space<vmem>>, %arg6: memref<128x1xi32, #tpu.memory_space<vmem>>, %arg7: memref<1x128xi32, #tpu.memory_space<vmem>>, %arg8: memref<3x128x128xf32, #tpu.memory_space<vmem>>, %arg9: memref<3x1x128xf32, #tpu.memory_space<vmem>>, %arg10: memref<3x1x128xf32, #tpu.memory_space<vmem>>, %arg11: memref<3x1x128xf32, #tpu.memory_space<vmem>>, %arg12: memref<3x128x128xf32, #tpu.memory_space<vmem>>, %arg13: memref<3x1x128xf32, #tpu.memory_space<vmem>>, %arg14: memref<3xf32, #tpu.memory_space<smem>>, %arg15: memref<128x128xf32, #tpu.memory_space<vmem>>) attributes {dimension_semantics = [], scalar_prefetch = 0 : i64, scratch_operands = 0 : i64, tpu.core_type = #tpu.core_type<tc>} {
    %c0 = arith.constant 0 : index
    %c0_0 = arith.constant 0 : index
    %0 = vector.load %arg0[%c0, %c0_0] : memref<128x256xf32, #tpu.memory_space<vmem>>, vector<128x256xf32>
    %c0_1 = arith.constant 0 : index
    %c0_2 = arith.constant 0 : index
    %1 = vector.load %arg1[%c0_1, %c0_2] : memref<256x128xf32, #tpu.memory_space<vmem>>, vector<256x128xf32>
    %cst = arith.constant dense<0.000000e+00> : vector<128x128xf32>
    %2 = tpu.matmul %0, %1, %cst {dimension_numbers = #tpu.dot_dimension_numbers<[1], [0], [0], [1], [0, 0, 1, 1], [], []>} : vector<128x256xf32>, vector<256x128xf32>, vector<128x128xf32> -> vector<128x128xf32>
    %c0_3 = arith.constant 0 : index
    %c0_4 = arith.constant 0 : index
    %3 = vector.load %arg2[%c0_3, %c0_4] : memref<1x128xf32, #tpu.memory_space<vmem>>, vector<1x128xf32>
    %4 = vector.broadcast %3 : vector<1x128xf32> to vector<128x128xf32>
    %5 = arith.addf %2, %4 : vector<128x128xf32>
    %cst_5 = arith.constant 0.000000e+00 : f32
    %6 = vector.broadcast %cst_5 : f32 to vector<128x128xf32>
    %7 = arith.maximumf %5, %6 : vector<128x128xf32>
    %c0_6 = arith.constant 0 : index
    %c0_7 = arith.constant 0 : index
    %8 = vector.load %arg3[%c0_6, %c0_7] : memref<128x256xf32, #tpu.memory_space<vmem>>, vector<128x256xf32>
    %c0_8 = arith.constant 0 : index
    %c0_9 = arith.constant 0 : index
    %9 = vector.load %arg4[%c0_8, %c0_9] : memref<256x128xf32, #tpu.memory_space<vmem>>, vector<256x128xf32>
    %cst_10 = arith.constant dense<0.000000e+00> : vector<128x128xf32>
    %10 = tpu.matmul %8, %9, %cst_10 {dimension_numbers = #tpu.dot_dimension_numbers<[1], [0], [0], [1], [0, 0, 1, 1], [], []>} : vector<128x256xf32>, vector<256x128xf32>, vector<128x128xf32> -> vector<128x128xf32>
    %c0_11 = arith.constant 0 : index
    %c0_12 = arith.constant 0 : index
    %11 = vector.load %arg5[%c0_11, %c0_12] : memref<1x128xf32, #tpu.memory_space<vmem>>, vector<1x128xf32>
    %12 = vector.broadcast %11 : vector<1x128xf32> to vector<128x128xf32>
    %13 = arith.addf %10, %12 : vector<128x128xf32>
    %cst_13 = arith.constant 0.000000e+00 : f32
    %14 = vector.broadcast %cst_13 : f32 to vector<128x128xf32>
    %15 = arith.maximumf %13, %14 : vector<128x128xf32>
    %16 = tpu.iota {dimensions = array<i32: 1>} : vector<128x128xi32>
    %c0_14 = arith.constant 0 : index
    %c0_15 = arith.constant 0 : index
    %17 = vector.load %arg6[%c0_14, %c0_15] : memref<128x1xi32, #tpu.memory_space<vmem>>, vector<128x1xi32>
    %18 = vector.broadcast %17 : vector<128x1xi32> to vector<128x128xi32>
    %19 = arith.cmpi eq, %16, %18 : vector<128x128xi32>
    %20 = arith.extui %19 : vector<128x128xi1> to vector<128x128xi32>
    %21 = arith.sitofp %20 : vector<128x128xi32> to vector<128x128xf32>
    %22 = arith.truncf %21 : vector<128x128xf32> to vector<128x128xbf16>
    %23 = tpu.iota {dimensions = array<i32: 0>} : vector<128x128xi32>
    %c0_16 = arith.constant 0 : index
    %c0_17 = arith.constant 0 : index
    %24 = vector.load %arg7[%c0_16, %c0_17] : memref<1x128xi32, #tpu.memory_space<vmem>>, vector<1x128xi32>
    %25 = vector.broadcast %24 : vector<1x128xi32> to vector<128x128xi32>
    %26 = arith.cmpi eq, %23, %25 : vector<128x128xi32>
    %27 = arith.extui %26 : vector<128x128xi1> to vector<128x128xi32>
    %28 = arith.sitofp %27 : vector<128x128xi32> to vector<128x128xf32>
    %29 = arith.truncf %28 : vector<128x128xf32> to vector<128x128xbf16>
    %30 = arith.truncf %7 : vector<128x128xf32> to vector<128x128xbf16>
    %cst_18 = arith.constant dense<0.000000e+00> : vector<128x128xf32>
    %31 = tpu.matmul %22, %30, %cst_18 {dimension_numbers = #tpu.dot_dimension_numbers<[1], [0], [0], [1], [0, 0, 1, 1], [], []>} : vector<128x128xbf16>, vector<128x128xbf16>, vector<128x128xf32> -> vector<128x128xf32>
    %32 = arith.addf %31, %15 : vector<128x128xf32>
    %cst_19 = arith.constant 0.000000e+00 : f32
    %33 = vector.broadcast %cst_19 : f32 to vector<128x128xf32>
    %34 = arith.maximumf %32, %33 : vector<128x128xf32>
    %cst_20 = arith.constant 1.000000e-07 : f32
    %35 = vector.broadcast %cst_20 : f32 to vector<128x128xf32>
    %36 = arith.addf %34, %35 : vector<128x128xf32>
    %c0_21 = arith.constant 0 : index
    %37 = memref.load %arg14[%c0_21] : memref<3xf32, #tpu.memory_space<smem>>
    %38 = vector.broadcast %37 : f32 to vector<128x128xf32>
    %39 = arith.mulf %38, %36 : vector<128x128xf32>
    %cst_22 = arith.constant dense<0xFF800000> : vector<128xf32>
    %40 = vector.multi_reduction <maximumf>, %39, %cst_22 [0] : vector<128x128xf32> to vector<128xf32>
    %41 = vector.shape_cast %40 : vector<128xf32> to vector<1x128xf32>
    %42 = vector.broadcast %41 : vector<1x128xf32> to vector<128x128xf32>
    %43 = arith.subf %39, %42 : vector<128x128xf32>
    %44 = math.exp %43 : vector<128x128xf32>
    %45 = arith.mulf %44, %36 : vector<128x128xf32>
    %46 = tpu.concatenate %45, %44 in 1 : vector<128x128xf32>, vector<128x128xf32> -> vector<128x256xf32>
    %47 = arith.truncf %46 : vector<128x256xf32> to vector<128x256xbf16>
    %cst_23 = arith.constant dense<0.000000e+00> : vector<128x256xf32>
    %48 = tpu.matmul %29, %47, %cst_23 {dimension_numbers = #tpu.dot_dimension_numbers<[1], [0], [0], [1], [0, 0, 1, 1], [], []>} : vector<128x128xbf16>, vector<128x256xbf16>, vector<128x256xf32> -> vector<128x256xf32>
    %49 = vector.extract_strided_slice %48 {offsets = [0, 0], sizes = [128, 128], strides = [1, 1]} : vector<128x256xf32> to vector<128x128xf32>
    %50 = vector.extract_strided_slice %48 {offsets = [0, 128], sizes = [128, 128], strides = [1, 1]} : vector<128x256xf32> to vector<128x128xf32>
    %cst_24 = arith.constant 9.99999996E-13 : f32
    %51 = vector.broadcast %cst_24 : f32 to vector<128x128xf32>
    %52 = arith.maximumf %50, %51 : vector<128x128xf32>
    %53 = tpu.reciprocal %52 {approx = true} : vector<128x128xf32> -> vector<128x128xf32>
    %54 = arith.mulf %49, %53 : vector<128x128xf32>
    %55 = arith.addf %54, %7 : vector<128x128xf32>
    %c0_25 = arith.constant 0 : index
    %c0_26 = arith.constant 0 : index
    %c0_27 = arith.constant 0 : index
    %56 = vector.load %arg8[%c0_25, %c0_26, %c0_27] : memref<3x128x128xf32, #tpu.memory_space<vmem>>, vector<1x128x128xf32>
    %57 = vector.shape_cast %56 : vector<1x128x128xf32> to vector<128x128xf32>
    %cst_28 = arith.constant dense<0.000000e+00> : vector<128x128xf32>
    %58 = tpu.matmul %55, %57, %cst_28 {dimension_numbers = #tpu.dot_dimension_numbers<[1], [0], [0], [1], [0, 0, 1, 1], [], []>} : vector<128x128xf32>, vector<128x128xf32>, vector<128x128xf32> -> vector<128x128xf32>
    %c0_29 = arith.constant 0 : index
    %c0_30 = arith.constant 0 : index
    %c0_31 = arith.constant 0 : index
    %59 = vector.load %arg9[%c0_29, %c0_30, %c0_31] : memref<3x1x128xf32, #tpu.memory_space<vmem>>, vector<1x1x128xf32>
    %60 = vector.shape_cast %59 : vector<1x1x128xf32> to vector<1x128xf32>
    %61 = vector.broadcast %60 : vector<1x128xf32> to vector<128x128xf32>
    %62 = arith.addf %58, %61 : vector<128x128xf32>
    %cst_32 = arith.constant dense<0.000000e+00> : vector<128xf32>
    %63 = vector.multi_reduction <add>, %62, %cst_32 [1] : vector<128x128xf32> to vector<128xf32>
    %64 = vector.shape_cast %63 : vector<128xf32> to vector<128x1xf32>
    %cst_33 = arith.constant 1.562500e-02 : f32
    %65 = vector.broadcast %cst_33 : f32 to vector<128x1xf32>
    %66 = arith.mulf %64, %65 : vector<128x1xf32>
    %67 = arith.mulf %62, %62 : vector<128x128xf32>
    %cst_34 = arith.constant dense<0.000000e+00> : vector<128xf32>
    %68 = vector.multi_reduction <add>, %67, %cst_34 [1] : vector<128x128xf32> to vector<128xf32>
    %69 = vector.shape_cast %68 : vector<128xf32> to vector<128x1xf32>
    %cst_35 = arith.constant 1.562500e-02 : f32
    %70 = vector.broadcast %cst_35 : f32 to vector<128x1xf32>
    %71 = arith.mulf %69, %70 : vector<128x1xf32>
    %72 = arith.mulf %66, %66 : vector<128x1xf32>
    %73 = arith.subf %71, %72 : vector<128x1xf32>
    %74 = vector.broadcast %66 : vector<128x1xf32> to vector<128x128xf32>
    %75 = arith.subf %62, %74 : vector<128x128xf32>
    %cst_36 = arith.constant 9.99999974E-6 : f32
    %76 = vector.broadcast %cst_36 : f32 to vector<128x1xf32>
    %77 = arith.addf %73, %76 : vector<128x1xf32>
    %78 = math.rsqrt %77 : vector<128x1xf32>
    %79 = vector.broadcast %78 : vector<128x1xf32> to vector<128x128xf32>
    %80 = arith.mulf %75, %79 : vector<128x128xf32>
    %c0_37 = arith.constant 0 : index
    %c0_38 = arith.constant 0 : index
    %c0_39 = arith.constant 0 : index
    %81 = vector.load %arg10[%c0_37, %c0_38, %c0_39] : memref<3x1x128xf32, #tpu.memory_space<vmem>>, vector<1x1x128xf32>
    %82 = vector.shape_cast %81 : vector<1x1x128xf32> to vector<1x128xf32>
    %83 = vector.broadcast %82 : vector<1x128xf32> to vector<128x128xf32>
    %84 = arith.mulf %80, %83 : vector<128x128xf32>
    %c0_40 = arith.constant 0 : index
    %c0_41 = arith.constant 0 : index
    %c0_42 = arith.constant 0 : index
    %85 = vector.load %arg11[%c0_40, %c0_41, %c0_42] : memref<3x1x128xf32, #tpu.memory_space<vmem>>, vector<1x1x128xf32>
    %86 = vector.shape_cast %85 : vector<1x1x128xf32> to vector<1x128xf32>
    %87 = vector.broadcast %86 : vector<1x128xf32> to vector<128x128xf32>
    %88 = arith.addf %84, %87 : vector<128x128xf32>
    %cst_43 = arith.constant 0.000000e+00 : f32
    %89 = vector.broadcast %cst_43 : f32 to vector<128x128xf32>
    %90 = arith.maximumf %88, %89 : vector<128x128xf32>
    %c0_44 = arith.constant 0 : index
    %c0_45 = arith.constant 0 : index
    %c0_46 = arith.constant 0 : index
    %91 = vector.load %arg12[%c0_44, %c0_45, %c0_46] : memref<3x128x128xf32, #tpu.memory_space<vmem>>, vector<1x128x128xf32>
    %92 = vector.shape_cast %91 : vector<1x128x128xf32> to vector<128x128xf32>
    %cst_47 = arith.constant dense<0.000000e+00> : vector<128x128xf32>
    %93 = tpu.matmul %90, %92, %cst_47 {dimension_numbers = #tpu.dot_dimension_numbers<[1], [0], [0], [1], [0, 0, 1, 1], [], []>} : vector<128x128xf32>, vector<128x128xf32>, vector<128x128xf32> -> vector<128x128xf32>
    %c0_48 = arith.constant 0 : index
    %c0_49 = arith.constant 0 : index
    %c0_50 = arith.constant 0 : index
    %94 = vector.load %arg13[%c0_48, %c0_49, %c0_50] : memref<3x1x128xf32, #tpu.memory_space<vmem>>, vector<1x1x128xf32>
    %95 = vector.shape_cast %94 : vector<1x1x128xf32> to vector<1x128xf32>
    %96 = vector.broadcast %95 : vector<1x128xf32> to vector<128x128xf32>
    %97 = arith.addf %93, %96 : vector<128x128xf32>
    %cst_51 = arith.constant 0.000000e+00 : f32
    %98 = vector.broadcast %cst_51 : f32 to vector<128x128xf32>
    %99 = arith.maximumf %97, %98 : vector<128x128xf32>
    %100 = arith.truncf %99 : vector<128x128xf32> to vector<128x128xbf16>
    %cst_52 = arith.constant dense<0.000000e+00> : vector<128x128xf32>
    %101 = tpu.matmul %22, %100, %cst_52 {dimension_numbers = #tpu.dot_dimension_numbers<[1], [0], [0], [1], [0, 0, 1, 1], [], []>} : vector<128x128xbf16>, vector<128x128xbf16>, vector<128x128xf32> -> vector<128x128xf32>
    %102 = arith.addf %101, %15 : vector<128x128xf32>
    %cst_53 = arith.constant 0.000000e+00 : f32
    %103 = vector.broadcast %cst_53 : f32 to vector<128x128xf32>
    %104 = arith.maximumf %102, %103 : vector<128x128xf32>
    %cst_54 = arith.constant 1.000000e-07 : f32
    %105 = vector.broadcast %cst_54 : f32 to vector<128x128xf32>
    %106 = arith.addf %104, %105 : vector<128x128xf32>
    %c1 = arith.constant 1 : index
    %107 = memref.load %arg14[%c1] : memref<3xf32, #tpu.memory_space<smem>>
    %108 = vector.broadcast %107 : f32 to vector<128x128xf32>
    %109 = arith.mulf %108, %106 : vector<128x128xf32>
    %cst_55 = arith.constant dense<0xFF800000> : vector<128xf32>
    %110 = vector.multi_reduction <maximumf>, %109, %cst_55 [0] : vector<128x128xf32> to vector<128xf32>
    %111 = vector.shape_cast %110 : vector<128xf32> to vector<1x128xf32>
    %112 = vector.broadcast %111 : vector<1x128xf32> to vector<128x128xf32>
    %113 = arith.subf %109, %112 : vector<128x128xf32>
    %114 = math.exp %113 : vector<128x128xf32>
    %115 = arith.mulf %114, %106 : vector<128x128xf32>
    %116 = tpu.concatenate %115, %114 in 1 : vector<128x128xf32>, vector<128x128xf32> -> vector<128x256xf32>
    %117 = arith.truncf %116 : vector<128x256xf32> to vector<128x256xbf16>
    %cst_56 = arith.constant dense<0.000000e+00> : vector<128x256xf32>
    %118 = tpu.matmul %29, %117, %cst_56 {dimension_numbers = #tpu.dot_dimension_numbers<[1], [0], [0], [1], [0, 0, 1, 1], [], []>} : vector<128x128xbf16>, vector<128x256xbf16>, vector<128x256xf32> -> vector<128x256xf32>
    %119 = vector.extract_strided_slice %118 {offsets = [0, 0], sizes = [128, 128], strides = [1, 1]} : vector<128x256xf32> to vector<128x128xf32>
    %120 = vector.extract_strided_slice %118 {offsets = [0, 128], sizes = [128, 128], strides = [1, 1]} : vector<128x256xf32> to vector<128x128xf32>
    %cst_57 = arith.constant 9.99999996E-13 : f32
    %121 = vector.broadcast %cst_57 : f32 to vector<128x128xf32>
    %122 = arith.maximumf %120, %121 : vector<128x128xf32>
    %123 = tpu.reciprocal %122 {approx = true} : vector<128x128xf32> -> vector<128x128xf32>
    %124 = arith.mulf %119, %123 : vector<128x128xf32>
    %125 = arith.addf %124, %99 : vector<128x128xf32>
    %c1_58 = arith.constant 1 : index
    %c0_59 = arith.constant 0 : index
    %c0_60 = arith.constant 0 : index
    %126 = vector.load %arg8[%c1_58, %c0_59, %c0_60] : memref<3x128x128xf32, #tpu.memory_space<vmem>>, vector<1x128x128xf32>
    %127 = vector.shape_cast %126 : vector<1x128x128xf32> to vector<128x128xf32>
    %cst_61 = arith.constant dense<0.000000e+00> : vector<128x128xf32>
    %128 = tpu.matmul %125, %127, %cst_61 {dimension_numbers = #tpu.dot_dimension_numbers<[1], [0], [0], [1], [0, 0, 1, 1], [], []>} : vector<128x128xf32>, vector<128x128xf32>, vector<128x128xf32> -> vector<128x128xf32>
    %c1_62 = arith.constant 1 : index
    %c0_63 = arith.constant 0 : index
    %c0_64 = arith.constant 0 : index
    %129 = vector.load %arg9[%c1_62, %c0_63, %c0_64] : memref<3x1x128xf32, #tpu.memory_space<vmem>>, vector<1x1x128xf32>
    %130 = vector.shape_cast %129 : vector<1x1x128xf32> to vector<1x128xf32>
    %131 = vector.broadcast %130 : vector<1x128xf32> to vector<128x128xf32>
    %132 = arith.addf %128, %131 : vector<128x128xf32>
    %cst_65 = arith.constant dense<0.000000e+00> : vector<128xf32>
    %133 = vector.multi_reduction <add>, %132, %cst_65 [1] : vector<128x128xf32> to vector<128xf32>
    %134 = vector.shape_cast %133 : vector<128xf32> to vector<128x1xf32>
    %cst_66 = arith.constant 1.562500e-02 : f32
    %135 = vector.broadcast %cst_66 : f32 to vector<128x1xf32>
    %136 = arith.mulf %134, %135 : vector<128x1xf32>
    %137 = arith.mulf %132, %132 : vector<128x128xf32>
    %cst_67 = arith.constant dense<0.000000e+00> : vector<128xf32>
    %138 = vector.multi_reduction <add>, %137, %cst_67 [1] : vector<128x128xf32> to vector<128xf32>
    %139 = vector.shape_cast %138 : vector<128xf32> to vector<128x1xf32>
    %cst_68 = arith.constant 1.562500e-02 : f32
    %140 = vector.broadcast %cst_68 : f32 to vector<128x1xf32>
    %141 = arith.mulf %139, %140 : vector<128x1xf32>
    %142 = arith.mulf %136, %136 : vector<128x1xf32>
    %143 = arith.subf %141, %142 : vector<128x1xf32>
    %144 = vector.broadcast %136 : vector<128x1xf32> to vector<128x128xf32>
    %145 = arith.subf %132, %144 : vector<128x128xf32>
    %cst_69 = arith.constant 9.99999974E-6 : f32
    %146 = vector.broadcast %cst_69 : f32 to vector<128x1xf32>
    %147 = arith.addf %143, %146 : vector<128x1xf32>
    %148 = math.rsqrt %147 : vector<128x1xf32>
    %149 = vector.broadcast %148 : vector<128x1xf32> to vector<128x128xf32>
    %150 = arith.mulf %145, %149 : vector<128x128xf32>
    %c1_70 = arith.constant 1 : index
    %c0_71 = arith.constant 0 : index
    %c0_72 = arith.constant 0 : index
    %151 = vector.load %arg10[%c1_70, %c0_71, %c0_72] : memref<3x1x128xf32, #tpu.memory_space<vmem>>, vector<1x1x128xf32>
    %152 = vector.shape_cast %151 : vector<1x1x128xf32> to vector<1x128xf32>
    %153 = vector.broadcast %152 : vector<1x128xf32> to vector<128x128xf32>
    %154 = arith.mulf %150, %153 : vector<128x128xf32>
    %c1_73 = arith.constant 1 : index
    %c0_74 = arith.constant 0 : index
    %c0_75 = arith.constant 0 : index
    %155 = vector.load %arg11[%c1_73, %c0_74, %c0_75] : memref<3x1x128xf32, #tpu.memory_space<vmem>>, vector<1x1x128xf32>
    %156 = vector.shape_cast %155 : vector<1x1x128xf32> to vector<1x128xf32>
    %157 = vector.broadcast %156 : vector<1x128xf32> to vector<128x128xf32>
    %158 = arith.addf %154, %157 : vector<128x128xf32>
    %cst_76 = arith.constant 0.000000e+00 : f32
    %159 = vector.broadcast %cst_76 : f32 to vector<128x128xf32>
    %160 = arith.maximumf %158, %159 : vector<128x128xf32>
    %c1_77 = arith.constant 1 : index
    %c0_78 = arith.constant 0 : index
    %c0_79 = arith.constant 0 : index
    %161 = vector.load %arg12[%c1_77, %c0_78, %c0_79] : memref<3x128x128xf32, #tpu.memory_space<vmem>>, vector<1x128x128xf32>
    %162 = vector.shape_cast %161 : vector<1x128x128xf32> to vector<128x128xf32>
    %cst_80 = arith.constant dense<0.000000e+00> : vector<128x128xf32>
    %163 = tpu.matmul %160, %162, %cst_80 {dimension_numbers = #tpu.dot_dimension_numbers<[1], [0], [0], [1], [0, 0, 1, 1], [], []>} : vector<128x128xf32>, vector<128x128xf32>, vector<128x128xf32> -> vector<128x128xf32>
    %c1_81 = arith.constant 1 : index
    %c0_82 = arith.constant 0 : index
    %c0_83 = arith.constant 0 : index
    %164 = vector.load %arg13[%c1_81, %c0_82, %c0_83] : memref<3x1x128xf32, #tpu.memory_space<vmem>>, vector<1x1x128xf32>
    %165 = vector.shape_cast %164 : vector<1x1x128xf32> to vector<1x128xf32>
    %166 = vector.broadcast %165 : vector<1x128xf32> to vector<128x128xf32>
    %167 = arith.addf %163, %166 : vector<128x128xf32>
    %168 = arith.addf %167, %99 : vector<128x128xf32>
    %cst_84 = arith.constant 0.000000e+00 : f32
    %169 = vector.broadcast %cst_84 : f32 to vector<128x128xf32>
    %170 = arith.maximumf %168, %169 : vector<128x128xf32>
    %171 = arith.truncf %170 : vector<128x128xf32> to vector<128x128xbf16>
    %cst_85 = arith.constant dense<0.000000e+00> : vector<128x128xf32>
    %172 = tpu.matmul %22, %171, %cst_85 {dimension_numbers = #tpu.dot_dimension_numbers<[1], [0], [0], [1], [0, 0, 1, 1], [], []>} : vector<128x128xbf16>, vector<128x128xbf16>, vector<128x128xf32> -> vector<128x128xf32>
    %173 = arith.addf %172, %15 : vector<128x128xf32>
    %cst_86 = arith.constant 0.000000e+00 : f32
    %174 = vector.broadcast %cst_86 : f32 to vector<128x128xf32>
    %175 = arith.maximumf %173, %174 : vector<128x128xf32>
    %cst_87 = arith.constant 1.000000e-07 : f32
    %176 = vector.broadcast %cst_87 : f32 to vector<128x128xf32>
    %177 = arith.addf %175, %176 : vector<128x128xf32>
    %c2 = arith.constant 2 : index
    %178 = memref.load %arg14[%c2] : memref<3xf32, #tpu.memory_space<smem>>
    %179 = vector.broadcast %178 : f32 to vector<128x128xf32>
    %180 = arith.mulf %179, %177 : vector<128x128xf32>
    %cst_88 = arith.constant dense<0xFF800000> : vector<128xf32>
    %181 = vector.multi_reduction <maximumf>, %180, %cst_88 [0] : vector<128x128xf32> to vector<128xf32>
    %182 = vector.shape_cast %181 : vector<128xf32> to vector<1x128xf32>
    %183 = vector.broadcast %182 : vector<1x128xf32> to vector<128x128xf32>
    %184 = arith.subf %180, %183 : vector<128x128xf32>
    %185 = math.exp %184 : vector<128x128xf32>
    %186 = arith.mulf %185, %177 : vector<128x128xf32>
    %187 = tpu.concatenate %186, %185 in 1 : vector<128x128xf32>, vector<128x128xf32> -> vector<128x256xf32>
    %188 = arith.truncf %187 : vector<128x256xf32> to vector<128x256xbf16>
    %cst_89 = arith.constant dense<0.000000e+00> : vector<128x256xf32>
    %189 = tpu.matmul %29, %188, %cst_89 {dimension_numbers = #tpu.dot_dimension_numbers<[1], [0], [0], [1], [0, 0, 1, 1], [], []>} : vector<128x128xbf16>, vector<128x256xbf16>, vector<128x256xf32> -> vector<128x256xf32>
    %190 = vector.extract_strided_slice %189 {offsets = [0, 0], sizes = [128, 128], strides = [1, 1]} : vector<128x256xf32> to vector<128x128xf32>
    %191 = vector.extract_strided_slice %189 {offsets = [0, 128], sizes = [128, 128], strides = [1, 1]} : vector<128x256xf32> to vector<128x128xf32>
    %cst_90 = arith.constant 9.99999996E-13 : f32
    %192 = vector.broadcast %cst_90 : f32 to vector<128x128xf32>
    %193 = arith.maximumf %191, %192 : vector<128x128xf32>
    %194 = tpu.reciprocal %193 {approx = true} : vector<128x128xf32> -> vector<128x128xf32>
    %195 = arith.mulf %190, %194 : vector<128x128xf32>
    %196 = arith.addf %195, %170 : vector<128x128xf32>
    %c2_91 = arith.constant 2 : index
    %c0_92 = arith.constant 0 : index
    %c0_93 = arith.constant 0 : index
    %197 = vector.load %arg8[%c2_91, %c0_92, %c0_93] : memref<3x128x128xf32, #tpu.memory_space<vmem>>, vector<1x128x128xf32>
    %198 = vector.shape_cast %197 : vector<1x128x128xf32> to vector<128x128xf32>
    %cst_94 = arith.constant dense<0.000000e+00> : vector<128x128xf32>
    %199 = tpu.matmul %196, %198, %cst_94 {dimension_numbers = #tpu.dot_dimension_numbers<[1], [0], [0], [1], [0, 0, 1, 1], [], []>} : vector<128x128xf32>, vector<128x128xf32>, vector<128x128xf32> -> vector<128x128xf32>
    %c2_95 = arith.constant 2 : index
    %c0_96 = arith.constant 0 : index
    %c0_97 = arith.constant 0 : index
    %200 = vector.load %arg9[%c2_95, %c0_96, %c0_97] : memref<3x1x128xf32, #tpu.memory_space<vmem>>, vector<1x1x128xf32>
    %201 = vector.shape_cast %200 : vector<1x1x128xf32> to vector<1x128xf32>
    %202 = vector.broadcast %201 : vector<1x128xf32> to vector<128x128xf32>
    %203 = arith.addf %199, %202 : vector<128x128xf32>
    %cst_98 = arith.constant dense<0.000000e+00> : vector<128xf32>
    %204 = vector.multi_reduction <add>, %203, %cst_98 [1] : vector<128x128xf32> to vector<128xf32>
    %205 = vector.shape_cast %204 : vector<128xf32> to vector<128x1xf32>
    %cst_99 = arith.constant 1.562500e-02 : f32
    %206 = vector.broadcast %cst_99 : f32 to vector<128x1xf32>
    %207 = arith.mulf %205, %206 : vector<128x1xf32>
    %208 = arith.mulf %203, %203 : vector<128x128xf32>
    %cst_100 = arith.constant dense<0.000000e+00> : vector<128xf32>
    %209 = vector.multi_reduction <add>, %208, %cst_100 [1] : vector<128x128xf32> to vector<128xf32>
    %210 = vector.shape_cast %209 : vector<128xf32> to vector<128x1xf32>
    %cst_101 = arith.constant 1.562500e-02 : f32
    %211 = vector.broadcast %cst_101 : f32 to vector<128x1xf32>
    %212 = arith.mulf %210, %211 : vector<128x1xf32>
    %213 = arith.mulf %207, %207 : vector<128x1xf32>
    %214 = arith.subf %212, %213 : vector<128x1xf32>
    %215 = vector.broadcast %207 : vector<128x1xf32> to vector<128x128xf32>
    %216 = arith.subf %203, %215 : vector<128x128xf32>
    %cst_102 = arith.constant 9.99999974E-6 : f32
    %217 = vector.broadcast %cst_102 : f32 to vector<128x1xf32>
    %218 = arith.addf %214, %217 : vector<128x1xf32>
    %219 = math.rsqrt %218 : vector<128x1xf32>
    %220 = vector.broadcast %219 : vector<128x1xf32> to vector<128x128xf32>
    %221 = arith.mulf %216, %220 : vector<128x128xf32>
    %c2_103 = arith.constant 2 : index
    %c0_104 = arith.constant 0 : index
    %c0_105 = arith.constant 0 : index
    %222 = vector.load %arg10[%c2_103, %c0_104, %c0_105] : memref<3x1x128xf32, #tpu.memory_space<vmem>>, vector<1x1x128xf32>
    %223 = vector.shape_cast %222 : vector<1x1x128xf32> to vector<1x128xf32>
    %224 = vector.broadcast %223 : vector<1x128xf32> to vector<128x128xf32>
    %225 = arith.mulf %221, %224 : vector<128x128xf32>
    %c2_106 = arith.constant 2 : index
    %c0_107 = arith.constant 0 : index
    %c0_108 = arith.constant 0 : index
    %226 = vector.load %arg11[%c2_106, %c0_107, %c0_108] : memref<3x1x128xf32, #tpu.memory_space<vmem>>, vector<1x1x128xf32>
    %227 = vector.shape_cast %226 : vector<1x1x128xf32> to vector<1x128xf32>
    %228 = vector.broadcast %227 : vector<1x128xf32> to vector<128x128xf32>
    %229 = arith.addf %225, %228 : vector<128x128xf32>
    %cst_109 = arith.constant 0.000000e+00 : f32
    %230 = vector.broadcast %cst_109 : f32 to vector<128x128xf32>
    %231 = arith.maximumf %229, %230 : vector<128x128xf32>
    %c2_110 = arith.constant 2 : index
    %c0_111 = arith.constant 0 : index
    %c0_112 = arith.constant 0 : index
    %232 = vector.load %arg12[%c2_110, %c0_111, %c0_112] : memref<3x128x128xf32, #tpu.memory_space<vmem>>, vector<1x128x128xf32>
    %233 = vector.shape_cast %232 : vector<1x128x128xf32> to vector<128x128xf32>
    %cst_113 = arith.constant dense<0.000000e+00> : vector<128x128xf32>
    %234 = tpu.matmul %231, %233, %cst_113 {dimension_numbers = #tpu.dot_dimension_numbers<[1], [0], [0], [1], [0, 0, 1, 1], [], []>} : vector<128x128xf32>, vector<128x128xf32>, vector<128x128xf32> -> vector<128x128xf32>
    %c2_114 = arith.constant 2 : index
    %c0_115 = arith.constant 0 : index
    %c0_116 = arith.constant 0 : index
    %235 = vector.load %arg13[%c2_114, %c0_115, %c0_116] : memref<3x1x128xf32, #tpu.memory_space<vmem>>, vector<1x1x128xf32>
    %236 = vector.shape_cast %235 : vector<1x1x128xf32> to vector<1x128xf32>
    %237 = vector.broadcast %236 : vector<1x128xf32> to vector<128x128xf32>
    %238 = arith.addf %234, %237 : vector<128x128xf32>
    %239 = arith.addf %238, %170 : vector<128x128xf32>
    %240 = arith.addf %239, %99 : vector<128x128xf32>
    %cst_117 = arith.constant 0.000000e+00 : f32
    %241 = vector.broadcast %cst_117 : f32 to vector<128x128xf32>
    %242 = arith.maximumf %240, %241 : vector<128x128xf32>
    %c0_118 = arith.constant 0 : index
    %c0_119 = arith.constant 0 : index
    %243 = vector.load %arg15[%c0_118, %c0_119] : memref<128x128xf32, #tpu.memory_space<vmem>>, vector<128x128xf32>
    tpu.vector_store %arg15[%c0_118, %c0_119], %242 {strides = array<i32>} : memref<128x128xf32, #tpu.memory_space<vmem>>, vector<128x128xf32>,
    return
  }
}

</mosaic_0001>

<bundles_post_ra>
// kernel: graph_network_forward.1
= control target key start
LH: loop header
LB: loop body
LE: loop exit
PB: predicated region body
PF: predicated region fallthrough
CT: control target
= control target key end

     0   :  { %20 = vsyncpa [#allocation3], 0  ;;  %s7003_s0 = inlined_call_operand.vmem [shape: f32[128,256], index: 0, kind: input, shape index: {}]   ;;  %s7004_s1 = inlined_call_operand.vmem [shape: f32[256,128], index: 1, kind: input, shape index: {}]   ;;  %s7005_s2 = inlined_call_operand.vmem [shape: f32[1,128], index: 2, kind: input, shape index: {}]   ;;  %s7006_s3 = inlined_call_operand.vmem [shape: f32[128,256], index: 3, kind: input, shape index: {}]   ;;  %s7007_s4 = inlined_call_operand.hbm [shape: f32[256,128], index: 4, kind: input, shape index: {}]   ;;  %s7008_s5 = inlined_call_operand.vmem [shape: f32[1,128], index: 5, kind: input, shape index: {}]   ;;  %s7009_s6 = inlined_call_operand.vmem [shape: s32[128,1], index: 6, kind: input, shape index: {}]   ;;  %s7010_s7 = inlined_call_operand.vmem [shape: s32[1,128], index: 7, kind: input, shape index: {}]   ;;  %s7011_s8 = inlined_call_operand.vmem [shape: f32[3,128,128], index: 8, kind: input, shape index: {}]   ;;  %s7012_s9 = inlined_call_operand.vmem [shape: f32[3,1,128], index: 9, kind: input, shape index: {}]   ;;  %s7013_s10 = inlined_call_operand.vmem [shape: f32[3,1,128], index: 10, kind: input, shape index: {}]   ;;  %s7014_s11 = inlined_call_operand.vmem [shape: f32[3,1,128], index: 11, kind: input, shape index: {}]   ;;  %s7015_s12 = inlined_call_operand.vmem [shape: f32[3,128,128], index: 12, kind: input, shape index: {}]   ;;  %s7016_s13 = inlined_call_operand.vmem [shape: f32[3,1,128], index: 13, kind: input, shape index: {}]   ;;  %s7017_s14 = inlined_call_operand.vmem [shape: f32[3], index: 14, kind: input, shape index: {}]   ;;  %s7018_s15 = inlined_call_operand.vmem [shape: f32[128,128], index: 15, kind: output, shape index: {}]  }
   0x1   :  { %s34_s20 = sshll.u32 %s7007_s4, 4  ;;  %s35_s20 = int_to_ptr.hbm [resolvable:$true] %s34_s20 }
   0x2   :  { %21 = vsyncpa [#allocation4], 0  ;;  %s4328_s21 = smov [#allocation2]   ;;  %s66_s25 = sshll.u32 %s7017_s14, 4  ;;  %s67_s25 = int_to_ptr.vmem [resolvable:$true] %s66_s25 }
   0x3   :  { %s36_s22 = sshll.u32 %s4328_s21, 4  ;;  %s4329_s26 = smov 128   ;;  %s37_s22 = int_to_ptr.vmem [resolvable:$true] %s36_s22 }
   0x4   :  { %s4330_s27 = smov 8   ;;  %s4331_s28 = smov [#allocation5]  }
   0x5   :  { %42 = dma.hbm_to_vmem [thread:$0]  %s35_s20, 4096, %s37_s22, [#allocation3], %s4329_s26, %s4329_s26, %s4330_s27  }
   0x6   :  { %69 = dma.vmem_to_smem %s67_s25, 16, %s4331_s28, [#allocation4]  }
   0x7   :  { %4324 = dma.done.wait [#allocation3], 4096  }
   0x8   :  { %4325 = vsyncadd [#allocation3], 4294963200 }
   0x9   :  { %4326 = dma.done.wait [#allocation4], 16  }
   0xa   :  { %4327 = vsyncadd [#allocation4], 4294967280 }
   0xb   :  { %78 = sfence }
   0xc   :  { %v126_v0 = vld [vmem:[%s7004_s1 + $0x78] sm:$0xff]  ;;  %v125_v1 = vld [vmem:[%s7004_s1 + $0x70] sm:$0xff]  ;;  %v124_v3 = vld [vmem:[%s7004_s1 + $0x68] sm:$0xff]  ;;  %v4332_v58 = vmov 0   ;;  %s3859_s17 = sld [smem:[#allocation5 + $0x2]] }
   0xd   :  { %3928 = vmatpush.msra.mxu3 %v126_v0  ;;  %v4429_v2 = vld [vmem:[%s7004_s1 + $0xf8] sm:$0xff]  ;;  %147 = vmatpush.msra.mxu0 %v126_v0  ;;  %v4438_v4 = vld [vmem:[%s7004_s1 + $0xf0] sm:$0xff]  ;;  %v4443_v5 = vld [vmem:[%s7004_s1 + $0xe8] sm:$0xff] }
   0xe   :  { %3944 = vmatpush.msra.mxu1 %v4429_v2  ;;  %v123_v6 = vld [vmem:[%s7004_s1 + $0x60] sm:$0xff]  ;;  %v122_v8 = vld [vmem:[%s7004_s1 + $0x58] sm:$0xff]  ;;  %v121_v10 = vld [vmem:[%s7004_s1 + $0x50] sm:$0xff]  ;;  %3982 = vset.pattern.permute.xlu0 %v4332_v58 }
   0xf   :  { %3929 = vmatpush.msra.mxu3 %v125_v1  ;;  %148 = vmatpush.msra.mxu0 %v125_v1  ;;  %v4452_v7 = vld [vmem:[%s7004_s1 + $0xe0] sm:$0xff]  ;;  %v4461_v9 = vld [vmem:[%s7004_s1 + $0xd8] sm:$0xff]  ;;  %v4470_v11 = vld [vmem:[%s7004_s1 + $0xd0] sm:$0xff] }
  0x10   :  { %3945 = vmatpush.msra.mxu1 %v4438_v4  ;;  %v120_v12 = vld [vmem:[%s7004_s1 + $0x48] sm:$0xff]  ;;  %v119_v13 = vld [vmem:[%s7004_s1 + $0x40] sm:$0xff]  ;;  %v118_v16 = vld [vmem:[%s7004_s1 + $0x38] sm:$0xff]  ;;  %3983 = vset.pattern.permute.xlu1 %v4332_v58 }
  0x11   :  { %3930 = vmatpush.msra.mxu3 %v124_v3  ;;  %149 = vmatpush.msra.mxu0 %v124_v3  ;;  %v4482_v14 = vld [vmem:[%s7004_s1 + $0xc8] sm:$0xff]  ;;  %v4487_v15 = vld [vmem:[%s7004_s1 + $0xc0] sm:$0xff]  ;;  %v4497_v17 = vld [vmem:[%s7004_s1 + $0xb8] sm:$0xff] }
  0x12   :  { %3946 = vmatpush.msra.mxu1 %v4443_v5  ;;  %v117_v18 = vld [vmem:[%s7004_s1 + $0x30] sm:$0xff]  ;;  %v116_v20 = vld [vmem:[%s7004_s1 + $0x28] sm:$0xff]  ;;  %v115_v22 = vld [vmem:[%s7004_s1 + $0x20] sm:$0xff]  ;;  %3984 = vset.pattern.permute.xlu2 %v4332_v58 }
  0x13   :  { %3931 = vmatpush.msra.mxu3 %v123_v6  ;;  %150 = vmatpush.msra.mxu0 %v123_v6  ;;  %v133_v19 = vld [vmem:[%s7004_s1 + $0xb0] sm:$0xff]  ;;  %v132_v21 = vld [vmem:[%s7004_s1 + $0xa8] sm:$0xff]  ;;  %v131_v23 = vld [vmem:[%s7004_s1 + $0xa0] sm:$0xff] }
  0x14   :  { %3947 = vmatpush.msra.mxu1 %v4452_v7  ;;  %v114_v24 = vld [vmem:[%s7004_s1 + $0x18] sm:$0xff]  ;;  %v113_v26 = vld [vmem:[%s7004_s1 + $0x10] sm:$0xff]  ;;  %v112_v28 = vld [vmem:[%s7004_s1 + $0x8] sm:$0xff] }
  0x15   :  { %3932 = vmatpush.msra.mxu3 %v122_v8  ;;  %151 = vmatpush.msra.mxu0 %v122_v8  ;;  %v130_v25 = vld [vmem:[%s7004_s1 + $0x98] sm:$0xff]  ;;  %v129_v27 = vld [vmem:[%s7004_s1 + $0x90] sm:$0xff]  ;;  %v128_v29 = vld [vmem:[%s7004_s1 + $0x88] sm:$0xff] }
  0x16   :  { %3948 = vmatpush.msra.mxu1 %v4461_v9  ;;  %v111_v30 = vld [vmem:[%s7004_s1] sm:$0xff]  ;;  %v88_v33 = vld [vmem:[%s7003_s0 + $0x48] sm:$0xff]  ;;  %v89_v35 = vld [vmem:[%s7003_s0 + $0x50] sm:$0xff] }
  0x17   :  { %3933 = vmatpush.msra.mxu3 %v121_v10  ;;  %152 = vmatpush.msra.mxu0 %v121_v10  ;;  %v87_v31 = vld [vmem:[%s7003_s0 + $0x40] sm:$0xff]  ;;  %v90_v36 = vld [vmem:[%s7003_s0 + $0x58] sm:$0xff]  ;;  %v81_v37 = vld [vmem:[%s7003_s0 + $0x10] sm:$0xff] }
  0x18   :  { %3949 = vmatpush.msra.mxu1 %v4470_v11  ;;  %v127_v32 = vld [vmem:[%s7004_s1 + $0x80] sm:$0xff]  ;;  %v92_v39 = vld [vmem:[%s7003_s0 + $0x68] sm:$0xff]  ;;  %v93_v41 = vld [vmem:[%s7003_s0 + $0x70] sm:$0xff] }
  0x19   :  { %3934 = vmatpush.msra.mxu3 %v120_v12  ;;  %153 = vmatpush.msra.mxu0 %v120_v12  ;;  %v79_v34 = vld [vmem:[%s7003_s0] sm:$0xff]  ;;  %v94_v42 = vld [vmem:[%s7003_s0 + $0x78] sm:$0xff]  ;;  %v85_v43 = vld [vmem:[%s7003_s0 + $0x30] sm:$0xff] }
  0x1a   :  { %3950 = vmatpush.msra.mxu1 %v4482_v14  ;;  %v91_v38 = vld [vmem:[%s7003_s0 + $0x60] sm:$0xff]  ;;  %v96_v45 = vld [vmem:[%s7003_s0 + $0x88] sm:$0xff]  ;;  %v97_v47 = vld [vmem:[%s7003_s0 + $0x90] sm:$0xff] }
  0x1b   :  { %3935 = vmatpush.msra.mxu3 %v119_v13  ;;  %154 = vmatpush.msra.mxu0 %v119_v13  ;;  %v83_v40 = vld [vmem:[%s7003_s0 + $0x20] sm:$0xff]  ;;  %v80_v46 = vld [vmem:[%s7003_s0 + $0x8] sm:$0xff]  ;;  %v98_v48 = vld [vmem:[%s7003_s0 + $0x98] sm:$0xff] }
  0x1c   :  { %3951 = vmatpush.msra.mxu1 %v4487_v15  ;;  %v95_v44 = vld [vmem:[%s7003_s0 + $0x80] sm:$0xff]  ;;  %v82_v49 = vld [vmem:[%s7003_s0 + $0x18] sm:$0xff]  ;;  %v100_v51 = vld [vmem:[%s7003_s0 + $0xa8] sm:$0xff] }
  0x1d   :  { %3936 = vmatpush.msra.mxu3 %v118_v16  ;;  %155 = vmatpush.msra.mxu0 %v118_v16  ;;  %v99_v50 = vld [vmem:[%s7003_s0 + $0xa0] sm:$0xff]  ;;  %v84_v52 = vld [vmem:[%s7003_s0 + $0x28] sm:$0xff]  ;;  %v101_v53 = vld [vmem:[%s7003_s0 + $0xb0] sm:$0xff] }
  0x1e   :  { %3952 = vmatpush.msra.mxu1 %v4497_v17  ;;  %v102_v54 = vld [vmem:[%s7003_s0 + $0xb8] sm:$0xff]  ;;  %v509_v56 = vld [vmem:[%s7009_s6] sm:$0xff]  ;;  %v511_v57 = vld [vmem:[%s7009_s6 + $0x10] sm:$0xff] }
  0x1f   :  { %3937 = vmatpush.msra.mxu3 %v117_v18  ;;  %156 = vmatpush.msra.mxu0 %v117_v18  ;;  %v86_v55 = vld [vmem:[%s7003_s0 + $0x38] sm:$0xff]  ;;  %v513_v59 = vld [vmem:[%s7009_s6 + $0x20] sm:$0xff]  ;;  %v104_v61 = vld [vmem:[%s7003_s0 + $0xc8] sm:$0xff] }
  0x20   :  { %3953 = vmatpush.msra.mxu1 %v133_v19  ;;  %526 = vperm.xlu0 %3982, %v509_v56   ;;  %v103_v60 = vld [vmem:[%s7003_s0 + $0xc0] sm:$0xff]  ;;  %v510_v62 = vld [vmem:[%s7009_s6 + $0x8] sm:$0xff]  ;;  %v512_v63 = vld [vmem:[%s7009_s6 + $0x18] sm:$0xff] }
  0x21   :  { %3938 = vmatpush.msra.mxu3 %v116_v20  ;;  %157 = vmatpush.msra.mxu0 %v116_v20  ;;  %v105_v0 = vld [vmem:[%s7003_s0 + $0xd0] sm:$0xff]  ;;  %v106_v1 = vld [vmem:[%s7003_s0 + $0xd8] sm:$0xff]  ;;  %v518_v6 = vld [vmem:[%s7009_s6 + $0x48] sm:$0xff] }
  0x22   :  { %3954 = vmatpush.msra.mxu1 %v132_v21  ;;  %532 = vperm.xlu1 %3983, %v511_v57   ;;  %v516_v3 = vld [vmem:[%s7009_s6 + $0x38] sm:$0xff]  ;;  %v109_v8 = vld [vmem:[%s7003_s0 + $0xf0] sm:$0xff]  ;;  %v521_v10 = vld [vmem:[%s7009_s6 + $0x60] sm:$0xff] }
  0x23   :  { %3939 = vmatpush.msra.mxu3 %v115_v22  ;;  %158 = vmatpush.msra.mxu0 %v115_v22  ;;  %v522_v12 = vld [vmem:[%s7009_s6 + $0x68] sm:$0xff]  ;;  %v524_v13 = vld [vmem:[%s7009_s6 + $0x78] sm:$0xff]  ;;  %v523_v16 = vld [vmem:[%s7009_s6 + $0x70] sm:$0xff] }
  0x24   :  { %3955 = vmatpush.msra.mxu1 %v131_v23  ;;  %538 = vperm.xlu2 %3984, %v513_v59   ;;  %v330_v56 = vld [vmem:[#allocation2 + $0x28] sm:$0xff]  ;;  %v344_v57 = vld [vmem:[#allocation2 + $0x98] sm:$0xff]  ;;  %v329_v58 = vld [vmem:[#allocation2 + $0x20] sm:$0xff] }
  0x25   :  { %3940 = vmatpush.msra.mxu3 %v114_v24  ;;  %159 = vmatpush.msra.mxu0 %v114_v24  ;;  %v343_v59 = vld [vmem:[#allocation2 + $0x90] sm:$0xff] }
  0x26   :  { %3956 = vmatpush.msra.mxu1 %v130_v25 }
  0x27   :  { %3941 = vmatpush.msra.mxu3 %v113_v26  ;;  %160 = vmatpush.msra.mxu0 %v113_v26  ;;  %v356_v26 = vld [vmem:[#allocation2 + $0xf8] sm:$0xff] }
  0x28   :  { %3957 = vmatpush.msra.mxu1 %v129_v27  ;;  %529 = vperm.xlu0 %3982, %v510_v62   ;;  %v342_v62 = vld [vmem:[#allocation2 + $0x88] sm:$0xff] }
  0x29   :  { %3942 = vmatpush.msra.mxu3 %v112_v28  ;;  %161 = vmatpush.msra.mxu0 %v112_v28 }
  0x2a   :  { %3958 = vmatpush.msra.mxu1 %v128_v29  ;;  %535 = vperm.xlu1 %3983, %v512_v63  }
  0x2b   :  { %3943 = vmatpush.msra.mxu3 %v111_v30  ;;  %162 = vmatpush.msra.mxu0 %v111_v30  ;;  %v354_v30 = vld [vmem:[#allocation2 + $0xe8] sm:$0xff] }
  0x2c   :  { %175 = vmatmul.f32.vlgmr.msra.gmra.mxu3 %v87_v31  ;;  %3959 = vmatpush.msra.mxu1 %v127_v32  ;;  %v339_v31 = vld [vmem:[#allocation2 + $0x70] sm:$0xff] }
  0x2d   :  { %240 = vmatmul.f32.vlgmr.msra.gmra.mxu1 %v88_v33  ;;  %163 = vmatmul.f32.vlgmr.msra.gmra.mxu0 %v79_v34  ;;  %v338_v34 = vld [vmem:[#allocation2 + $0x68] sm:$0xff] }
  0x2e   :  { %212 = vmatpush.msrb.mxu0 %v4429_v2  ;;  %v515_v2 = vld [vmem:[%s7009_s6 + $0x30] sm:$0xff]  ;;  %426 = vmatpush.msrb.mxu3 %v356_v26 }
  0x30   :  { %213 = vmatpush.msrb.mxu0 %v4438_v4  ;;  %544 = vperm.xlu0 %3982, %v515_v2   ;;  %v107_v4 = vld [vmem:[%s7003_s0 + $0xe0] sm:$0xff] }
  0x32   :  { %214 = vmatpush.msrb.mxu0 %v4443_v5  ;;  %547 = vperm.xlu1 %3983, %v516_v3   ;;  %v108_v5 = vld [vmem:[%s7003_s0 + $0xe8] sm:$0xff] }
  0x33   :  { %v294_v3 = vld [vmem:[%s7006_s3 + $0x8] sm:$0xff] }
  0x34   :  { %178 = vmatmul.f32.gmra.mxu3 %v89_v35  ;;  %215 = vmatpush.msrb.mxu0 %v4452_v7  ;;  %v519_v7 = vld [vmem:[%s7009_s6 + $0x50] sm:$0xff]  ;;  %v352_v35 = vld [vmem:[#allocation2 + $0xd8] sm:$0xff] }
  0x35   :  { %243 = vmatmul.f32.gmra.mxu1 %v90_v36  ;;  %166 = vmatmul.f32.gmra.mxu0 %v81_v37  ;;  %v337_v37 = vld [vmem:[#allocation2 + $0x60] sm:$0xff] }
  0x36   :  { %216 = vmatpush.msrb.mxu0 %v4461_v9  ;;  %v110_v9 = vld [vmem:[%s7003_s0 + $0xf8] sm:$0xff] }
  0x38   :  { %217 = vmatpush.msrb.mxu0 %v4470_v11  ;;  %553 = vperm.xlu0 %3982, %v518_v6   ;;  %v514_v11 = vld [vmem:[%s7009_s6 + $0x28] sm:$0xff]  ;;  %v293_v6 = vld [vmem:[%s7006_s3] sm:$0xff] }
  0x39   :  { %541 = vperm.xlu2 %3984, %v514_v11   ;;  %v295_v11 = vld [vmem:[%s7006_s3 + $0x10] sm:$0xff] }
  0x3a   :  { %218 = vmatpush.msrb.mxu0 %v4482_v14  ;;  %556 = vperm.xlu1 %3983, %v519_v7   ;;  %v517_v14 = vld [vmem:[%s7009_s6 + $0x40] sm:$0xff] }
  0x3c   :  { %181 = vmatmul.f32.gmra.mxu3 %v91_v38  ;;  %219 = vmatpush.msrb.mxu0 %v4487_v15  ;;  %v520_v15 = vld [vmem:[%s7009_s6 + $0x58] sm:$0xff]  ;;  %v351_v38 = vld [vmem:[#allocation2 + $0xd0] sm:$0xff] }
  0x3d   :  { %246 = vmatmul.f32.gmra.mxu1 %v92_v39  ;;  %169 = vmatmul.f32.gmra.mxu0 %v83_v40  ;;  %v336_v40 = vld [vmem:[#allocation2 + $0x58] sm:$0xff] }
  0x3e   :  { %220 = vmatpush.msrb.mxu0 %v4497_v17 }
  0x40   :  { %221 = vmatpush.msrb.mxu0 %v133_v19  ;;  %562 = vperm.xlu0 %3982, %v521_v10  }
  0x41   :  { %550 = vperm.xlu2 %3984, %v517_v14  }
  0x42   :  { %222 = vmatpush.msrb.mxu0 %v132_v21  ;;  %565 = vperm.xlu1 %3983, %v522_v12  }
  0x44   :  { %184 = vmatmul.f32.gmra.mxu3 %v93_v41  ;;  %223 = vmatpush.msrb.mxu0 %v131_v23  ;;  %v350_v41 = vld [vmem:[#allocation2 + $0xc8] sm:$0xff] }
  0x45   :  { %249 = vmatmul.f32.gmra.mxu1 %v94_v42  ;;  %172 = vmatmul.f32.gmra.mxu0 %v85_v43  ;;  %v335_v42 = vld [vmem:[#allocation2 + $0x50] sm:$0xff]  ;;  %v349_v43 = vld [vmem:[#allocation2 + $0xc0] sm:$0xff] }
  0x46   :  { %224 = vmatpush.msrb.mxu0 %v130_v25 }
  0x48   :  { %225 = vmatpush.msrb.mxu0 %v129_v27  ;;  %571 = vperm.xlu0 %3982, %v524_v13   ;;  %v355_v27 = vld [vmem:[#allocation2 + $0xf0] sm:$0xff]  ;;  %v298_v13 = vld [vmem:[%s7006_s3 + $0x28] sm:$0xff] }
  0x49   :  { %559 = vperm.xlu2 %3984, %v520_v15   ;;  %427 = vmatpush.msrb.mxu3 %v355_v27  ;;  %v297_v15 = vld [vmem:[%s7006_s3 + $0x20] sm:$0xff]  ;;  %v300_v27 = vld [vmem:[%s7006_s3 + $0x38] sm:$0xff] }
  0x4a   :  { %226 = vmatpush.msrb.mxu0 %v128_v29  ;;  %v340_v29 = vld [vmem:[#allocation2 + $0x78] sm:$0xff] }
  0x4b   :  { %428 = vmatpush.msrb.mxu3 %v354_v30  ;;  %3960 = vmatpush.msra.mxu2 %v340_v29 }
  0x4c   :  { %187 = vmatmul.f32.gmra.mxu3 %v95_v44  ;;  %227 = vmatpush.msrb.mxu0 %v127_v32  ;;  %v353_v32 = vld [vmem:[#allocation2 + $0xe0] sm:$0xff] }
  0x4d   :  { %252 = vmatmul.f32.gmra.mxu1 %v96_v45  ;;  %228 = vmatmul.f32.vlgmr.msrb.gmra.mxu0 %v80_v46  ;;  %v334_v45 = vld [vmem:[#allocation2 + $0x48] sm:$0xff]  ;;  %v348_v46 = vld [vmem:[#allocation2 + $0xb8] sm:$0xff] }
  0x4e   :  { %361 = vmatpush.msra.mxu0 %v340_v29  ;;  %429 = vmatpush.msrb.mxu3 %v353_v32  ;;  %v3985_v29 = vld [vmem:[%s7005_s2] ss:$0 sm:$0xff] }
  0x4f   :  { %3961 = vmatpush.msra.mxu2 %v339_v31 }
  0x50   :  { %362 = vmatpush.msra.mxu0 %v339_v31  ;;  %430 = vmatpush.msrb.mxu3 %v352_v35  ;;  %v299_v31 = vld [vmem:[%s7006_s3 + $0x30] sm:$0xff] }
  0x51   :  { %568 = vperm.xlu2 %3984, %v523_v16   ;;  %3962 = vmatpush.msra.mxu2 %v338_v34 }
  0x52   :  { %363 = vmatpush.msra.mxu0 %v338_v34  ;;  %431 = vmatpush.msrb.mxu3 %v351_v38 }
  0x53   :  { %3963 = vmatpush.msra.mxu2 %v337_v37 }
  0x54   :  { %190 = vmatmul.f32.gmra.mxu3 %v97_v47  ;;  %364 = vmatpush.msra.mxu0 %v337_v37  ;;  %v333_v47 = vld [vmem:[#allocation2 + $0x40] sm:$0xff] }
  0x55   :  { %255 = vmatmul.f32.gmra.mxu1 %v98_v48  ;;  %231 = vmatmul.f32.gmra.mxu0 %v82_v49  ;;  %v347_v48 = vld [vmem:[#allocation2 + $0xb0] sm:$0xff] }
  0x56   :  { %365 = vmatpush.msra.mxu0 %v336_v40  ;;  %432 = vmatpush.msrb.mxu3 %v350_v41 }
  0x57   :  { %3964 = vmatpush.msra.mxu2 %v336_v40 }
  0x58   :  { %366 = vmatpush.msra.mxu0 %v335_v42  ;;  %433 = vmatpush.msrb.mxu3 %v349_v43 }
  0x59   :  { %3965 = vmatpush.msra.mxu2 %v335_v42 }
  0x5a   :  { %367 = vmatpush.msra.mxu0 %v334_v45  ;;  %434 = vmatpush.msrb.mxu3 %v348_v46 }
  0x5b   :  { %3966 = vmatpush.msra.mxu2 %v334_v45 }
  0x5c   :  { %193 = vmatmul.f32.gmra.mxu3 %v99_v50  ;;  %368 = vmatpush.msra.mxu0 %v333_v47 }
  0x5d   :  { %258 = vmatmul.f32.gmra.mxu1 %v100_v51  ;;  %234 = vmatmul.f32.gmra.mxu0 %v84_v52  ;;  %v332_v51 = vld [vmem:[#allocation2 + $0x38] sm:$0xff]  ;;  %v346_v52 = vld [vmem:[#allocation2 + $0xa8] sm:$0xff] }
  0x5e   :  { %435 = vmatpush.msrb.mxu3 %v347_v48  ;;  %3967 = vmatpush.msra.mxu2 %v333_v47 }
  0x5f   :  { %369 = vmatpush.msra.mxu0 %v332_v51 }
  0x60   :  { %436 = vmatpush.msrb.mxu3 %v346_v52  ;;  %3968 = vmatpush.msra.mxu2 %v332_v51 }
  0x64   :  { %196 = vmatmul.f32.gmra.mxu3 %v101_v53  ;;  %v331_v53 = vld [vmem:[#allocation2 + $0x30] sm:$0xff] }
  0x65   :  { %261 = vmatmul.f32.gmra.mxu1 %v102_v54  ;;  %237 = vmatmul.f32.gmra.mxu0 %v86_v55  ;;  %v345_v54 = vld [vmem:[#allocation2 + $0xa0] sm:$0xff] }
  0x66   :  { %370 = vmatpush.msra.mxu0 %v331_v53  ;;  %437 = vmatpush.msrb.mxu3 %v345_v54 }
  0x67   :  { %3969 = vmatpush.msra.mxu2 %v331_v53 }
  0x68   :  { %371 = vmatpush.msra.mxu0 %v330_v56  ;;  %438 = vmatpush.msrb.mxu3 %v344_v57 }
  0x69   :  { %3970 = vmatpush.msra.mxu2 %v330_v56 }
  0x6a   :  { %372 = vmatpush.msra.mxu0 %v329_v58  ;;  %439 = vmatpush.msrb.mxu3 %v343_v59 }
  0x6b   :  { %3971 = vmatpush.msra.mxu2 %v329_v58 }
  0x6c   :  { %199 = vmatmul.f32.gmra.mxu3 %v103_v60 }
  0x6d   :  { %264 = vmatmul.f32.gmra.mxu1 %v104_v61  ;;  %v328_v61 = vld [vmem:[#allocation2 + $0x18] sm:$0xff]  ;;  %440 = vmatpush.msrb.mxu3 %v342_v62 }
  0x6e   :  { %373 = vmatpush.msra.mxu0 %v328_v61  ;;  %3972 = vmatpush.msra.mxu2 %v328_v61 }
  0x74   :  { %202 = vmatmul.f32.gmra.mxu3 %v105_v0  ;;  %v327_v0 = vld [vmem:[#allocation2 + $0x10] sm:$0xff] }
  0x75   :  { %267 = vmatmul.f32.gmra.mxu1 %v106_v1  ;;  %v341_v1 = vld [vmem:[#allocation2 + $0x80] sm:$0xff]  ;;  %374 = vmatpush.msra.mxu0 %v327_v0 }
  0x76   :  { %441 = vmatpush.msrb.mxu3 %v341_v1  ;;  %3973 = vmatpush.msra.mxu2 %v327_v0 }
  0x7c   :  { %205 = vmatmul.f32.gmra.mxu3 %v107_v4  ;;  %v326_v4 = vld [vmem:[#allocation2 + $0x8] sm:$0xff] }
  0x7d   :  { %270 = vmatmul.f32.gmra.mxu1 %v108_v5  ;;  %375 = vmatpush.msra.mxu0 %v326_v4  ;;  %v325_v5 = vld [vmem:[#allocation2] sm:$0xff] }
  0x7e   :  { %3974 = vmatpush.msra.mxu2 %v326_v4 }
  0x7f   :  { %376 = vmatpush.msra.mxu0 %v325_v5 }
  0x80   :  { %377 = vmatmul.f32.vlgmr.msra.gmra.mxu0 %v293_v6  ;;  %3975 = vmatpush.msra.mxu2 %v325_v5 }
  0x84   :  { %208 = vmatmul.f32.gmra.mxu3 %v109_v8  ;;  %v296_v8 = vld [vmem:[%s7006_s3 + $0x18] sm:$0xff] }
  0x85   :  { %273 = vmatmul.f32.gmra.mxu1 %v110_v9 }
  0x88   :  { %380 = vmatmul.f32.gmra.mxu0 %v295_v11  ;;  %v301_v11 = vld [vmem:[%s7006_s3 + $0x40] sm:$0xff] }
  0x89   :  { %389 = vmatmul.f32.vlgmr.msra.gmra.mxu2 %v301_v11 }
  0x8c   :  { %442 = vmatmul.f32.vlgmr.msrb.gmra.mxu3 %v294_v3 }
  0x90   :  { %383 = vmatmul.f32.gmra.mxu0 %v297_v15 }
  0x94   :  { %445 = vmatmul.f32.gmra.mxu3 %v296_v8 }
  0x98   :  { %386 = vmatmul.f32.gmra.mxu0 %v299_v31 }
  0x9c   :  { %448 = vmatmul.f32.gmra.mxu3 %v298_v13 }
  0xa4   :  { %451 = vmatmul.f32.gmra.mxu3 %v300_v27  ;;  %v7037_v27 = vlaneseq }
  0xaa   :  { %v4696_v17 = vpop.f32.mrf.mxu1  ;;  %v4718_v36 = vpop.f32.mrf.mxu0 }
  0xaf   :  { %v4698_v18 = vpop.f32.mrf.mxu3 }
  0xb2   :  { %v4700_v19 = vpop.f32.mrf.mxu1  ;;  %v4724_v49 = vpop.f32.mrf.mxu0 }
  0xb3   :  { %v168_v8 = vadd.f32 %v3985_v29, %v4724_v49  ;;  %v527_v49 = vpop.permute.xlu0 %526 }
  0xb7   :  { %v4702_v20 = vpop.f32.mrf.mxu3 }
  0xba   :  { %v4704_v21 = vpop.f32.mrf.mxu1  ;;  %v4730_v63 = vpop.f32.mrf.mxu0 }
  0xbb   :  { %v171_v3 = vadd.f32 %v3985_v29, %v4730_v63 }
  0xbf   :  { %v4706_v22 = vpop.f32.mrf.mxu3 }
  0xc2   :  { %v4708_v23 = vpop.f32.mrf.mxu1  ;;  %v173_v9 = vpop.f32.mrf.mxu0 }
  0xc3   :  { %v174_v4 = vadd.f32 %v3985_v29, %v173_v9 }
  0xc7   :  { %v4710_v24 = vpop.f32.mrf.mxu3 }
  0xca   :  { %v4712_v25 = vpop.f32.mrf.mxu1  ;;  %v4747_v14 = vpop.f32.mrf.mxu0 }
  0xcf   :  { %v4714_v28 = vpop.f32.mrf.mxu3 }
  0xd2   :  { %v4716_v33 = vpop.f32.mrf.mxu1  ;;  %v4761_v32 = vpop.f32.mrf.mxu0 }
  0xd3   :  { %v4855_v15 = vadd.f32 %v4761_v32, %v168_v8  ;;  %v304_v32 = vld [vmem:[%s7006_s3 + $0x58] sm:$0xff] }
  0xd4   :  { %v316_v8 = vld [vmem:[%s7006_s3 + $0xb8] sm:$0xff] }
  0xd5   :  { %v7033_v31 = vmax.f32 %v4855_v15, 0.0 }
  0xd7   :  { %v4720_v39 = vpop.f32.mrf.mxu3 }
  0xd8   :  { %v192_v52 = vadd.f32 %v3985_v29, %v4720_v39  ;;  %v186_v39 = vadd.f32 %v3985_v29, %v4710_v24  ;;  %v180_v24 = vadd.f32 %v3985_v29, %v4702_v20 }
  0xda   :  { %v4722_v44 = vpop.f32.mrf.mxu1  ;;  %v235_v59 = vpop.f32.mrf.mxu0  ;;  %v4817_v20 = vadd.f32 %v4700_v19, %v180_v24 }
  0xdb   :  { %v4832_v63 = vadd.f32 %v235_v59, %v171_v3  ;;  %v539_v24 = vpop.permute.xlu2 %538 }
  0xdc   :  { %7196 = vst [vmem:[#allocation18_spill] sm:$0xff] %v4817_v20  ;;  %v7029_v19 = vmax.f32 %v4817_v20, 0.0 }
  0xdf   :  { %v4726_v50 = vpop.f32.mrf.mxu3 }
  0xe0   :  { %v195_v46 = vadd.f32 %v3985_v29, %v4726_v50  ;;  %v189_v50 = vadd.f32 %v3985_v29, %v4714_v28  ;;  %v183_v28 = vadd.f32 %v3985_v29, %v4706_v22  ;;  %v177_v22 = vadd.f32 %v3985_v29, %v4698_v18 }
  0xe2   :  { %v4728_v55 = vpop.f32.mrf.mxu1  ;;  %v4785_v57 = vadd.f32 %v4722_v44, %v195_v46  ;;  %v4799_v44 = vadd.f32 %v4712_v25, %v189_v50  ;;  %v4813_v25 = vadd.f32 %v4704_v21, %v183_v28  ;;  %v4826_v18 = vadd.f32 %v4696_v17, %v177_v22  ;;  %v238_v21 = vpop.f32.mrf.mxu0  ;;  %v306_v46 = vld [vmem:[%s7006_s3 + $0x68] sm:$0xff]  ;;  %v308_v50 = vld [vmem:[%s7006_s3 + $0x78] sm:$0xff] }
  0xe3   :  { %v4834_v9 = vadd.f32 %v238_v21, %v174_v4  ;;  %v310_v28 = vld [vmem:[%s7006_s3 + $0x88] sm:$0xff]  ;;  %v312_v22 = vld [vmem:[%s7006_s3 + $0x98] sm:$0xff]  ;;  %v542_v3 = vpop.permute.xlu2 %541  ;;  %v7204_v4 = vmov 0 }
  0xe4   :  { %7191 = vst [vmem:[#allocation13_spill] sm:$0xff] %v4785_v57  ;;  %v7024_v62 = vmax.f32 %v4785_v57, 0.0  ;;  %v7028_v6 = vmax.f32 %v4813_v25, 0.0  ;;  %v314_v21 = vld [vmem:[%s7006_s3 + $0xa8] sm:$0xff] }
  0xe5   :  { %7193 = vst [vmem:[#allocation15_spill] sm:$0xff] %v4799_v44 }
  0xe6   :  { %7195 = vst [vmem:[#allocation17_spill] sm:$0xff] %v4813_v25 }
  0xe7   :  { %v197_v60 = vpop.f32.mrf.mxu3  ;;  %7197 = vst [vmem:[#allocation19_spill] sm:$0xff] %v4826_v18 }
  0xe8   :  { %v198_v42 = vadd.f32 %v3985_v29, %v197_v60 }
  0xea   :  { %v265_v2 = vpop.f32.mrf.mxu1  ;;  %v4776_v53 = vadd.f32 %v4728_v55, %v198_v42  ;;  %v4790_v55 = vadd.f32 %v4716_v33, %v192_v52  ;;  %v4804_v33 = vadd.f32 %v4708_v23, %v186_v39  ;;  %v305_v42 = vld [vmem:[%s7006_s3 + $0x60] sm:$0xff]  ;;  %v533_v52 = vpop.permute.xlu1 %532  ;;  %v7201_v39 = vmov 0 }
  0xec   :  { %7190 = vst [vmem:[#allocation12_spill] sm:$0xff] %v4776_v53  ;;  %v7023_v60 = vmax.f32 %v4776_v53, 0.0  ;;  %v7025_v0 = vmax.f32 %v4790_v55, 0.0  ;;  %v7027_v23 = vmax.f32 %v4804_v33, 0.0 }
  0xed   :  { %7192 = vst [vmem:[#allocation14_spill] sm:$0xff] %v4790_v55 }
  0xee   :  { %7194 = vst [vmem:[#allocation16_spill] sm:$0xff] %v4804_v33  ;;  %v709_v1 = vpack.c.bf16 %v7023_v60, %v7024_v62  ;;  %v707_v17 = vpack.c.bf16 %v7027_v23, %v7028_v6 }
  0xef   :  { %v200_v7 = vpop.f32.mrf.mxu3 }
  0xf0   :  { %v201_v38 = vadd.f32 %v3985_v29, %v200_v7  ;;  %v165_v7 = vadd.f32 %v3985_v29, %v4718_v36  ;;  %v302_v36 = vld [vmem:[%s7006_s3 + $0x48] sm:$0xff] }
  0xf1   :  { %454 = vmatmul.f32.gmra.mxu3 %v302_v36  ;;  %v7207_v36 = vmov 0 }
  0xf2   :  { %v268_v10 = vpop.f32.mrf.mxu1  ;;  %v4770_v47 = vadd.f32 %v265_v2, %v201_v38  ;;  %v7026_v2 = vmax.f32 %v4799_v44, 0.0  ;;  %v4852_v13 = vadd.f32 %v4747_v14, %v165_v7  ;;  %v7198_v38 = vmov 0  ;;  %v536_v59 = vpop.permute.xlu1 %535  ;;  %v315_v7 = vld [vmem:[%s7006_s3 + $0xb0] sm:$0xff] }
  0xf4   :  { %7189 = vst [vmem:[#allocation11_spill] sm:$0xff] %v4770_v47  ;;  %v7022_v58 = vmax.f32 %v4770_v47, 0.0  ;;  %v708_v5 = vpack.c.bf16 %v7025_v0, %v7026_v2 }
  0xf7   :  { %v203_v12 = vpop.f32.mrf.mxu3 }
  0xf8   :  { %v204_v34 = vadd.f32 %v3985_v29, %v203_v12 }
  0xf9   :  { %457 = vmatmul.f32.gmra.mxu3 %v304_v32  ;;  %v551_v32 = vpop.permute.xlu2 %550 }
  0xfa   :  { %v271_v16 = vpop.f32.mrf.mxu1  ;;  %v4765_v43 = vadd.f32 %v268_v10, %v204_v34  ;;  %v7030_v10 = vmax.f32 %v4826_v18, 0.0  ;;  %v4872_v34 = vand.u32 127, %v7037_v27  ;;  %v548_v11 = vpop.permute.xlu1 %547 }
  0xfc   :  { %7187 = vst [vmem:[#allocation9_spill] sm:$0xff] %v4765_v43  ;;  %v7021_v54 = vmax.f32 %v4765_v43, 0.0  ;;  %v706_v12 = vpack.c.bf16 %v7029_v19, %v7030_v10  ;;  %vm573_vm0 = vcmp.eq.s32.totalorder %v4872_v34, %v527_v49  ;;  %vm575_vm3 = vcmp.eq.s32.totalorder %v4872_v34, %v533_v52  ;;  %v317_v49 = vld [vmem:[%s7006_s3 + $0xc0] sm:$0xff]  ;;  %v323_v52 = vld [vmem:[%s7006_s3 + $0xf0] sm:$0xff] }
  0xfd   :  { %vm576_vm4 = vcmp.eq.s32.totalorder %v4872_v34, %v536_v59  ;;  %vm577_vm6 = vcmp.eq.s32.totalorder %v4872_v34, %v539_v24  ;;  %vm578_vm7 = vcmp.eq.s32.totalorder %v4872_v34, %v542_v3  ;;  %vm580_vm10 = vcmp.eq.s32.totalorder %v4872_v34, %v548_v11 }
  0xfe   :  { %v710_v61 = vpack.c.bf16 %v7021_v54, %v7022_v58  ;;  %vm4901_vm5 = vmpackc.low %vm576_vm4, %vm575_vm3  ;;  %vm581_vm12 = vcmp.eq.s32.totalorder %v4872_v34, %v551_v32  ;;  %v7216_v3 = vmov 0 }
  0xff   :  { %v206_v26 = vpop.f32.mrf.mxu3  ;;  %v7202_v39 = vsel %vm4901_vm5, 4294967295, %v7201_v39  ;;  %vm4922_vm8 = vmpackc.low %vm578_vm7, %vm577_vm6 }
 0x100   :  { %v207_v30 = vadd.f32 %v3985_v29, %v206_v26  ;;  %v7031_v26 = vmax.f32 %v4834_v9, 0.0  ;;  %7203 = vst [vmem:[#allocation21_spill] sm:$0xff] %v7202_v39  ;;  %v7205_v4 = vsel %vm4922_vm8, 4294967295, %v7204_v4 }
 0x101   :  { %460 = vmatmul.f32.gmra.mxu3 %v306_v46  ;;  %7206 = vst [vmem:[#allocation22_spill] sm:$0xff] %v7205_v4  ;;  %v322_v46 = vld [vmem:[%s7006_s3 + $0xe8] sm:$0xff] }
 0x102   :  { %v274_v37 = vpop.f32.mrf.mxu1  ;;  %v4763_v40 = vadd.f32 %v271_v16, %v207_v30  ;;  %v7032_v16 = vmax.f32 %v4832_v63, 0.0  ;;  %v7034_v30 = vmax.f32 %v4852_v13, 0.0  ;;  %v557_v59 = vpop.permute.xlu1 %556 }
 0x104   :  { %7186 = vst [vmem:[#allocation8_spill] sm:$0xff] %v4763_v40  ;;  %v7020_v48 = vmax.f32 %v4763_v40, 0.0  ;;  %v705_v14 = vpack.c.bf16 %v7031_v26, %v7032_v16 }
 0x107   :  { %v209_v35 = vpop.f32.mrf.mxu3 }
 0x108   :  { %v210_v41 = vadd.f32 %v3985_v29, %v209_v35  ;;  %v303_v29 = vld [vmem:[%s7006_s3 + $0x50] sm:$0xff]  ;;  %v530_v35 = vpop.permute.xlu0 %529 }
 0x109   :  { %392 = vmatmul.f32.gmra.mxu2 %v303_v29  ;;  %vm574_vm1 = vcmp.eq.s32.totalorder %v4872_v34, %v530_v35  ;;  %463 = vmatmul.f32.gmra.mxu3 %v308_v50  ;;  %v319_v29 = vld [vmem:[%s7006_s3 + $0xd0] sm:$0xff]  ;;  %v560_v50 = vpop.permute.xlu2 %559 }
 0x10a   :  { %v4767_v45 = vadd.f32 %v274_v37, %v210_v41  ;;  %v704_v37 = vpack.c.bf16 %v7033_v31, %v7034_v30  ;;  %vm4880_vm2 = vmpackc.low %vm574_vm1, %vm573_vm0  ;;  %v7035_v41 = vmov 1.0|1.0   ;;  %vm584_vm15 = vcmp.eq.s32.totalorder %v4872_v34, %v560_v50 }
 0x10b   :  { %v7199_v38 = vsel %vm4880_vm2, 4294967295, %v7198_v38  ;;  %vm583_vm0 = vcmp.eq.s32.totalorder %v4872_v34, %v557_v59 }
 0x10c   :  { %7188 = vst [vmem:[#allocation10_spill] sm:$0xff] %v4767_v45  ;;  %v7019_v51 = vmax.f32 %v4767_v45, 0.0  ;;  %vm4985_vm1 = vmpackc.low %vm584_vm15, %vm583_vm0 }
 0x10d   :  { %7200 = vst [vmem:[#allocation20_spill] sm:$0xff] %v7199_v38 }
 0x10e   :  { %v711_v56 = vpack.c.bf16 %v7019_v51, %v7020_v48 }
 0x10f   :  { %v443_v24 = vpop.f32.mrf.mxu3 }
 0x110   :  { %712 = vmatpush.bf16.msrb.mxu0 %v711_v56  ;;  %v307_v56 = vld [vmem:[%s7006_s3 + $0x70] sm:$0xff] }
 0x111   :  { %395 = vmatmul.f32.gmra.mxu2 %v305_v42  ;;  %466 = vmatmul.f32.gmra.mxu3 %v310_v28  ;;  %v321_v42 = vld [vmem:[%s7006_s3 + $0xe0] sm:$0xff]  ;;  %v378_v28 = vpop.f32.mrf.mxu0 }
 0x114   :  { %713 = vmatpush.bf16.msrb.mxu0 %v710_v61  ;;  %v309_v61 = vld [vmem:[%s7006_s3 + $0x80] sm:$0xff] }
 0x118   :  { %714 = vmatpush.bf16.msrb.mxu0 %v709_v1  ;;  %v311_v1 = vld [vmem:[%s7006_s3 + $0x90] sm:$0xff] }
 0x119   :  { %398 = vmatmul.f32.gmra.mxu2 %v307_v56  ;;  %469 = vmatmul.f32.gmra.mxu3 %v312_v22  ;;  %v324_v56 = vld [vmem:[%s7006_s3 + $0xf8] sm:$0xff] }
 0x11c   :  { %715 = vmatpush.bf16.msrb.mxu0 %v708_v5  ;;  %v313_v5 = vld [vmem:[%s7006_s3 + $0xa0] sm:$0xff] }
 0x120   :  { %716 = vmatpush.bf16.msrb.mxu0 %v707_v17  ;;  %v545_v17 = vpop.permute.xlu0 %544 }
 0x121   :  { %401 = vmatmul.f32.gmra.mxu2 %v309_v61  ;;  %472 = vmatmul.f32.gmra.mxu3 %v314_v21  ;;  %vm579_vm9 = vcmp.eq.s32.totalorder %v4872_v34, %v545_v17  ;;  %v7213_v61 = vmov 0  ;;  %v5001_v21 = vpop.f32.mrf.mxu3 }
 0x122   :  { %vm4943_vm11 = vmpackc.low %vm580_vm10, %vm579_vm9  ;;  %v7214_v61 = vsel %vm4985_vm1, 4294967295, %v7213_v61 }
 0x123   :  { %v7208_v36 = vsel %vm4943_vm11, 4294967295, %v7207_v36  ;;  %7215 = vst [vmem:[#allocation25_spill] sm:$0xff] %v7214_v61 }
 0x124   :  { %717 = vmatpush.bf16.msrb.mxu0 %v706_v12  ;;  %7209 = vst [vmem:[#allocation23_spill] sm:$0xff] %v7208_v36  ;;  %v318_v12 = vld [vmem:[%s7006_s3 + $0xc8] sm:$0xff] }
 0x128   :  { %718 = vmatpush.bf16.msrb.mxu0 %v705_v14  ;;  %v320_v14 = vld [vmem:[%s7006_s3 + $0xd8] sm:$0xff]  ;;  %v554_v35 = vpop.permute.xlu0 %553 }
 0x129   :  { %404 = vmatmul.f32.gmra.mxu2 %v311_v1  ;;  %475 = vmatmul.f32.gmra.mxu3 %v316_v8  ;;  %vm582_vm13 = vcmp.eq.s32.totalorder %v4872_v34, %v554_v35  ;;  %v566_v1 = vpop.permute.xlu1 %565  ;;  %v5003_v11 = vpop.f32.mrf.mxu3 }
 0x12a   :  { %vm4964_vm14 = vmpackc.low %vm582_vm13, %vm581_vm12  ;;  %vm586_vm4 = vcmp.eq.s32.totalorder %v4872_v34, %v566_v1 }
 0x12c   :  { %719 = vmatpush.bf16.msrb.mxu0 %v704_v37  ;;  %v7210_v37 = vmov 0 }
 0x12d   :  { %v7211_v37 = vsel %vm4964_vm14, 4294967295, %v7210_v37 }
 0x12e   :  { %7212 = vst [vmem:[#allocation24_spill] sm:$0xff] %v7211_v37 }
 0x12f   :  { %3711 = vmatmul.msk.bf16.vlgmr.msrb.gmra.mxu0 %vm4880_vm2, %v7035_v41 }
 0x130   :  { %v563_v22 = vpop.permute.xlu0 %562 }
 0x131   :  { %407 = vmatmul.f32.gmra.mxu2 %v313_v5  ;;  %478 = vmatmul.f32.gmra.mxu3 %v318_v12  ;;  %vm585_vm3 = vcmp.eq.s32.totalorder %v4872_v34, %v563_v22  ;;  %v381_v5 = vpop.f32.mrf.mxu0 }
 0x132   :  { %vm4994_vm6 = vmpackc.low %vm586_vm4, %vm585_vm3 }
 0x133   :  { %v7217_v3 = vsel %vm4994_vm6, 4294967295, %v7216_v3 }
 0x134   :  { %7218 = vst [vmem:[#allocation26_spill] sm:$0xff] %v7217_v3 }
 0x138   :  { %v572_v8 = vpop.permute.xlu0 %571 }
 0x139   :  { %410 = vmatmul.f32.gmra.mxu2 %v315_v7  ;;  %481 = vmatmul.f32.gmra.mxu3 %v320_v14  ;;  %v569_v7 = vpop.permute.xlu2 %568  ;;  %v384_v17 = vpop.f32.mrf.mxu0  ;;  %vm588_vm9 = vcmp.eq.s32.totalorder %v4872_v34, %v572_v8 }
 0x13a   :  { %vm587_vm7 = vcmp.eq.s32.totalorder %v4872_v34, %v569_v7  ;;  %v390_v14 = vpop.f32.mrf.mxu2 }
 0x13b   :  { %vm5007_vm10 = vmpackc.low %vm588_vm9, %vm587_vm7 }
 0x13f   :  { %3713 = vmatmul.msk.bf16.gmra.mxu0 %vm4901_vm5, %v7035_v41 }
 0x141   :  { %413 = vmatmul.f32.gmra.mxu2 %v317_v49  ;;  %484 = vmatmul.f32.gmra.mxu3 %v322_v46  ;;  %v7219_v49 = vmov 0  ;;  %v387_v12 = vpop.f32.mrf.mxu0 }
 0x142   :  { %v7220_v49 = vsel %vm5007_vm10, 4294967295, %v7219_v49 }
 0x143   :  { %7221 = vst [vmem:[#allocation27_spill] sm:$0xff] %v7220_v49 }
 0x149   :  { %416 = vmatmul.f32.gmra.mxu2 %v319_v29  ;;  %487 = vmatmul.f32.gmra.mxu3 %v324_v56  ;;  %v452_v29 = vpop.f32.mrf.mxu3 }
 0x14f   :  { %3715 = vmatmul.msk.bf16.gmra.mxu0 %vm4922_vm8, %v7035_v41 }
 0x151   :  { %419 = vmatmul.f32.gmra.mxu2 %v321_v42 }
 0x159   :  { %422 = vmatmul.f32.gmra.mxu2 %v323_v52 }
 0x15f   :  { %3717 = vmatmul.msk.bf16.gmra.mxu0 %vm4943_vm11, %v7035_v41 }
 0x16f   :  { %3719 = vmatmul.msk.bf16.gmra.mxu0 %vm4964_vm14, %v7035_v41 }
 0x174   :  { %v455_v35 = vpop.f32.mrf.mxu3 }
 0x17c   :  { %v458_v52 = vpop.f32.mrf.mxu3 }
 0x17f   :  { %3721 = vmatmul.msk.bf16.gmra.mxu0 %vm4985_vm1, %v7035_v41 }
 0x184   :  { %v461_v50 = vpop.f32.mrf.mxu3 }
 0x18c   :  { %v393_v42 = vpop.f32.mrf.mxu2  ;;  %v464_v22 = vpop.f32.mrf.mxu3 }
 0x18f   :  { %3723 = vmatmul.msk.bf16.gmra.mxu0 %vm4994_vm6, %v7035_v41 }
 0x194   :  { %v396_v34 = vpop.f32.mrf.mxu2  ;;  %v467_v48 = vpop.f32.mrf.mxu3 }
 0x19c   :  { %v399_v1 = vpop.f32.mrf.mxu2  ;;  %v470_v60 = vpop.f32.mrf.mxu3 }
 0x19f   :  { %3725 = vmatmul.msk.bf16.gmra.mxu0 %vm5007_vm10, %v7035_v41  ;;  %v3986_v41 = vld [vmem:[%s7008_s5] ss:$0 sm:$0xff]  ;;  %s5077_s5 = sld [smem:[#allocation5]] }
 0x1a0   :  { %v379_v3 = vadd.f32 %v3986_v41, %v378_v28  ;;  %v394_v61 = vadd.f32 %v3986_v41, %v393_v42  ;;  %v391_v36 = vadd.f32 %v3986_v41, %v390_v14  ;;  %v397_v4 = vadd.f32 %v3986_v41, %v396_v34 }
 0x1a1   :  { %v400_v39 = vadd.f32 %v3986_v41, %v399_v1  ;;  %v382_v40 = vadd.f32 %v3986_v41, %v381_v5  ;;  %v385_v47 = vadd.f32 %v3986_v41, %v384_v17  ;;  %v388_v53 = vadd.f32 %v3986_v41, %v387_v12 }
 0x1a2   :  { %v444_v37 = vadd.f32 %v443_v24, %v379_v3  ;;  %v459_v57 = vadd.f32 %v458_v52, %v394_v61  ;;  %v456_v28 = vadd.f32 %v455_v35, %v391_v36  ;;  %v462_v42 = vadd.f32 %v461_v50, %v397_v4 }
 0x1a3   :  { %v465_v24 = vadd.f32 %v464_v22, %v400_v39  ;;  %v447_v14 = vadd.f32 %v5001_v21, %v382_v40  ;;  %v453_v5 = vadd.f32 %v452_v29, %v388_v53 }
 0x1a4   :  { %v402_v8 = vpop.f32.mrf.mxu2  ;;  %v473_v2 = vpop.f32.mrf.mxu3  ;;  %v5043_v20 = vmax.f32 %v444_v37, 0.0  ;;  %v5047_v17 = vmax.f32 %v459_v57, 0.0  ;;  %v5051_v4 = vmax.f32 %v456_v28, 0.0  ;;  %v5053_v39 = vmax.f32 %v462_v42, 0.0 }
 0x1a5   :  { %v403_v55 = vadd.f32 %v3986_v41, %v402_v8  ;;  %v5055_v40 = vmax.f32 %v465_v24, 0.0 }
 0x1a6   :  { %7222 = vst [vmem:[#allocation28_spill] sm:$0xff] %v5043_v20 }
 0x1a7   :  { %7223 = vst [vmem:[#allocation29_spill] sm:$0xff] %v5047_v17  ;;  %v468_v61 = vadd.f32 %v467_v48, %v403_v55  ;;  %v5063_v55 = vmax.f32 %v453_v5, 0.0  ;;  %v794_v5 = vstv %s5077_s5 }
 0x1a8   :  { %7224 = vst [vmem:[#allocation30_spill] sm:$0xff] %v5051_v4 }
 0x1a9   :  { %7225 = vst [vmem:[#allocation31_spill] sm:$0xff] %v5053_v39 }
 0x1aa   :  { %7226 = vst [vmem:[#allocation32_spill] sm:$0xff] %v5055_v40 }
 0x1ab   :  { %7230 = vst [vmem:[#allocation36_spill] sm:$0xff] %v5063_v55 }
 0x1ac   :  { %v5014_v32 = vpop.f32.mrf.mxu0  ;;  %v405_v54 = vpop.f32.mrf.mxu2 }
 0x1ad   :  { %v476_v19 = vpop.f32.mrf.mxu3  ;;  %v406_v43 = vadd.f32 %v3986_v41, %v405_v54  ;;  %v450_v54 = vadd.f32 %v5003_v11, %v385_v47  ;;  %v722_v36 = vadd.f32 %v5014_v32, %v5043_v20 }
 0x1af   :  { %v471_v34 = vadd.f32 %v470_v60, %v406_v43  ;;  %v5061_v48 = vmax.f32 %v450_v54, 0.0 }
 0x1b1   :  { %v5059_v47 = vmax.f32 %v471_v34, 0.0  ;;  %7229 = vst [vmem:[#allocation35_spill] sm:$0xff] %v5061_v48 }
 0x1b3   :  { %7228 = vst [vmem:[#allocation34_spill] sm:$0xff] %v5059_v47 }
 0x1b4   :  { %v5016_v46 = vpop.f32.mrf.mxu0  ;;  %v408_v0 = vpop.f32.mrf.mxu2 }
 0x1b5   :  { %v479_v31 = vpop.f32.mrf.mxu3  ;;  %v409_v44 = vadd.f32 %v3986_v41, %v408_v0 }
 0x1b7   :  { %v474_v0 = vadd.f32 %v473_v2, %v409_v44  ;;  %v5067_v44 = vmax.f32 %v468_v61, 0.0 }
 0x1b9   :  { %7231 = vst [vmem:[#allocation37_spill] sm:$0xff] %v5067_v44  ;;  %v5071_v2 = vmax.f32 %v474_v0, 0.0 }
 0x1bb   :  { %7232 = vst [vmem:[#allocation38_spill] sm:$0xff] %v5071_v2 }
 0x1bc   :  { %v5018_v56 = vpop.f32.mrf.mxu0  ;;  %v411_v6 = vpop.f32.mrf.mxu2 }
 0x1bd   :  { %v482_v49 = vpop.f32.mrf.mxu3  ;;  %v412_v33 = vadd.f32 %v3986_v41, %v411_v6  ;;  %v727_v29 = vadd.f32 %v5018_v56, %v5061_v48 }
 0x1bf   :  { %v477_v6 = vadd.f32 %v476_v19, %v412_v33 }
 0x1c1   :  { %v5073_v19 = vmax.f32 %v477_v6, 0.0 }
 0x1c3   :  { %7233 = vst [vmem:[#allocation39_spill] sm:$0xff] %v5073_v19 }
 0x1c4   :  { %v5020_v59 = vpop.f32.mrf.mxu0  ;;  %v414_v26 = vpop.f32.mrf.mxu2 }
 0x1c5   :  { %v485_v3 = vpop.f32.mrf.mxu3  ;;  %v415_v1 = vadd.f32 %v3986_v41, %v414_v26  ;;  %v729_v32 = vadd.f32 %v5020_v59, %v5063_v55 }
 0x1c7   :  { %v480_v53 = vadd.f32 %v479_v31, %v415_v1  ;;  %v764_v24 = vmax.f32 %v729_v32, 0.0 }
 0x1c9   :  { %v5087_v11 = vmax.f32 %v480_v53, 0.0 }
 0x1cb   :  { %7235 = vst [vmem:[#allocation41_spill] sm:$0xff] %v5087_v11 }
 0x1cc   :  { %v5022_v7 = vpop.f32.mrf.mxu0  ;;  %v417_v30 = vpop.f32.mrf.mxu2 }
 0x1cd   :  { %v418_v25 = vadd.f32 %v3986_v41, %v417_v30  ;;  %v732_v31 = vadd.f32 %v5022_v7, %v5051_v4 }
 0x1cf   :  { %v483_v30 = vadd.f32 %v482_v49, %v418_v25  ;;  %v765_v56 = vmax.f32 %v732_v31, 0.0 }
 0x1d1   :  { %v5075_v26 = vmax.f32 %v483_v30, 0.0  ;;  %v5112_v61 = vadd.f32 1e-07, %v765_v56 }
 0x1d3   :  { %7234 = vst [vmem:[#allocation40_spill] sm:$0xff] %v5075_v26 }
 0x1d4   :  { %v5024_v51 = vpop.f32.mrf.mxu0  ;;  %v420_v45 = vpop.f32.mrf.mxu2 }
 0x1d5   :  { %v421_v18 = vadd.f32 %v3986_v41, %v420_v45  ;;  %v5057_v45 = vmax.f32 %v447_v14, 0.0  ;;  %v734_v60 = vadd.f32 %v5024_v51, %v5047_v17 }
 0x1d7   :  { %7227 = vst [vmem:[#allocation33_spill] sm:$0xff] %v5057_v45  ;;  %v486_v57 = vadd.f32 %v485_v3, %v421_v18  ;;  %v724_v25 = vadd.f32 %v5016_v46, %v5057_v45  ;;  %v761_v18 = vmax.f32 %v722_v36, 0.0  ;;  %v766_v35 = vmax.f32 %v734_v60, 0.0  ;;  %v488_v46 = vpop.f32.mrf.mxu3 }
 0x1d9   :  { %v5089_v49 = vmax.f32 %v486_v57, 0.0  ;;  %v5102_v50 = vadd.f32 1e-07, %v761_v18  ;;  %v5107_v3 = vadd.f32 1e-07, %v766_v35 }
 0x1da   :  { %v5124_v57 = vadd.f32 1e-07, %v764_v24 }
 0x1db   :  { %7236 = vst [vmem:[#allocation42_spill] sm:$0xff] %v5089_v49  ;;  %v5127_v60 = vmul.f32 %v794_v5, %v5107_v3 }
 0x1dc   :  { %v5026_v58 = vpop.f32.mrf.mxu0  ;;  %v423_v33 = vpop.f32.mrf.mxu2 }
 0x1dd   :  { %v737_v51 = vadd.f32 %v5026_v58, %v5053_v39  ;;  %v424_v12 = vadd.f32 %v3986_v41, %v423_v33 }
 0x1df   :  { %v767_v22 = vmax.f32 %v737_v51, 0.0  ;;  %v489_v42 = vadd.f32 %v488_v46, %v424_v12 }
 0x1e1   :  { %v5114_v0 = vadd.f32 1e-07, %v767_v22 }
 0x1e3   :  { %v5147_v12 = vmul.f32 %v794_v5, %v5114_v0 }
 0x1e4   :  { %v5028_v62 = vpop.f32.mrf.mxu0 }
 0x1e5   :  { %v739_v37 = vadd.f32 %v5028_v62, %v5055_v40  ;;  %v762_v62 = vmax.f32 %v724_v25, 0.0  ;;  %v5132_v25 = vmul.f32 %v794_v5, %v5102_v50 }
 0x1e7   :  { %v768_v59 = vmax.f32 %v739_v37, 0.0  ;;  %v5109_v14 = vadd.f32 1e-07, %v762_v62 }
 0x1e9   :  { %v5116_v6 = vadd.f32 1e-07, %v768_v59  ;;  %v5141_v37 = vmul.f32 %v794_v5, %v5109_v14 }
 0x1ec   :  { %v5030_v23 = vpop.f32.mrf.mxu0 }
 0x1ed   :  { %v742_v58 = vadd.f32 %v5030_v23, %v5067_v44 }
 0x1f4   :  { %v5032_v10 = vpop.f32.mrf.mxu0 }
 0x1f5   :  { %v744_v21 = vadd.f32 %v5032_v10, %v5059_v47 }
 0x1f7   :  { %v770_v8 = vmax.f32 %v744_v21, 0.0  ;;  %v5144_v21 = vmul.f32 %v794_v5, %v5112_v61 }
 0x1fc   :  { %v5034_v16 = vpop.f32.mrf.mxu0 }
 0x1fd   :  { %v747_v10 = vadd.f32 %v5034_v16, %v5071_v2  ;;  %v763_v16 = vmax.f32 %v727_v29, 0.0  ;;  %v5150_v29 = vmul.f32 %v794_v5, %v5116_v6 }
 0x1ff   :  { %v771_v34 = vmax.f32 %v747_v10, 0.0  ;;  %v5122_v53 = vadd.f32 1e-07, %v763_v16 }
 0x201   :  { %v5134_v18 = vadd.f32 1e-07, %v771_v34  ;;  %v5159_v10 = vmul.f32 %v794_v5, %v5122_v53 }
 0x203   :  { %v805_v22 = vmul.f32 %v794_v5, %v5134_v18 }
 0x204   :  { %v5039_v27 = vpop.f32.mrf.mxu0 }
 0x205   :  { %v749_v52 = vadd.f32 %v5039_v27, %v5073_v19  ;;  %v769_v27 = vmax.f32 %v742_v58, 0.0 }
 0x207   :  { %v772_v1 = vmax.f32 %v749_v52, 0.0  ;;  %v5129_v33 = vadd.f32 1e-07, %v769_v27  ;;  %v5162_v52 = vmul.f32 %v794_v5, %v5124_v57 }
 0x209   :  { %v5136_v31 = vadd.f32 1e-07, %v772_v1  ;;  %v803_v56 = vmul.f32 %v794_v5, %v5129_v33 }
 0x20b   :  { %v806_v59 = vmul.f32 %v794_v5, %v5136_v31 }
 0x20c   :  { %v5041_v38 = vpop.f32.mrf.mxu0 }
 0x20d   :  { %v752_v23 = vadd.f32 %v5041_v38, %v5087_v11  ;;  %v5118_v38 = vadd.f32 1e-07, %v770_v8 }
 0x20f   :  { %v773_v30 = vmax.f32 %v752_v23, 0.0  ;;  %v804_v35 = vmul.f32 %v794_v5, %v5118_v38  ;;  %v811_v23 = vmax.f32 %v5132_v25, %v5144_v21 }
 0x211   :  { %v5153_v58 = vadd.f32 1e-07, %v773_v30  ;;  %v815_v1 = vmax.f32 %v811_v23, %v803_v56 }
 0x213   :  { %v807_v24 = vmul.f32 %v794_v5, %v5153_v58 }
 0x214   :  { %v753_v43 = vpop.f32.mrf.mxu0 }
 0x215   :  { %v754_v41 = vadd.f32 %v753_v43, %v5075_v26  ;;  %v5120_v43 = vmax.f32 %v489_v42, 0.0  ;;  %v814_v42 = vmax.f32 %v5162_v52, %v5150_v29 }
 0x217   :  { %v774_v54 = vmax.f32 %v754_v41, 0.0  ;;  %7237 = vst [vmem:[#allocation43_spill] sm:$0xff] %v5120_v43  ;;  %v812_v41 = vmax.f32 %v5141_v37, %v5127_v60  ;;  %v818_v30 = vmax.f32 %v814_v42, %v806_v59 }
 0x219   :  { %v5138_v51 = vadd.f32 1e-07, %v774_v54  ;;  %v816_v16 = vmax.f32 %v812_v41, %v804_v35 }
 0x21c   :  { %v756_v7 = vpop.f32.mrf.mxu0 }
 0x21d   :  { %v757_v28 = vadd.f32 %v756_v7, %v5089_v49  ;;  %v808_v7 = vmul.f32 %v794_v5, %v5138_v51 }
 0x21f   :  { %v775_v36 = vmax.f32 %v757_v28, 0.0  ;;  %v813_v28 = vmax.f32 %v5159_v10, %v5147_v12 }
 0x221   :  { %v5155_v46 = vadd.f32 1e-07, %v775_v36  ;;  %v817_v54 = vmax.f32 %v813_v28, %v805_v22  ;;  %v820_v36 = vmax.f32 %v816_v16, %v808_v7 }
 0x223   :  { %v809_v27 = vmul.f32 %v794_v5, %v5155_v46 }
 0x224   :  { %v758_v32 = vpop.f32.mrf.mxu0 }
 0x225   :  { %v759_v62 = vadd.f32 %v758_v32, %v5120_v43  ;;  %v821_v43 = vmax.f32 %v817_v54, %v809_v27 }
 0x227   :  { %v776_v8 = vmax.f32 %v759_v62, 0.0  ;;  %v819_v62 = vmax.f32 %v815_v1, %v807_v24 }
 0x229   :  { %v792_v34 = vadd.f32 1e-07, %v776_v8  ;;  %v823_v11 = vmax.f32 %v819_v62, %v820_v36 }
 0x22b   :  { %v810_v32 = vmul.f32 %v794_v5, %v792_v34 }
 0x22d   :  { %v822_v49 = vmax.f32 %v818_v30, %v810_v32 }
 0x22f   :  { %v824_v26 = vmax.f32 %v821_v43, %v822_v49 }
 0x231   :  { %v825_v19 = vmax.f32 %v823_v11, %v824_v26 }
 0x233   :  { %v826_v2 = vrot.slane %v825_v19, 4 }
 0x235   :  { %v827_v44 = vmax.f32 %v825_v19, %v826_v2 }
 0x237   :  { %v828_v55 = vrot.slane %v827_v44, 2 }
 0x239   :  { %v829_v41 = vmax.f32 %v827_v44, %v828_v55 }
 0x23b   :  { %v830_v48 = vrot.slane %v829_v41, 1 }
 0x23d   :  { %v5178_v47 = vmax.f32 %v829_v41, %v830_v48 }
 0x23f   :  { %v847_v8 = vsub.f32 %v810_v32, %v5178_v47  ;;  %v846_v23 = vsub.f32 %v809_v27, %v5178_v47  ;;  %v844_v28 = vsub.f32 %v807_v24, %v5178_v47  ;;  %v845_v5 = vsub.f32 %v808_v7, %v5178_v47 }
 0x240   :  { %v842_v42 = vsub.f32 %v805_v22, %v5178_v47  ;;  %v843_v49 = vsub.f32 %v806_v59, %v5178_v47  ;;  %v840_v48 = vsub.f32 %v803_v56, %v5178_v47  ;;  %v841_v43 = vsub.f32 %v804_v35, %v5178_v47 }
 0x241   :  { %v878_v26 = vmul.f32 1.442695, %v847_v8  ;;  %v876_v11 = vmul.f32 1.442695, %v846_v23  ;;  %v872_v2 = vmul.f32 1.442695, %v844_v28  ;;  %v838_v7 = vsub.f32 %v5147_v12, %v5178_v47 }
 0x242   :  { %v874_v19 = vmul.f32 1.442695, %v845_v5  ;;  %v868_v55 = vmul.f32 1.442695, %v842_v42  ;;  %v870_v44 = vmul.f32 1.442695, %v843_v49  ;;  %v839_v16 = vsub.f32 %v5150_v29, %v5178_v47 }
 0x243   :  { %4000 = vpow2.f32 %v878_v26  ;;  %v864_v22 = vmul.f32 1.442695, %v840_v48  ;;  %v866_v59 = vmul.f32 1.442695, %v841_v43  ;;  %v832_v56 = vsub.f32 %v5132_v25, %v5178_v47 }
 0x244   :  { %4002 = vpow2.f32 %v876_v11  ;;  %v860_v54 = vmul.f32 1.442695, %v838_v7  ;;  %v833_v35 = vsub.f32 %v5141_v37, %v5178_v47  ;;  %v836_v32 = vsub.f32 %v5144_v21, %v5178_v47 }
 0x245   :  { %4004 = vpow2.f32 %v872_v2  ;;  %v862_v29 = vmul.f32 1.442695, %v839_v16  ;;  %v837_v25 = vsub.f32 %v5127_v60, %v5178_v47  ;;  %v848_v23 = vmul.f32 1.442695, %v832_v56 }
 0x246   :  { %4006 = vpow2.f32 %v874_v19  ;;  %v856_v21 = vmul.f32 1.442695, %v836_v32  ;;  %v834_v42 = vsub.f32 %v5159_v10, %v5178_v47  ;;  %v835_v60 = vsub.f32 %v5162_v52, %v5178_v47 }
 0x247   :  { %4008 = vpow2.f32 %v868_v55  ;;  %v858_v49 = vmul.f32 1.442695, %v837_v25 }
 0x248   :  { %4010 = vpow2.f32 %v870_v44  ;;  %v852_v55 = vmul.f32 1.442695, %v834_v42  ;;  %v854_v10 = vmul.f32 1.442695, %v835_v60  ;;  %v7246_v42 = vmov 0 }
 0x249   :  { %v4001_v24 = vpop.eup %4000  ;;  %4012 = vpow2.f32 %v864_v22 }
 0x24a   :  { %v4003_v27 = vpop.eup %4002  ;;  %v895_v1 = vmul.f32 %v4001_v24, %v792_v34  ;;  %4014 = vpow2.f32 %v866_v59 }
 0x24b   :  { %v4005_v30 = vpop.eup %4004  ;;  %v911_v36 = vpack.c.bf16 %v4001_v24, %v4003_v27  ;;  %v894_v12 = vmul.f32 %v4003_v27, %v5155_v46  ;;  %v850_v46 = vmul.f32 1.442695, %v833_v35  ;;  %4016 = vpow2.f32 %v860_v54 }
 0x24c   :  { %v4007_v62 = vpop.eup %4006  ;;  %v892_v8 = vmul.f32 %v4005_v30, %v5153_v58  ;;  %4018 = vpow2.f32 %v862_v29 }
 0x24d   :  { %v4009_v41 = vpop.eup %4008  ;;  %961 = vmatpush.bf16.msrb.mxu2 %v911_v36  ;;  %v910_v34 = vpack.c.bf16 %v895_v1, %v894_v12  ;;  %v893_v37 = vmul.f32 %v4007_v62, %v5138_v51  ;;  %v909_v5 = vpack.c.bf16 %v4007_v62, %v4005_v30  ;;  %4020 = vpow2.f32 %v848_v23 }
 0x24e   :  { %v4011_v28 = vpop.eup %4010  ;;  %v890_v51 = vmul.f32 %v4009_v41, %v5134_v18  ;;  %4022 = vpow2.f32 %v850_v46  ;;  %v7238_v12 = vlaneseq  ;;  %v7244_v46 = vmov 0 }
 0x24f   :  { %912 = vmatpush.bf16.msrb.mxu1 %v910_v34  ;;  %v4013_v26 = vpop.eup %4012  ;;  %v908_v58 = vpack.c.bf16 %v893_v37, %v892_v8  ;;  %v891_v11 = vmul.f32 %v4011_v28, %v5136_v31  ;;  %v907_v19 = vpack.c.bf16 %v4011_v28, %v4009_v41  ;;  %4024 = vpow2.f32 %v856_v21  ;;  %v3906_v37 = vld [vmem:[%s7011_s8 + $0x170] sm:$0xff] }
 0x250   :  { %v4015_v2 = vpop.eup %4014  ;;  %4026 = vpow2.f32 %v858_v49  ;;  %v888_v47 = vmul.f32 %v4013_v26, %v5129_v33  ;;  %v5218_v32 = vshrl.u32 %v7238_v12, 7  ;;  %v7241_v41 = vmov 1.0|1.0  }
 0x251   :  { %962 = vmatpush.bf16.msrb.mxu2 %v909_v5  ;;  %v4017_v48 = vpop.eup %4016  ;;  %v906_v44 = vpack.c.bf16 %v891_v11, %v890_v51  ;;  %v889_v52 = vmul.f32 %v4015_v2, %v5118_v38  ;;  %v905_v31 = vpack.c.bf16 %v4015_v2, %v4013_v26  ;;  %4028 = vpow2.f32 %v852_v55  ;;  %v1089_v2 = vld [vmem:[%s7011_s8 + $0x78] sm:$0xff]  ;;  %v1087_v55 = vld [vmem:[%s7011_s8 + $0x68] sm:$0xff] }
 0x252   :  { %v4019_v43 = vpop.eup %4018  ;;  %4030 = vpow2.f32 %v854_v10  ;;  %v886_v24 = vmul.f32 %v4017_v48, %v5114_v0  ;;  %v631_v29 = vadd.s32 8, %v5218_v32  ;;  %v632_v34 = vadd.s32 16, %v5218_v32  ;;  %1094 = vmatpush.msra.mxu3 %v1089_v2  ;;  %v1086_v10 = vld [vmem:[%s7011_s8 + $0x60] sm:$0xff] }
 0x253   :  { %913 = vmatpush.bf16.msrb.mxu1 %v908_v58  ;;  %v4021_v18 = vpop.eup %4020  ;;  %v904_v16 = vpack.c.bf16 %v889_v52, %v888_v47  ;;  %v887_v56 = vmul.f32 %v4019_v43, %v5116_v6  ;;  %v903_v38 = vpack.c.bf16 %v4019_v43, %v4017_v48  ;;  %v633_v8 = vadd.s32 24, %v5218_v32  ;;  %v1085_v47 = vld [vmem:[%s7011_s8 + $0x58] sm:$0xff]  ;;  %v1084_v52 = vld [vmem:[%s7011_s8 + $0x50] sm:$0xff]  ;;  %v1083_v43 = vld [vmem:[%s7011_s8 + $0x48] sm:$0xff] }
 0x254   :  { %v4023_v7 = vpop.eup %4022  ;;  %v880_v22 = vmul.f32 %v4021_v18, %v5102_v50  ;;  %v634_v23 = vadd.s32 32, %v5218_v32  ;;  %v635_v28 = vadd.s32 40, %v5218_v32  ;;  %v636_v5 = vadd.s32 48, %v5218_v32 }
 0x255   :  { %963 = vmatpush.bf16.msrb.mxu2 %v907_v19  ;;  %v4025_v59 = vpop.eup %4024  ;;  %v881_v33 = vmul.f32 %v4023_v7, %v5109_v14  ;;  %v902_v35 = vpack.c.bf16 %v887_v56, %v886_v24  ;;  %v637_v21 = vadd.s32 56, %v5218_v32  ;;  %v638_v49 = vadd.s32 64, %v5218_v32  ;;  %v1088_v19 = vld [vmem:[%s7011_s8 + $0x70] sm:$0xff]  ;;  %v1079_v56 = vld [vmem:[%s7011_s8 + $0x28] sm:$0xff] }
 0x256   :  { %v4027_v27 = vpop.eup %4026  ;;  %v884_v30 = vmul.f32 %v4025_v59, %v5112_v61  ;;  %v5226_v61 = vld [vmem:[%s7010_s7] ss:$0 sm:$0xff]  ;;  %v639_v60 = vadd.s32 72, %v5218_v32  ;;  %v7248_v26 = vmov 0  ;;  %v640_v58 = vadd.s32 80, %v5218_v32  ;;  %1095 = vmatpush.msra.mxu3 %v1088_v19  ;;  %v1080_v24 = vld [vmem:[%s7011_s8 + $0x30] sm:$0xff] }
 0x257   :  { %914 = vmatpush.bf16.msrb.mxu1 %v906_v44  ;;  %v896_v1 = vpack.c.bf16 %v881_v33, %v880_v22  ;;  %v4029_v54 = vpop.eup %4028  ;;  %v885_v50 = vmul.f32 %v4027_v27, %v5107_v3  ;;  %v901_v0 = vpack.c.bf16 %v4027_v27, %v4025_v59  ;;  %vm648_vm12 = vcmp.eq.s32.totalorder %v5218_v32, %v5226_v61  ;;  %v1078_v33 = vld [vmem:[%s7011_s8 + $0x20] sm:$0xff]  ;;  %v1077_v27 = vld [vmem:[%s7011_s8 + $0x18] sm:$0xff]  ;;  %s3774_s7 = sld [smem:[#allocation5 + $0x1]] }
 0x258   :  { %v4031_v36 = vpop.eup %4030  ;;  %v882_v14 = vmul.f32 %v4029_v54, %v5122_v53  ;;  %vm649_vm13 = vcmp.eq.s32.totalorder %v631_v29, %v5226_v61  ;;  %v897_v53 = vpack.c.bf16 %v4023_v7, %v4021_v18  ;;  %vm650_vm0 = vcmp.eq.s32.totalorder %v632_v34, %v5226_v61  ;;  %1096 = vmatpush.msra.mxu3 %v1087_v55  ;;  %v1082_v18 = vld [vmem:[%s7011_s8 + $0x40] sm:$0xff]  ;;  %v1081_v7 = vld [vmem:[%s7011_s8 + $0x38] sm:$0xff] }
 0x259   :  { %964 = vmatpush.bf16.msrb.mxu2 %v905_v31  ;;  %v900_v6 = vpack.c.bf16 %v885_v50, %v884_v30  ;;  %v883_v62 = vmul.f32 %v4031_v36, %v5124_v57  ;;  %v899_v3 = vpack.c.bf16 %v4031_v36, %v4029_v54  ;;  %vm5231_vm15 = vmpackc.low %vm649_vm13, %vm648_vm12  ;;  %vm651_vm3 = vcmp.eq.s32.totalorder %v633_v8, %v5226_v61  ;;  %v1074_v54 = vld [vmem:[%s7011_s8] sm:$0xff]  ;;  %v3907_v57 = vld [vmem:[%s7011_s8 + $0x178] sm:$0xff] }
 0x25a   :  { %vm5245_vm4 = vmpackc.low %vm651_vm3, %vm650_vm0  ;;  %vm652_vm7 = vcmp.eq.s32.totalorder %v634_v23, %v5226_v61  ;;  %vm653_vm9 = vcmp.eq.s32.totalorder %v635_v28, %v5226_v61  ;;  %vm654_vm13 = vcmp.eq.s32.totalorder %v636_v5, %v5226_v61  ;;  %vm655_vm0 = vcmp.eq.s32.totalorder %v637_v21, %v5226_v61  ;;  %1097 = vmatpush.msra.mxu3 %v1086_v10 }
 0x25b   :  { %915 = vmatpush.bf16.msrb.mxu1 %v904_v16  ;;  %v898_v25 = vpack.c.bf16 %v883_v62, %v882_v14  ;;  %vm5259_vm12 = vmpackc.low %vm653_vm9, %vm652_vm7  ;;  %vm656_vm7 = vcmp.eq.s32.totalorder %v638_v49, %v5226_v61  ;;  %vm657_vm9 = vcmp.eq.s32.totalorder %v639_v60, %v5226_v61  ;;  %v641_v51 = vadd.s32 88, %v5218_v32 }
 0x25c   :  { %v7245_v46 = vsel %vm5259_vm12, 4294967295, %v7244_v46  ;;  %vm5273_vm3 = vmpackc.low %vm655_vm0, %vm654_vm13  ;;  %vm658_vm0 = vcmp.eq.s32.totalorder %v640_v58, %v5226_v61  ;;  %v7250_v11 = vmov 0  ;;  %v642_v48 = vadd.s32 96, %v5218_v32  ;;  %1098 = vmatpush.msra.mxu3 %v1085_v47 }
 0x25d   :  { %965 = vmatpush.bf16.msrb.mxu2 %v903_v38  ;;  %v7247_v42 = vsel %vm5273_vm3, 4294967295, %v7246_v42  ;;  %vm5287_vm13 = vmpackc.low %vm657_vm9, %vm656_vm7  ;;  %v643_v44 = vadd.s32 104, %v5218_v32  ;;  %v7252_v31 = vmov 0  ;;  %v644_v22 = vadd.s32 112, %v5218_v32  ;;  %v1076_v38 = vld [vmem:[%s7011_s8 + $0x10] sm:$0xff] }
 0x25e   :  { %v7249_v26 = vsel %vm5287_vm13, 4294967295, %v7248_v26  ;;  %1099 = vmatpush.msra.mxu3 %v1084_v52  ;;  %v645_v59 = vadd.s32 120, %v5218_v32  ;;  %v7255_v16 = vmov 0  ;;  %v7258_v14 = vmax.f32 %v4852_v13, 0.0 }
 0x25f   :  { %916 = vmatpush.bf16.msrb.mxu1 %v902_v35  ;;  %vm661_vm9 = vcmp.eq.s32.totalorder %v643_v44, %v5226_v61  ;;  %v7259_v34 = vmax.f32 %v4855_v15, 0.0  ;;  %v7260_v13 = vmax.f32 %v4832_v63, 0.0  ;;  %v7261_v15 = vmax.f32 %v4834_v9, 0.0 }
 0x260   :  { %1100 = vmatpush.msra.mxu3 %v1083_v43 }
 0x261   :  { %966 = vmatpush.bf16.msrb.mxu2 %v901_v0 }
 0x262   :  { %1101 = vmatpush.msra.mxu3 %v1082_v18  ;;  %v7262_v18 = vld [vmem:[#allocation19_spill] sm:$0xff] }
 0x263   :  { %917 = vmatpush.bf16.msrb.mxu1 %v900_v6  ;;  %v7263_v63 = vmax.f32 %v7262_v18, 0.0 }
 0x264   :  { %1102 = vmatpush.msra.mxu3 %v1081_v7 }
 0x265   :  { %967 = vmatpush.bf16.msrb.mxu2 %v899_v3 }
 0x266   :  { %1103 = vmatpush.msra.mxu3 %v1080_v24 }
 0x267   :  { %918 = vmatpush.bf16.msrb.mxu1 %v898_v25 }
 0x268   :  { %1104 = vmatpush.msra.mxu3 %v1079_v56 }
 0x269   :  { %968 = vmatpush.bf16.msrb.mxu2 %v897_v53 }
 0x26a   :  { %1105 = vmatpush.msra.mxu3 %v1078_v33 }
 0x26b   :  { %919 = vmatpush.bf16.msrb.mxu1 %v896_v1  ;;  %v1075_v1 = vld [vmem:[%s7011_s8 + $0x8] sm:$0xff] }
 0x26c   :  { %3743 = vmatmul.msk.bf16.vlgmr.msrb.gmra.mxu2 %vm5231_vm15, %v7241_v41  ;;  %1106 = vmatpush.msra.mxu3 %v1077_v27  ;;  %v7264_v27 = vld [vmem:[#allocation18_spill] sm:$0xff] }
 0x26d   :  { %v7265_v9 = vmax.f32 %v7264_v27, 0.0 }
 0x26e   :  { %3727 = vmatmul.msk.bf16.vlgmr.msrb.gmra.mxu1 %vm5231_vm15, %v7241_v41  ;;  %1107 = vmatpush.msra.mxu3 %v1076_v38 }
 0x270   :  { %1108 = vmatpush.msra.mxu3 %v1075_v1 }
 0x272   :  { %1109 = vmatpush.msra.mxu3 %v1074_v54 }
 0x27c   :  { %3745 = vmatmul.msk.bf16.gmra.mxu2 %vm5245_vm4, %v7241_v41 }
 0x27e   :  { %3729 = vmatmul.msk.bf16.gmra.mxu1 %vm5245_vm4, %v7241_v41 }
 0x28c   :  { %3747 = vmatmul.msk.bf16.gmra.mxu2 %vm5259_vm12, %v7241_v41 }
 0x28e   :  { %3731 = vmatmul.msk.bf16.gmra.mxu1 %vm5259_vm12, %v7241_v41 }
 0x29c   :  { %3749 = vmatmul.msk.bf16.gmra.mxu2 %vm5273_vm3, %v7241_v41 }
 0x29e   :  { %3733 = vmatmul.msk.bf16.gmra.mxu1 %vm5273_vm3, %v7241_v41  ;;  %vm659_vm3 = vcmp.eq.s32.totalorder %v641_v51, %v5226_v61 }
 0x29f   :  { %vm5301_vm7 = vmpackc.low %vm659_vm3, %vm658_vm0  ;;  %vm660_vm3 = vcmp.eq.s32.totalorder %v642_v48, %v5226_v61 }
 0x2a0   :  { %v7251_v11 = vsel %vm5301_vm7, 4294967295, %v7250_v11  ;;  %vm5339_vm0 = vmpackc.low %vm661_vm9, %vm660_vm3  ;;  %vm662_vm3 = vcmp.eq.s32.totalorder %v644_v22, %v5226_v61  ;;  %vm663_vm9 = vcmp.eq.s32.totalorder %v645_v59, %v5226_v61 }
 0x2a1   :  { %v7253_v31 = vsel %vm5339_vm0, 4294967295, %v7252_v31 }
 0x2a2   :  { %7254 = vst [vmem:[#allocation44_spill] sm:$0xff] %v7253_v31 }
 0x2ac   :  { %3751 = vmatmul.msk.bf16.gmra.mxu2 %vm5287_vm13, %v7241_v41 }
 0x2ae   :  { %3735 = vmatmul.msk.bf16.gmra.mxu1 %vm5287_vm13, %v7241_v41 }
 0x2bc   :  { %3753 = vmatmul.msk.bf16.gmra.mxu2 %vm5301_vm7, %v7241_v41 }
 0x2be   :  { %3737 = vmatmul.msk.bf16.gmra.mxu1 %vm5301_vm7, %v7241_v41  ;;  %vm5356_vm7 = vmpackc.low %vm663_vm9, %vm662_vm3 }
 0x2bf   :  { %v7256_v16 = vsel %vm5356_vm7, 4294967295, %v7255_v16 }
 0x2c0   :  { %7257 = vst [vmem:[#allocation45_spill] sm:$0xff] %v7256_v16 }
 0x2cc   :  { %3755 = vmatmul.msk.bf16.gmra.mxu2 %vm5339_vm0, %v7241_v41 }
 0x2ce   :  { %3739 = vmatmul.msk.bf16.gmra.mxu1 %vm5339_vm0, %v7241_v41 }
 0x2dc   :  { %3757 = vmatmul.msk.bf16.gmra.mxu2 %vm5356_vm7, %v7241_v41 }
 0x2de   :  { %3741 = vmatmul.msk.bf16.gmra.mxu1 %vm5356_vm7, %v7241_v41 }
 0x2eb   :  { %v921_v35 = vpop.f32.mrf.mxu1 }
 0x2ef   :  { %v970_v30 = vpop.f32.mrf.mxu2 }
 0x2f0   :  { %v1010_v50 = vmax.f32 %v970_v30, 1e-12 }
 0x2f2   :  { %4032 = vrcp.f32 %v1010_v50 }
 0x2f3   :  { %v923_v36 = vpop.f32.mrf.mxu1 }
 0x2f7   :  { %v972_v12 = vpop.f32.mrf.mxu2 }
 0x2f8   :  { %v4033_v32 = vpop.eup %4032  ;;  %v1011_v0 = vmax.f32 %v972_v12, 1e-12 }
 0x2f9   :  { %v1042_v6 = vmul.f32 %v4033_v32, %v921_v35 }
 0x2fa   :  { %4034 = vrcp.f32 %v1011_v0 }
 0x2fb   :  { %v1058_v62 = vadd.f32 %v1042_v6, %v7258_v14  ;;  %v926_v29 = vpop.f32.mrf.mxu1 }
 0x2fd   :  { %1110 = vmatmul.f32.vlgmr.msra.gmra.mxu3 %v1058_v62 }
 0x2ff   :  { %v975_v61 = vpop.f32.mrf.mxu2 }
 0x300   :  { %v4035_v3 = vpop.eup %4034  ;;  %v1012_v25 = vmax.f32 %v975_v61, 1e-12  ;;  %v7268_v61 = vld [vmem:[#allocation16_spill] sm:$0xff] }
 0x301   :  { %v1043_v53 = vmul.f32 %v4035_v3, %v923_v36  ;;  %v7266_v36 = vld [vmem:[#allocation17_spill] sm:$0xff]  ;;  %v7269_v3 = vmax.f32 %v7268_v61, 0.0 }
 0x302   :  { %4036 = vrcp.f32 %v1012_v25  ;;  %v7267_v12 = vmax.f32 %v7266_v36, 0.0 }
 0x303   :  { %v1059_v8 = vadd.f32 %v1043_v53, %v7259_v34  ;;  %v928_v23 = vpop.f32.mrf.mxu1 }
 0x305   :  { %1113 = vmatmul.f32.gmra.mxu3 %v1059_v8 }
 0x307   :  { %v977_v28 = vpop.f32.mrf.mxu2 }
 0x308   :  { %v4037_v5 = vpop.eup %4036  ;;  %v1013_v21 = vmax.f32 %v977_v28, 1e-12 }
 0x309   :  { %v1044_v49 = vmul.f32 %v4037_v5, %v926_v29  ;;  %v7270_v5 = vld [vmem:[#allocation15_spill] sm:$0xff] }
 0x30a   :  { %4038 = vrcp.f32 %v1013_v21  ;;  %v7271_v21 = vmax.f32 %v7270_v5, 0.0 }
 0x30b   :  { %v1060_v60 = vadd.f32 %v1044_v49, %v7260_v13  ;;  %v931_v58 = vpop.f32.mrf.mxu1 }
 0x30d   :  { %1116 = vmatmul.f32.gmra.mxu3 %v1060_v60 }
 0x30f   :  { %v980_v51 = vpop.f32.mrf.mxu2 }
 0x310   :  { %v4039_v2 = vpop.eup %4038  ;;  %v1014_v19 = vmax.f32 %v980_v51, 1e-12 }
 0x311   :  { %v1045_v55 = vmul.f32 %v4039_v2, %v928_v23 }
 0x312   :  { %4040 = vrcp.f32 %v1014_v19  ;;  %v7272_v19 = vld [vmem:[#allocation14_spill] sm:$0xff] }
 0x313   :  { %v1061_v10 = vadd.f32 %v1045_v55, %v7261_v15  ;;  %v933_v48 = vpop.f32.mrf.mxu1  ;;  %v7273_v55 = vmax.f32 %v7272_v19, 0.0 }
 0x315   :  { %1119 = vmatmul.f32.gmra.mxu3 %v1061_v10 }
 0x317   :  { %v982_v44 = vpop.f32.mrf.mxu2 }
 0x318   :  { %v4041_v47 = vpop.eup %4040  ;;  %v1015_v52 = vmax.f32 %v982_v44, 1e-12 }
 0x319   :  { %v1046_v43 = vmul.f32 %v4041_v47, %v931_v58 }
 0x31a   :  { %4042 = vrcp.f32 %v1015_v52 }
 0x31b   :  { %v1062_v7 = vadd.f32 %v1046_v43, %v7263_v63  ;;  %v936_v22 = vpop.f32.mrf.mxu1  ;;  %v7274_v43 = vld [vmem:[#allocation13_spill] sm:$0xff] }
 0x31c   :  { %v7275_v18 = vmax.f32 %v7274_v43, 0.0 }
 0x31d   :  { %1122 = vmatmul.f32.gmra.mxu3 %v1062_v7 }
 0x31f   :  { %v985_v59 = vpop.f32.mrf.mxu2 }
 0x320   :  { %v4043_v24 = vpop.eup %4042  ;;  %v1016_v56 = vmax.f32 %v985_v59, 1e-12 }
 0x321   :  { %v1047_v33 = vmul.f32 %v4043_v24, %v933_v48 }
 0x322   :  { %4044 = vrcp.f32 %v1016_v56 }
 0x323   :  { %v1063_v38 = vadd.f32 %v1047_v33, %v7265_v9  ;;  %v938_v1 = vpop.f32.mrf.mxu1  ;;  %v7276_v33 = vld [vmem:[#allocation12_spill] sm:$0xff] }
 0x324   :  { %v7277_v27 = vmax.f32 %v7276_v33, 0.0 }
 0x325   :  { %1125 = vmatmul.f32.gmra.mxu3 %v1063_v38 }
 0x327   :  { %v987_v54 = vpop.f32.mrf.mxu2 }
 0x328   :  { %v4045_v35 = vpop.eup %4044  ;;  %v1017_v30 = vmax.f32 %v987_v54, 1e-12 }
 0x329   :  { %v1048_v50 = vmul.f32 %v4045_v35, %v936_v22 }
 0x32a   :  { %4046 = vrcp.f32 %v1017_v30  ;;  %v7278_v30 = vld [vmem:[#allocation11_spill] sm:$0xff] }
 0x32b   :  { %v1064_v32 = vadd.f32 %v1048_v50, %v7267_v12  ;;  %v941_v0 = vpop.f32.mrf.mxu1  ;;  %v7279_v50 = vmax.f32 %v7278_v30, 0.0 }
 0x32d   :  { %1128 = vmatmul.f32.gmra.mxu3 %v1064_v32 }
 0x32f   :  { %v990_v6 = vpop.f32.mrf.mxu2 }
 0x330   :  { %v4047_v14 = vpop.eup %4046  ;;  %v1018_v62 = vmax.f32 %v990_v6, 1e-12 }
 0x331   :  { %v1049_v29 = vmul.f32 %v4047_v14, %v938_v1 }
 0x332   :  { %4048 = vrcp.f32 %v1018_v62  ;;  %v7280_v62 = vld [vmem:[#allocation9_spill] sm:$0xff] }
 0x333   :  { %v1065_v25 = vadd.f32 %v1049_v29, %v7269_v3  ;;  %v943_v53 = vpop.f32.mrf.mxu1  ;;  %v7281_v29 = vmax.f32 %v7280_v62, 0.0 }
 0x335   :  { %1131 = vmatmul.f32.gmra.mxu3 %v1065_v25 }
 0x337   :  { %v992_v34 = vpop.f32.mrf.mxu2 }
 0x338   :  { %v4049_v8 = vpop.eup %4048  ;;  %v1019_v23 = vmax.f32 %v992_v34, 1e-12 }
 0x339   :  { %v1050_v28 = vmul.f32 %v4049_v8, %v941_v0 }
 0x33a   :  { %4050 = vrcp.f32 %v1019_v23  ;;  %v7282_v23 = vld [vmem:[#allocation8_spill] sm:$0xff] }
 0x33b   :  { %v1066_v49 = vadd.f32 %v1050_v28, %v7271_v21  ;;  %v946_v13 = vpop.f32.mrf.mxu1  ;;  %v7283_v28 = vmax.f32 %v7282_v23, 0.0  ;;  %v1582_v23 = vld [vmem:[%s7015_s12 + $0x78] sm:$0xff] }
 0x33c   :  { %1587 = vmatpush.msra.mxu0 %v1582_v23  ;;  %v1568_v23 = vld [vmem:[%s7015_s12 + $0x8] sm:$0xff] }
 0x33d   :  { %1134 = vmatmul.f32.gmra.mxu3 %v1066_v49 }
 0x33f   :  { %v995_v60 = vpop.f32.mrf.mxu2 }
 0x340   :  { %v4051_v58 = vpop.eup %4050  ;;  %v1020_v51 = vmax.f32 %v995_v60, 1e-12  ;;  %v7284_v60 = vld [vmem:[#allocation10_spill] sm:$0xff] }
 0x341   :  { %v1051_v2 = vmul.f32 %v4051_v58, %v943_v53  ;;  %v7285_v58 = vmax.f32 %v7284_v60, 0.0  ;;  %v1579_v60 = vld [vmem:[%s7015_s12 + $0x60] sm:$0xff] }
 0x342   :  { %4052 = vrcp.f32 %v1020_v51 }
 0x343   :  { %v1067_v15 = vadd.f32 %v1051_v2, %v7273_v55  ;;  %v948_v47 = vpop.f32.mrf.mxu1  ;;  %v5422_v2 = vld [vmem:[%s7012_s9] ss:$0 sm:$0xff] }
 0x345   :  { %1137 = vmatmul.f32.gmra.mxu3 %v1067_v15 }
 0x347   :  { %v997_v10 = vpop.f32.mrf.mxu2 }
 0x348   :  { %v4053_v48 = vpop.eup %4052  ;;  %v1021_v44 = vmax.f32 %v997_v10, 1e-12 }
 0x349   :  { %v1052_v52 = vmul.f32 %v4053_v48, %v946_v13 }
 0x34a   :  { %4054 = vrcp.f32 %v1021_v44 }
 0x34b   :  { %v1068_v63 = vadd.f32 %v1052_v52, %v7275_v18  ;;  %v951_v56 = vpop.f32.mrf.mxu1 }
 0x34d   :  { %1140 = vmatmul.f32.gmra.mxu3 %v1068_v63 }
 0x34f   :  { %v1000_v7 = vpop.f32.mrf.mxu2 }
 0x350   :  { %v4055_v22 = vpop.eup %4054  ;;  %v1022_v59 = vmax.f32 %v1000_v7, 1e-12 }
 0x351   :  { %v1053_v24 = vmul.f32 %v4055_v22, %v948_v47 }
 0x352   :  { %4056 = vrcp.f32 %v1022_v59 }
 0x353   :  { %v1069_v9 = vadd.f32 %v1053_v24, %v7277_v27  ;;  %v953_v12 = vpop.f32.mrf.mxu1 }
 0x355   :  { %1143 = vmatmul.f32.gmra.mxu3 %v1069_v9 }
 0x357   :  { %v1002_v38 = vpop.f32.mrf.mxu2 }
 0x358   :  { %v4057_v1 = vpop.eup %4056  ;;  %v1023_v54 = vmax.f32 %v1002_v38, 1e-12 }
 0x359   :  { %v1054_v35 = vmul.f32 %v4057_v1, %v951_v56 }
 0x35a   :  { %4058 = vrcp.f32 %v1023_v54 }
 0x35b   :  { %v1070_v36 = vadd.f32 %v1054_v35, %v7279_v50  ;;  %v956_v3 = vpop.f32.mrf.mxu1 }
 0x35d   :  { %1146 = vmatmul.f32.gmra.mxu3 %v1070_v36 }
 0x35f   :  { %v1005_v32 = vpop.f32.mrf.mxu2 }
 0x360   :  { %v4059_v0 = vpop.eup %4058  ;;  %v1024_v6 = vmax.f32 %v1005_v32, 1e-12 }
 0x361   :  { %v1055_v14 = vmul.f32 %v4059_v0, %v953_v12 }
 0x362   :  { %4060 = vrcp.f32 %v1024_v6 }
 0x363   :  { %v1071_v61 = vadd.f32 %v1055_v14, %v7281_v29  ;;  %v958_v49 = vpop.f32.mrf.mxu1 }
 0x365   :  { %1149 = vmatmul.f32.gmra.mxu3 %v1071_v61 }
 0x367   :  { %v1007_v25 = vpop.f32.mrf.mxu2 }
 0x368   :  { %v4061_v53 = vpop.eup %4060  ;;  %v1025_v34 = vmax.f32 %v1007_v25, 1e-12 }
 0x369   :  { %v1056_v8 = vmul.f32 %v4061_v53, %v956_v3 }
 0x36a   :  { %4062 = vrcp.f32 %v1025_v34 }
 0x36b   :  { %v1072_v5 = vadd.f32 %v1056_v8, %v7283_v28 }
 0x36d   :  { %1152 = vmatmul.f32.gmra.mxu3 %v1072_v5 }
 0x370   :  { %v4063_v21 = vpop.eup %4062 }
 0x371   :  { %v1057_v13 = vmul.f32 %v4063_v21, %v958_v49  ;;  %v1581_v21 = vld [vmem:[%s7015_s12 + $0x70] sm:$0xff] }
 0x372   :  { %1588 = vmatpush.msra.mxu0 %v1581_v21 }
 0x373   :  { %v1073_v51 = vadd.f32 %v1057_v13, %v7285_v58  ;;  %v1580_v13 = vld [vmem:[%s7015_s12 + $0x68] sm:$0xff]  ;;  %v1578_v58 = vld [vmem:[%s7015_s12 + $0x58] sm:$0xff] }
 0x374   :  { %1589 = vmatpush.msra.mxu0 %v1580_v13 }
 0x375   :  { %1155 = vmatmul.f32.gmra.mxu3 %v1073_v51 }
 0x376   :  { %1590 = vmatpush.msra.mxu0 %v1579_v60 }
 0x378   :  { %1591 = vmatpush.msra.mxu0 %v1578_v58 }
 0x380   :  { %v1111_v19 = vpop.f32.mrf.mxu3 }
 0x381   :  { %v5425_v55 = vadd.f32 %v5422_v2, %v1111_v19 }
 0x383   :  { %1159 = vadd.xlane.f32.xlu1 %v5425_v55  ;;  %v1207_v15 = vmul.f32 %v5425_v55, %v5425_v55 }
 0x385   :  { %1223 = vadd.xlane.f32.xlu2 %v1207_v15  ;;  %v1577_v15 = vld [vmem:[%s7015_s12 + $0x50] sm:$0xff] }
 0x386   :  { %1592 = vmatpush.msra.mxu0 %v1577_v15 }
 0x388   :  { %v1114_v10 = vpop.f32.mrf.mxu3 }
 0x389   :  { %v5431_v48 = vadd.f32 %v5422_v2, %v1114_v10 }
 0x38b   :  { %1161 = vadd.xlane.f32.xlu0 %v5431_v48  ;;  %v1208_v44 = vmul.f32 %v5431_v48, %v5431_v48 }
 0x38d   :  { %1225 = vadd.xlane.f32.xlu2 %v1208_v44  ;;  %v1576_v44 = vld [vmem:[%s7015_s12 + $0x48] sm:$0xff] }
 0x38e   :  { %1593 = vmatpush.msra.mxu0 %v1576_v44 }
 0x390   :  { %v1117_v47 = vpop.f32.mrf.mxu3 }
 0x391   :  { %v5437_v52 = vadd.f32 %v5422_v2, %v1117_v47  ;;  %v1575_v47 = vld [vmem:[%s7015_s12 + $0x40] sm:$0xff] }
 0x392   :  { %1594 = vmatpush.msra.mxu0 %v1575_v47 }
 0x393   :  { %1163 = vadd.xlane.f32.xlu1 %v5437_v52  ;;  %v1209_v43 = vmul.f32 %v5437_v52, %v5437_v52 }
 0x395   :  { %1227 = vadd.xlane.f32.xlu2 %v1209_v43 }
 0x398   :  { %v1120_v18 = vpop.f32.mrf.mxu3 }
 0x399   :  { %v5443_v63 = vadd.f32 %v5422_v2, %v1120_v18 }
 0x39b   :  { %1165 = vadd.xlane.f32.xlu0 %v5443_v63  ;;  %v1210_v7 = vmul.f32 %v5443_v63, %v5443_v63 }
 0x39d   :  { %1229 = vadd.xlane.f32.xlu1 %v1210_v7  ;;  %v1574_v7 = vld [vmem:[%s7015_s12 + $0x38] sm:$0xff] }
 0x39e   :  { %1595 = vmatpush.msra.mxu0 %v1574_v7 }
 0x3a0   :  { %v1123_v22 = vpop.f32.mrf.mxu3 }
 0x3a1   :  { %v5449_v59 = vadd.f32 %v5422_v2, %v1123_v22 }
 0x3a3   :  { %1167 = vadd.xlane.f32.xlu2 %v5449_v59  ;;  %v1211_v24 = vmul.f32 %v5449_v59, %v5449_v59 }
 0x3a5   :  { %1231 = vadd.xlane.f32.xlu0 %v1211_v24 }
 0x3a8   :  { %v1126_v56 = vpop.f32.mrf.mxu3 }
 0x3a9   :  { %v5455_v33 = vadd.f32 %v5422_v2, %v1126_v56 }
 0x3ab   :  { %1169 = vadd.xlane.f32.xlu1 %v5455_v33  ;;  %v1212_v27 = vmul.f32 %v5455_v33, %v5455_v33 }
 0x3ad   :  { %1233 = vadd.xlane.f32.xlu2 %v1212_v27 }
 0x3b0   :  { %v1129_v9 = vpop.f32.mrf.mxu3 }
 0x3b1   :  { %v5461_v38 = vadd.f32 %v5422_v2, %v1129_v9 }
 0x3b3   :  { %1171 = vadd.xlane.f32.xlu0 %v5461_v38  ;;  %v1213_v1 = vmul.f32 %v5461_v38, %v5461_v38 }
 0x3b5   :  { %1235 = vadd.xlane.f32.xlu1 %v1213_v1  ;;  %v1573_v1 = vld [vmem:[%s7015_s12 + $0x30] sm:$0xff] }
 0x3b6   :  { %1596 = vmatpush.msra.mxu0 %v1573_v1 }
 0x3b8   :  { %v1132_v54 = vpop.f32.mrf.mxu3 }
 0x3b9   :  { %v5467_v35 = vadd.f32 %v5422_v2, %v1132_v54 }
 0x3bb   :  { %1173 = vadd.xlane.f32.xlu2 %v5467_v35  ;;  %v1214_v30 = vmul.f32 %v5467_v35, %v5467_v35 }
 0x3bd   :  { %1237 = vadd.xlane.f32.xlu0 %v1214_v30 }
 0x3c0   :  { %v1135_v50 = vpop.f32.mrf.mxu3 }
 0x3c1   :  { %v5473_v36 = vadd.f32 %v5422_v2, %v1135_v50  ;;  %v1572_v50 = vld [vmem:[%s7015_s12 + $0x28] sm:$0xff] }
 0x3c2   :  { %1597 = vmatpush.msra.mxu0 %v1572_v50 }
 0x3c3   :  { %1175 = vadd.xlane.f32.xlu1 %v5473_v36  ;;  %v1215_v12 = vmul.f32 %v5473_v36, %v5473_v36 }
 0x3c5   :  { %1239 = vadd.xlane.f32.xlu2 %v1215_v12 }
 0x3c8   :  { %v1138_v32 = vpop.f32.mrf.mxu3 }
 0x3c9   :  { %v5479_v0 = vadd.f32 %v5422_v2, %v1138_v32 }
 0x3cb   :  { %1177 = vadd.xlane.f32.xlu0 %v5479_v0  ;;  %v1216_v6 = vmul.f32 %v5479_v0, %v5479_v0 }
 0x3cd   :  { %1241 = vadd.xlane.f32.xlu1 %v1216_v6 }
 0x3d0   :  { %v1141_v14 = vpop.f32.mrf.mxu3 }
 0x3d1   :  { %v5485_v62 = vadd.f32 %v5422_v2, %v1141_v14  ;;  %v1570_v14 = vld [vmem:[%s7015_s12 + $0x18] sm:$0xff] }
 0x3d3   :  { %1179 = vadd.xlane.f32.xlu2 %v5485_v62  ;;  %v1217_v29 = vmul.f32 %v5485_v62, %v5485_v62 }
 0x3d5   :  { %1243 = vadd.xlane.f32.xlu0 %v1217_v29 }
 0x3d8   :  { %v1144_v61 = vpop.f32.mrf.mxu3 }
 0x3d9   :  { %v5491_v3 = vadd.f32 %v5422_v2, %v1144_v61 }
 0x3db   :  { %1181 = vadd.xlane.f32.xlu1 %v5491_v3  ;;  %v1218_v25 = vmul.f32 %v5491_v3, %v5491_v3 }
 0x3dd   :  { %1245 = vadd.xlane.f32.xlu2 %v1218_v25 }
 0x3e0   :  { %v1147_v53 = vpop.f32.mrf.mxu3 }
 0x3e1   :  { %v5497_v34 = vadd.f32 %v5422_v2, %v1147_v53  ;;  %v1569_v53 = vld [vmem:[%s7015_s12 + $0x10] sm:$0xff] }
 0x3e3   :  { %1183 = vadd.xlane.f32.xlu0 %v5497_v34  ;;  %v1219_v8 = vmul.f32 %v5497_v34, %v5497_v34 }
 0x3e5   :  { %1247 = vadd.xlane.f32.xlu1 %v1219_v8 }
 0x3e8   :  { %v1150_v28 = vpop.f32.mrf.mxu3 }
 0x3e9   :  { %v5506_v5 = vadd.f32 %v5422_v2, %v1150_v28 }
 0x3eb   :  { %1185 = vadd.xlane.f32.xlu2 %v5506_v5  ;;  %v1220_v49 = vmul.f32 %v5506_v5, %v5506_v5 }
 0x3ed   :  { %1249 = vadd.xlane.f32.xlu0 %v1220_v49  ;;  %v1567_v49 = vld [vmem:[%s7015_s12] sm:$0xff] }
 0x3f0   :  { %v1153_v51 = vpop.f32.mrf.mxu3 }
 0x3f1   :  { %v5524_v19 = vadd.f32 %v5422_v2, %v1153_v51 }
 0x3f3   :  { %1187 = vadd.xlane.f32.xlu1 %v5524_v19  ;;  %v1221_v10 = vmul.f32 %v5524_v19, %v5524_v19 }
 0x3f5   :  { %1251 = vadd.xlane.f32.xlu2 %v1221_v10 }
 0x3f6   :  { %v1160_v43 = vpop.xlane.xlu1 %1159 }
 0x3f7   :  { %v5538_v18 = vmul.f32 0.015625, %v1160_v43 }
 0x3f8   :  { %v1224_v22 = vpop.xlane.xlu2 %1223  ;;  %v1156_v24 = vpop.f32.mrf.mxu3 }
 0x3f9   :  { %v1271_v56 = vmul.f32 %v5538_v18, %v5538_v18  ;;  %v1255_v27 = vmul.f32 0.015625, %v1224_v22  ;;  %v5546_v9 = vadd.f32 %v5422_v2, %v1156_v24  ;;  %v1571_v2 = vld [vmem:[%s7015_s12 + $0x20] sm:$0xff] }
 0x3fa   :  { %1598 = vmatpush.msra.mxu0 %v1571_v2 }
 0x3fb   :  { %v1287_v54 = vsub.f32 %v1255_v27, %v1271_v56  ;;  %1189 = vadd.xlane.f32.xlu0 %v5546_v9  ;;  %v1222_v30 = vmul.f32 %v5546_v9, %v5546_v9 }
 0x3fc   :  { %1599 = vmatpush.msra.mxu0 %v1570_v14 }
 0x3fd   :  { %v1319_v12 = vadd.f32 1e-05, %v1287_v54  ;;  %1253 = vadd.xlane.f32.xlu1 %v1222_v30  ;;  %v1303_v54 = vsub.f32 %v5425_v55, %v5538_v18  ;;  %v5585_v30 = vld [vmem:[%s7013_s10] ss:$0 sm:$0xff] }
 0x3fe   :  { %v1162_v32 = vpop.xlane.xlu0 %1161  ;;  %1600 = vmatpush.msra.mxu0 %v1569_v53  ;;  %v5594_v55 = vld [vmem:[%s7014_s11] ss:$0 sm:$0xff] }
 0x3ff   :  { %4064 = vrsqrt.f32 %v1319_v12  ;;  %v5560_v6 = vmul.f32 0.015625, %v1162_v32  ;;  %vm1341_vm9 = vweird.f32 %v1319_v12 }
 0x400   :  { %v1226_v29 = vpop.xlane.xlu2 %1225  ;;  %1601 = vmatpush.msra.mxu0 %v1568_v23 }
 0x401   :  { %v1272_v61 = vmul.f32 %v5560_v6, %v5560_v6  ;;  %v1256_v25 = vmul.f32 0.015625, %v1226_v29 }
 0x402   :  { %1602 = vmatpush.msra.mxu0 %v1567_v49 }
 0x403   :  { %v1288_v8 = vsub.f32 %v1256_v25, %v1272_v61 }
 0x405   :  { %v4065_v28 = vpop.eup %4064  ;;  %v1320_v21 = vadd.f32 1e-05, %v1288_v8 }
 0x406   :  { %v1336_v13 = vmul.f32 %v4065_v28, %v1319_v12  ;;  %v1164_v60 = vpop.xlane.xlu1 %1163  ;;  %vm1342_vm3 = vweird.f32 %v4065_v28 }
 0x407   :  { %4066 = vrsqrt.f32 %v1320_v21  ;;  %v5576_v58 = vmul.f32 0.015625, %v1164_v60  ;;  %vm1343_vm7 = vmor %vm1341_vm9, %vm1342_vm3 }
 0x408   :  { %v1337_v51 = vmul.f32 %v4065_v28, %v1336_v13  ;;  %v1228_v15 = vpop.xlane.xlu2 %1227 }
 0x409   :  { %v1273_v10 = vmul.f32 %v5576_v58, %v5576_v58  ;;  %v1257_v44 = vmul.f32 0.015625, %v1228_v15  ;;  %v1304_v15 = vsub.f32 %v5431_v48, %v5560_v6 }
 0x40a   :  { %v1338_v47 = vmul.f32 0.5, %v1337_v51 }
 0x40b   :  { %v1289_v43 = vsub.f32 %v1257_v44, %v1273_v10 }
 0x40c   :  { %v1339_v7 = vsub.f32 1.5, %v1338_v47 }
 0x40d   :  { %v4067_v22 = vpop.eup %4066  ;;  %v1321_v24 = vadd.f32 1e-05, %v1289_v43 }
 0x40e   :  { %v1340_v56 = vmul.f32 %v4065_v28, %v1339_v7  ;;  %v1346_v27 = vmul.f32 %v4067_v22, %v1320_v21  ;;  %v1166_v1 = vpop.xlane.xlu0 %1165  ;;  %vm1352_vm3 = vweird.f32 %v4067_v22 }
 0x40f   :  { %4068 = vrsqrt.f32 %v1321_v24  ;;  %v5587_v50 = vmul.f32 0.015625, %v1166_v1 }
 0x410   :  { %v1344_v2 = vsel %vm1343_vm7, %v4065_v28, %v1340_v56  ;;  %v1347_v32 = vmul.f32 %v4067_v22, %v1346_v27  ;;  %v1230_v14 = vpop.xlane.xlu1 %1229  ;;  %vm1351_vm7 = vweird.f32 %v1320_v21 }
 0x411   :  { %v1495_v29 = vmul.f32 %v1344_v2, %v1303_v54  ;;  %v1274_v12 = vmul.f32 %v5587_v50, %v5587_v50  ;;  %v1258_v61 = vmul.f32 0.015625, %v1230_v14  ;;  %vm1353_vm9 = vmor %vm1351_vm7, %vm1352_vm3  ;;  %vm1361_vm3 = vweird.f32 %v1321_v24 }
 0x412   :  { %v1348_v18 = vmul.f32 0.5, %v1347_v32 }
 0x413   :  { %v1515_v25 = vmul.f32 %v5585_v30, %v1495_v29  ;;  %v1290_v53 = vsub.f32 %v1258_v61, %v1274_v12  ;;  %v1305_v61 = vsub.f32 %v5437_v52, %v5576_v58 }
 0x414   :  { %v1349_v8 = vsub.f32 1.5, %v1348_v18 }
 0x415   :  { %v4069_v23 = vpop.eup %4068  ;;  %v1322_v28 = vadd.f32 1e-05, %v1290_v53  ;;  %v1535_v49 = vadd.f32 %v5594_v55, %v1515_v25 }
 0x416   :  { %v1350_v13 = vmul.f32 %v4067_v22, %v1349_v8  ;;  %v1356_v60 = vmul.f32 %v4069_v23, %v1321_v24  ;;  %v1168_v51 = vpop.xlane.xlu2 %1167  ;;  %vm1362_vm0 = vweird.f32 %v4069_v23 }
 0x417   :  { %4070 = vrsqrt.f32 %v1322_v28  ;;  %v5600_v10 = vmul.f32 0.015625, %v1168_v51  ;;  %v1551_v44 = vmax.f32 %v1535_v49, 0.0  ;;  %vm1363_vm7 = vmor %vm1361_vm3, %vm1362_vm0  ;;  %vm1371_vm0 = vweird.f32 %v1322_v28 }
 0x418   :  { %v1357_v47 = vmul.f32 %v4069_v23, %v1356_v60  ;;  %v1232_v43 = vpop.xlane.xlu0 %1231  ;;  %v1354_v7 = vsel %vm1353_vm9, %v4067_v22, %v1350_v13 }
 0x419   :  { %v1275_v56 = vmul.f32 %v5600_v10, %v5600_v10  ;;  %v1259_v27 = vmul.f32 0.015625, %v1232_v43  ;;  %1603 = vmatmul.f32.vlgmr.msra.gmra.mxu0 %v1551_v44  ;;  %v1496_v1 = vmul.f32 %v1354_v7, %v1304_v15 }
 0x41a   :  { %v1358_v21 = vmul.f32 0.5, %v1357_v47 }
 0x41b   :  { %v1291_v54 = vsub.f32 %v1259_v27, %v1275_v56  ;;  %v1516_v2 = vmul.f32 %v5585_v30, %v1496_v1  ;;  %v1306_v27 = vsub.f32 %v5443_v63, %v5587_v50 }
 0x41c   :  { %v1359_v32 = vsub.f32 1.5, %v1358_v21 }
 0x41d   :  { %v4071_v48 = vpop.eup %4070  ;;  %v1323_v6 = vadd.f32 1e-05, %v1291_v54  ;;  %v1536_v14 = vadd.f32 %v5594_v55, %v1516_v2 }
 0x41e   :  { %v1360_v29 = vmul.f32 %v4069_v23, %v1359_v32  ;;  %v1366_v12 = vmul.f32 %v4071_v48, %v1322_v28  ;;  %v1170_v22 = vpop.xlane.xlu1 %1169  ;;  %vm1372_vm9 = vweird.f32 %v4071_v48 }
 0x41f   :  { %4072 = vrsqrt.f32 %v1323_v6  ;;  %v5608_v18 = vmul.f32 0.015625, %v1170_v22  ;;  %v1552_v25 = vmax.f32 %v1536_v14, 0.0  ;;  %vm1373_vm3 = vmor %vm1371_vm0, %vm1372_vm9  ;;  %vm1381_vm9 = vweird.f32 %v1323_v6 }
 0x420   :  { %v1367_v53 = vmul.f32 %v4071_v48, %v1366_v12  ;;  %v1234_v8 = vpop.xlane.xlu2 %1233  ;;  %v1364_v49 = vsel %vm1363_vm7, %v4069_v23, %v1360_v29 }
 0x421   :  { %v1276_v13 = vmul.f32 %v5608_v18, %v5608_v18  ;;  %v1260_v60 = vmul.f32 0.015625, %v1234_v8  ;;  %1606 = vmatmul.f32.gmra.mxu0 %v1552_v25  ;;  %v1497_v51 = vmul.f32 %v1364_v49, %v1305_v61 }
 0x422   :  { %v1368_v24 = vmul.f32 0.5, %v1367_v53 }
 0x423   :  { %v1292_v15 = vsub.f32 %v1260_v60, %v1276_v13  ;;  %v1517_v44 = vmul.f32 %v5585_v30, %v1497_v51  ;;  %v1307_v13 = vsub.f32 %v5449_v59, %v5600_v10 }
 0x424   :  { %v1369_v47 = vsub.f32 1.5, %v1368_v24 }
 0x425   :  { %v4073_v52 = vpop.eup %4072  ;;  %v1324_v58 = vadd.f32 1e-05, %v1292_v15  ;;  %v1537_v43 = vadd.f32 %v5594_v55, %v1517_v44 }
 0x426   :  { %v1370_v7 = vmul.f32 %v4071_v48, %v1369_v47  ;;  %v1376_v56 = vmul.f32 %v4073_v52, %v1323_v6  ;;  %v1172_v23 = vpop.xlane.xlu0 %1171  ;;  %vm1382_vm7 = vweird.f32 %v4073_v52 }
 0x427   :  { %4074 = vrsqrt.f32 %v1324_v58  ;;  %v5616_v1 = vmul.f32 0.015625, %v1172_v23  ;;  %v1553_v21 = vmax.f32 %v1537_v43, 0.0  ;;  %vm1383_vm0 = vmor %vm1381_vm9, %vm1382_vm7  ;;  %vm1391_vm7 = vweird.f32 %v1324_v58 }
 0x428   :  { %v1377_v54 = vmul.f32 %v4073_v52, %v1376_v56  ;;  %v1236_v2 = vpop.xlane.xlu1 %1235  ;;  %v1374_v32 = vsel %vm1373_vm3, %v4071_v48, %v1370_v7 }
 0x429   :  { %v1277_v14 = vmul.f32 %v5616_v1, %v5616_v1  ;;  %v1261_v29 = vmul.f32 0.015625, %v1236_v2  ;;  %1609 = vmatmul.f32.gmra.mxu0 %v1553_v21  ;;  %v1498_v12 = vmul.f32 %v1374_v32, %v1306_v27  ;;  %v1308_v32 = vsub.f32 %v5455_v33, %v5608_v18 }
 0x42a   :  { %v1378_v28 = vmul.f32 0.5, %v1377_v54 }
 0x42b   :  { %v1293_v22 = vsub.f32 %v1261_v29, %v1277_v14  ;;  %v1518_v61 = vmul.f32 %v5585_v30, %v1498_v12 }
 0x42c   :  { %v1379_v25 = vsub.f32 1.5, %v1378_v28 }
 0x42d   :  { %v4075_v63 = vpop.eup %4074  ;;  %v1325_v50 = vadd.f32 1e-05, %v1293_v22  ;;  %v1538_v53 = vadd.f32 %v5594_v55, %v1518_v61 }
 0x42e   :  { %v1380_v8 = vmul.f32 %v4073_v52, %v1379_v25  ;;  %v1386_v49 = vmul.f32 %v4075_v63, %v1324_v58  ;;  %v1174_v48 = vpop.xlane.xlu2 %1173  ;;  %vm1392_vm3 = vweird.f32 %v4075_v63 }
 0x42f   :  { %4076 = vrsqrt.f32 %v1325_v50  ;;  %v5624_v60 = vmul.f32 0.015625, %v1174_v48  ;;  %v1554_v51 = vmax.f32 %v1538_v53, 0.0  ;;  %vm1393_vm9 = vmor %vm1391_vm7, %vm1392_vm3  ;;  %vm1401_vm3 = vweird.f32 %v1325_v50 }
 0x430   :  { %v1387_v24 = vmul.f32 %v4075_v63, %v1386_v49  ;;  %v1238_v15 = vpop.xlane.xlu0 %1237  ;;  %v1384_v44 = vsel %vm1383_vm0, %v4073_v52, %v1380_v8 }
 0x431   :  { %v1278_v47 = vmul.f32 %v5624_v60, %v5624_v60  ;;  %v1262_v43 = vmul.f32 0.015625, %v1238_v15  ;;  %1612 = vmatmul.f32.gmra.mxu0 %v1554_v51  ;;  %v1499_v7 = vmul.f32 %v1384_v44, %v1307_v13  ;;  %v1309_v15 = vsub.f32 %v5461_v38, %v5616_v1 }
 0x432   :  { %v1388_v6 = vmul.f32 0.5, %v1387_v24 }
 0x433   :  { %v1294_v56 = vsub.f32 %v1262_v43, %v1278_v47  ;;  %v1519_v23 = vmul.f32 %v5585_v30, %v1499_v7 }
 0x434   :  { %v1389_v27 = vsub.f32 1.5, %v1388_v6 }
 0x435   :  { %v4077_v59 = vpop.eup %4076  ;;  %v1326_v10 = vadd.f32 1e-05, %v1294_v56  ;;  %v1539_v21 = vadd.f32 %v5594_v55, %v1519_v23 }
 0x436   :  { %v1390_v54 = vmul.f32 %v4075_v63, %v1389_v27  ;;  %v1396_v2 = vmul.f32 %v4077_v59, %v1325_v50  ;;  %v1176_v52 = vpop.xlane.xlu1 %1175  ;;  %vm1402_vm0 = vweird.f32 %v4077_v59 }
 0x437   :  { %4078 = vrsqrt.f32 %v1326_v10  ;;  %v5632_v14 = vmul.f32 0.015625, %v1176_v52  ;;  %v1555_v29 = vmax.f32 %v1539_v21, 0.0  ;;  %vm1403_vm7 = vmor %vm1401_vm3, %vm1402_vm0  ;;  %vm1411_vm0 = vweird.f32 %v1326_v10 }
 0x438   :  { %v1397_v12 = vmul.f32 %v4077_v59, %v1396_v2  ;;  %v1240_v28 = vpop.xlane.xlu2 %1239  ;;  %v1394_v22 = vsel %vm1393_vm9, %v4075_v63, %v1390_v54 }
 0x439   :  { %v1279_v61 = vmul.f32 %v5632_v14, %v5632_v14  ;;  %v1263_v25 = vmul.f32 0.015625, %v1240_v28  ;;  %1615 = vmatmul.f32.gmra.mxu0 %v1555_v29  ;;  %v1500_v53 = vmul.f32 %v1394_v22, %v1308_v32 }
 0x43a   :  { %v1398_v58 = vmul.f32 0.5, %v1397_v12  ;;  %v1310_v12 = vsub.f32 %v5467_v35, %v5624_v60 }
 0x43b   :  { %v1295_v8 = vsub.f32 %v1263_v25, %v1279_v61  ;;  %v1520_v49 = vmul.f32 %v5585_v30, %v1500_v53 }
 0x43c   :  { %v1399_v48 = vsub.f32 1.5, %v1398_v58 }
 0x43d   :  { %v4079_v33 = vpop.eup %4078  ;;  %v1327_v18 = vadd.f32 1e-05, %v1295_v8  ;;  %v1540_v13 = vadd.f32 %v5594_v55, %v1520_v49 }
 0x43e   :  { %v1400_v51 = vmul.f32 %v4077_v59, %v1399_v48  ;;  %v1406_v24 = vmul.f32 %v4079_v33, %v1326_v10  ;;  %v1178_v63 = vpop.xlane.xlu0 %1177  ;;  %vm1412_vm9 = vweird.f32 %v4079_v33 }
 0x43f   :  { %4080 = vrsqrt.f32 %v1327_v18  ;;  %v5640_v44 = vmul.f32 0.015625, %v1178_v63  ;;  %v1556_v47 = vmax.f32 %v1540_v13, 0.0  ;;  %vm1413_vm3 = vmor %vm1411_vm0, %vm1412_vm9  ;;  %vm1421_vm9 = vweird.f32 %v1327_v18 }
 0x440   :  { %v1407_v43 = vmul.f32 %v4079_v33, %v1406_v24  ;;  %v1242_v7 = vpop.xlane.xlu1 %1241  ;;  %v1404_v6 = vsel %vm1403_vm7, %v4077_v59, %v1400_v51 }
 0x441   :  { %v1280_v56 = vmul.f32 %v5640_v44, %v5640_v44  ;;  %v1264_v23 = vmul.f32 0.015625, %v1242_v7  ;;  %1618 = vmatmul.f32.gmra.mxu0 %v1556_v47  ;;  %v1501_v27 = vmul.f32 %v1404_v6, %v1309_v15  ;;  %v1311_v47 = vsub.f32 %v5473_v36, %v5632_v14 }
 0x442   :  { %v1408_v50 = vmul.f32 0.5, %v1407_v43 }
 0x443   :  { %v1296_v21 = vsub.f32 %v1264_v23, %v1280_v56  ;;  %v1521_v54 = vmul.f32 %v5585_v30, %v1501_v27 }
 0x444   :  { %v1409_v2 = vsub.f32 1.5, %v1408_v50 }
 0x445   :  { %v4081_v38 = vpop.eup %4080  ;;  %v1328_v1 = vadd.f32 1e-05, %v1296_v21  ;;  %v1541_v52 = vadd.f32 %v5594_v55, %v1521_v54 }
 0x446   :  { %v1410_v32 = vmul.f32 %v4079_v33, %v1409_v2  ;;  %v1416_v29 = vmul.f32 %v4081_v38, %v1327_v18  ;;  %v1180_v59 = vpop.xlane.xlu2 %1179  ;;  %vm1422_vm7 = vweird.f32 %v4081_v38 }
 0x447   :  { %4082 = vrsqrt.f32 %v1328_v1  ;;  %v5648_v28 = vmul.f32 0.015625, %v1180_v59  ;;  %v1557_v22 = vmax.f32 %v1541_v52, 0.0  ;;  %vm1423_vm0 = vmor %vm1421_vm9, %vm1422_vm7  ;;  %vm1431_vm7 = vweird.f32 %v1328_v1 }
 0x448   :  { %v1417_v61 = vmul.f32 %v4081_v38, %v1416_v29  ;;  %v1244_v25 = vpop.xlane.xlu0 %1243  ;;  %v1414_v53 = vsel %vm1413_vm3, %v4079_v33, %v1410_v32 }
 0x449   :  { %v1281_v58 = vmul.f32 %v5648_v28, %v5648_v28  ;;  %v1265_v8 = vmul.f32 0.015625, %v1244_v25  ;;  %1621 = vmatmul.f32.gmra.mxu0 %v1557_v22  ;;  %v1502_v49 = vmul.f32 %v1414_v53, %v1310_v12  ;;  %v1312_v12 = vsub.f32 %v5479_v0, %v5640_v44 }
 0x44a   :  { %v1418_v10 = vmul.f32 0.5, %v1417_v61 }
 0x44b   :  { %v1297_v48 = vsub.f32 %v1265_v8, %v1281_v58  ;;  %v1522_v13 = vmul.f32 %v5585_v30, %v1502_v49 }
 0x44c   :  { %v1419_v51 = vsub.f32 1.5, %v1418_v10 }
 0x44d   :  { %v4083_v35 = vpop.eup %4082  ;;  %v1329_v60 = vadd.f32 1e-05, %v1297_v48  ;;  %v1542_v24 = vadd.f32 %v5594_v55, %v1522_v13 }
 0x44e   :  { %v1420_v63 = vmul.f32 %v4081_v38, %v1419_v51  ;;  %v1426_v15 = vmul.f32 %v4083_v35, %v1328_v1  ;;  %v1182_v33 = vpop.xlane.xlu1 %1181  ;;  %vm1432_vm3 = vweird.f32 %v4083_v35 }
 0x44f   :  { %4084 = vrsqrt.f32 %v1329_v60  ;;  %v5656_v43 = vmul.f32 0.015625, %v1182_v33  ;;  %v1558_v7 = vmax.f32 %v1542_v24, 0.0  ;;  %vm1433_vm9 = vmor %vm1431_vm7, %vm1432_vm3  ;;  %vm1441_vm3 = vweird.f32 %v1329_v60 }
 0x450   :  { %v1427_v6 = vmul.f32 %v4083_v35, %v1426_v15  ;;  %v1246_v56 = vpop.xlane.xlu2 %1245  ;;  %v1424_v23 = vsel %vm1423_vm0, %v4081_v38, %v1420_v63  ;;  %v1313_v33 = vsub.f32 %v5485_v62, %v5648_v28 }
 0x451   :  { %v1282_v27 = vmul.f32 %v5656_v43, %v5656_v43  ;;  %v1266_v50 = vmul.f32 0.015625, %v1246_v56  ;;  %1624 = vmatmul.f32.gmra.mxu0 %v1558_v7  ;;  %v1503_v21 = vmul.f32 %v1424_v23, %v1311_v47 }
 0x452   :  { %v1428_v18 = vmul.f32 0.5, %v1427_v6 }
 0x453   :  { %v1298_v54 = vsub.f32 %v1266_v50, %v1282_v27  ;;  %v1523_v2 = vmul.f32 %v5585_v30, %v1503_v21 }
 0x454   :  { %v1429_v52 = vsub.f32 1.5, %v1428_v18 }
 0x455   :  { %v4085_v36 = vpop.eup %4084  ;;  %v1330_v14 = vadd.f32 1e-05, %v1298_v54  ;;  %v1543_v32 = vadd.f32 %v5594_v55, %v1523_v2 }
 0x456   :  { %v1430_v29 = vmul.f32 %v4083_v35, %v1429_v52  ;;  %v1436_v59 = vmul.f32 %v4085_v36, %v1329_v60  ;;  %v1184_v38 = vpop.xlane.xlu0 %1183  ;;  %vm1442_vm0 = vweird.f32 %v4085_v36 }
 0x457   :  { %4086 = vrsqrt.f32 %v1330_v14  ;;  %v5664_v22 = vmul.f32 0.015625, %v1184_v38  ;;  %v1559_v61 = vmax.f32 %v1543_v32, 0.0  ;;  %vm1443_vm7 = vmor %vm1441_vm3, %vm1442_vm0  ;;  %vm1451_vm0 = vweird.f32 %v1330_v14 }
 0x458   :  { %v1437_v25 = vmul.f32 %v4085_v36, %v1436_v59  ;;  %v1248_v53 = vpop.xlane.xlu1 %1247  ;;  %v1434_v58 = vsel %vm1433_vm9, %v4083_v35, %v1430_v29  ;;  %v1314_v59 = vsub.f32 %v5491_v3, %v5656_v43 }
 0x459   :  { %v1283_v8 = vmul.f32 %v5664_v22, %v5664_v22  ;;  %v1267_v49 = vmul.f32 0.015625, %v1248_v53  ;;  %1627 = vmatmul.f32.gmra.mxu0 %v1559_v61  ;;  %v1504_v10 = vmul.f32 %v1434_v58, %v1312_v12 }
 0x45a   :  { %v1438_v1 = vmul.f32 0.5, %v1437_v25 }
 0x45b   :  { %v1299_v48 = vsub.f32 %v1267_v49, %v1283_v8  ;;  %v1524_v13 = vmul.f32 %v5585_v30, %v1504_v10 }
 0x45c   :  { %v1439_v51 = vsub.f32 1.5, %v1438_v1 }
 0x45d   :  { %v4087_v0 = vpop.eup %4086  ;;  %v1331_v44 = vadd.f32 1e-05, %v1299_v48  ;;  %v1544_v24 = vadd.f32 %v5594_v55, %v1524_v13 }
 0x45e   :  { %v1440_v63 = vmul.f32 %v4085_v36, %v1439_v51  ;;  %v1446_v15 = vmul.f32 %v4087_v0, %v1330_v14  ;;  %v1186_v35 = vpop.xlane.xlu2 %1185  ;;  %vm1452_vm9 = vweird.f32 %v4087_v0 }
 0x45f   :  { %4088 = vrsqrt.f32 %v1331_v44  ;;  %v5672_v47 = vmul.f32 0.015625, %v1186_v35  ;;  %v1560_v7 = vmax.f32 %v1544_v24, 0.0  ;;  %vm1453_vm3 = vmor %vm1451_vm0, %vm1452_vm9  ;;  %vm1461_vm9 = vweird.f32 %v1331_v44 }
 0x460   :  { %v1447_v6 = vmul.f32 %v4087_v0, %v1446_v15  ;;  %v1250_v56 = vpop.xlane.xlu0 %1249  ;;  %v1444_v23 = vsel %vm1443_vm7, %v4085_v36, %v1440_v63  ;;  %v1315_v63 = vsub.f32 %v5497_v34, %v5664_v22 }
 0x461   :  { %v1284_v27 = vmul.f32 %v5672_v47, %v5672_v47  ;;  %v1268_v50 = vmul.f32 0.015625, %v1250_v56  ;;  %1630 = vmatmul.f32.gmra.mxu0 %v1560_v7  ;;  %v1505_v21 = vmul.f32 %v1444_v23, %v1313_v33 }
 0x462   :  { %v1448_v60 = vmul.f32 0.5, %v1447_v6 }
 0x463   :  { %v1300_v18 = vsub.f32 %v1268_v50, %v1284_v27  ;;  %v1525_v54 = vmul.f32 %v5585_v30, %v1505_v21 }
 0x464   :  { %v1449_v2 = vsub.f32 1.5, %v1448_v60 }
 0x465   :  { %v4089_v62 = vpop.eup %4088  ;;  %v1332_v28 = vadd.f32 1e-05, %v1300_v18  ;;  %v1545_v52 = vadd.f32 %v5594_v55, %v1525_v54 }
 0x466   :  { %v1450_v32 = vmul.f32 %v4087_v0, %v1449_v2  ;;  %v1456_v29 = vmul.f32 %v4089_v62, %v1331_v44  ;;  %v1188_v36 = vpop.xlane.xlu1 %1187  ;;  %vm1462_vm7 = vweird.f32 %v4089_v62 }
 0x467   :  { %4090 = vrsqrt.f32 %v1332_v28  ;;  %v5680_v38 = vmul.f32 0.015625, %v1188_v36  ;;  %v1561_v12 = vmax.f32 %v1545_v52, 0.0  ;;  %vm1463_vm0 = vmor %vm1461_vm9, %vm1462_vm7  ;;  %vm1471_vm7 = vweird.f32 %v1332_v28 }
 0x468   :  { %v1457_v61 = vmul.f32 %v4089_v62, %v1456_v29  ;;  %v1252_v25 = vpop.xlane.xlu2 %1251  ;;  %v1454_v53 = vsel %vm1453_vm3, %v4087_v0, %v1450_v32 }
 0x469   :  { %v1285_v58 = vmul.f32 %v5680_v38, %v5680_v38  ;;  %v1269_v8 = vmul.f32 0.015625, %v1252_v25  ;;  %1633 = vmatmul.f32.gmra.mxu0 %v1561_v12  ;;  %v1506_v49 = vmul.f32 %v1454_v53, %v1314_v59 }
 0x46a   :  { %v1458_v14 = vmul.f32 0.5, %v1457_v61 }
 0x46b   :  { %v1301_v10 = vsub.f32 %v1269_v8, %v1285_v58  ;;  %v1526_v1 = vmul.f32 %v5585_v30, %v1506_v49 }
 0x46c   :  { %v1459_v48 = vsub.f32 1.5, %v1458_v14 }
 0x46d   :  { %v4091_v3 = vpop.eup %4090  ;;  %v1333_v43 = vadd.f32 1e-05, %v1301_v10  ;;  %v1546_v13 = vadd.f32 %v5594_v55, %v1526_v1 }
 0x46e   :  { %v1460_v51 = vmul.f32 %v4089_v62, %v1459_v48  ;;  %v1466_v24 = vmul.f32 %v4091_v3, %v1332_v28  ;;  %v1190_v0 = vpop.xlane.xlu0 %1189  ;;  %vm1472_vm3 = vweird.f32 %v4091_v3 }
 0x46f   :  { %4092 = vrsqrt.f32 %v1333_v43  ;;  %v1206_v15 = vmul.f32 0.015625, %v1190_v0  ;;  %v1562_v35 = vmax.f32 %v1546_v13, 0.0  ;;  %vm1473_vm9 = vmor %vm1471_vm7, %vm1472_vm3  ;;  %vm1481_vm13 = vweird.f32 %v1333_v43 }
 0x470   :  { %v1467_v33 = vmul.f32 %v4091_v3, %v1466_v24  ;;  %v1254_v7 = vpop.xlane.xlu1 %1253  ;;  %v1464_v6 = vsel %vm1463_vm0, %v4089_v62, %v1460_v51  ;;  %v1316_v62 = vsub.f32 %v5506_v5, %v5672_v47  ;;  %v1317_v5 = vsub.f32 %v5524_v19, %v5680_v38 }
 0x471   :  { %v1286_v56 = vmul.f32 %v1206_v15, %v1206_v15  ;;  %v1270_v23 = vmul.f32 0.015625, %v1254_v7  ;;  %1636 = vmatmul.f32.gmra.mxu0 %v1562_v35  ;;  %v1507_v27 = vmul.f32 %v1464_v6, %v1315_v63 }
 0x472   :  { %v1468_v50 = vmul.f32 0.5, %v1467_v33 }
 0x473   :  { %v1302_v21 = vsub.f32 %v1270_v23, %v1286_v56  ;;  %v1527_v44 = vmul.f32 %v5585_v30, %v1507_v27 }
 0x474   :  { %v1469_v60 = vsub.f32 1.5, %v1468_v50 }
 0x475   :  { %v4093_v18 = vpop.eup %4092  ;;  %v1334_v54 = vadd.f32 1e-05, %v1302_v21  ;;  %v1547_v34 = vadd.f32 %v5594_v55, %v1527_v44 }
 0x476   :  { %v1470_v22 = vmul.f32 %v4091_v3, %v1469_v60  ;;  %v1476_v2 = vmul.f32 %v4093_v18, %v1333_v43  ;;  %vm1482_vm0 = vweird.f32 %v4093_v18  ;;  %v1318_v43 = vsub.f32 %v5546_v9, %v1206_v15 }
 0x477   :  { %4094 = vrsqrt.f32 %v1334_v54  ;;  %v1563_v52 = vmax.f32 %v1547_v34, 0.0  ;;  %vm1483_vm3 = vmor %vm1481_vm13, %vm1482_vm0  ;;  %vm7321_vm13 = vnez %v7247_v42  ;;  %vm7322_vm0 = vnez %v7249_v26 }
 0x478   :  { %v1477_v32 = vmul.f32 %v4093_v18, %v1476_v2  ;;  %v1474_v29 = vsel %vm1473_vm9, %v4091_v3, %v1470_v22  ;;  %vm1491_vm9 = vweird.f32 %v1334_v54 }
 0x479   :  { %1639 = vmatmul.f32.gmra.mxu0 %v1563_v52  ;;  %v1508_v36 = vmul.f32 %v1474_v29, %v1316_v62 }
 0x47a   :  { %v1478_v59 = vmul.f32 0.5, %v1477_v32 }
 0x47b   :  { %v1528_v12 = vmul.f32 %v5585_v30, %v1508_v36 }
 0x47c   :  { %v1479_v61 = vsub.f32 1.5, %v1478_v59 }
 0x47d   :  { %v4095_v25 = vpop.eup %4094  ;;  %v1548_v53 = vadd.f32 %v5594_v55, %v1528_v12 }
 0x47e   :  { %v1480_v28 = vmul.f32 %v4093_v18, %v1479_v61  ;;  %v1486_v58 = vmul.f32 %v4095_v25, %v1334_v54  ;;  %vm1492_vm7 = vweird.f32 %v4095_v25 }
 0x47f   :  { %v1564_v47 = vmax.f32 %v1548_v53, 0.0  ;;  %vm1493_vm12 = vmor %vm1491_vm9, %vm1492_vm7  ;;  %vm7324_vm7 = vnez %v7253_v31  ;;  %vm7325_vm9 = vnez %v7256_v16 }
 0x480   :  { %v1487_v8 = vmul.f32 %v4095_v25, %v1486_v58  ;;  %v1484_v49 = vsel %vm1483_vm3, %v4093_v18, %v1480_v28  ;;  %vm7323_vm3 = vnez %v7251_v11 }
 0x481   :  { %1642 = vmatmul.f32.gmra.mxu0 %v1564_v47  ;;  %v1509_v14 = vmul.f32 %v1484_v49, %v1317_v5 }
 0x482   :  { %v1488_v10 = vmul.f32 0.5, %v1487_v8 }
 0x483   :  { %v1529_v1 = vmul.f32 %v5585_v30, %v1509_v14 }
 0x484   :  { %v1489_v48 = vsub.f32 1.5, %v1488_v10 }
 0x485   :  { %v1549_v3 = vadd.f32 %v5594_v55, %v1529_v1 }
 0x486   :  { %v1490_v13 = vmul.f32 %v4095_v25, %v1489_v48 }
 0x487   :  { %v1565_v51 = vmax.f32 %v1549_v3, 0.0 }
 0x488   :  { %v1494_v19 = vsel %vm1493_vm12, %v4095_v25, %v1490_v13  ;;  %vm7320_vm12 = vnez %v7245_v46 }
 0x489   :  { %1645 = vmatmul.f32.gmra.mxu0 %v1565_v51  ;;  %v1510_v38 = vmul.f32 %v1494_v19, %v1318_v43 }
 0x48b   :  { %v1530_v24 = vmul.f32 %v5585_v30, %v1510_v38  ;;  %v3991_v30 = vld [vmem:[%s7016_s13] ss:$0 sm:$0xff] }
 0x48d   :  { %v1550_v0 = vadd.f32 %v5594_v55, %v1530_v24 }
 0x48f   :  { %v1566_v63 = vmax.f32 %v1550_v0, 0.0 }
 0x491   :  { %1648 = vmatmul.f32.gmra.mxu0 %v1566_v63 }
 0x496   :  { %v1604_v35 = vpop.f32.mrf.mxu0 }
 0x49e   :  { %v1607_v33 = vpop.f32.mrf.mxu0 }
 0x49f   :  { %v1608_v63 = vadd.f32 %v3991_v30, %v1607_v33 }
 0x4a6   :  { %v1610_v7 = vpop.f32.mrf.mxu0 }
 0x4a7   :  { %v1611_v24 = vadd.f32 %v3991_v30, %v1610_v7 }
 0x4ae   :  { %v1613_v6 = vpop.f32.mrf.mxu0 }
 0x4af   :  { %v1614_v51 = vadd.f32 %v3991_v30, %v1613_v6  ;;  %v5744_v6 = vmax.f32 %v1608_v63, 0.0 }
 0x4b1   :  { %7300 = vst [vmem:[#allocation48_spill] sm:$0xff] %v5744_v6 }
 0x4b6   :  { %v1616_v56 = vpop.f32.mrf.mxu0 }
 0x4b7   :  { %v1617_v13 = vadd.f32 %v3991_v30, %v1616_v56  ;;  %v1605_v56 = vadd.f32 %v3991_v30, %v1604_v35 }
 0x4b9   :  { %v5736_v0 = vmax.f32 %v1617_v13, 0.0 }
 0x4bb   :  { %7297 = vst [vmem:[#allocation10_spill] sm:$0xff] %v5736_v0 }
 0x4be   :  { %v1619_v23 = vpop.f32.mrf.mxu0 }
 0x4bf   :  { %v1620_v1 = vadd.f32 %v3991_v30, %v1619_v23  ;;  %v5738_v23 = vmax.f32 %v1614_v51, 0.0 }
 0x4c1   :  { %v5732_v19 = vmax.f32 %v1620_v1, 0.0  ;;  %7298 = vst [vmem:[#allocation46_spill] sm:$0xff] %v5738_v23 }
 0x4c3   :  { %7296 = vst [vmem:[#allocation8_spill] sm:$0xff] %v5732_v19 }
 0x4c6   :  { %v1622_v27 = vpop.f32.mrf.mxu0 }
 0x4c7   :  { %v1623_v14 = vadd.f32 %v3991_v30, %v1622_v27  ;;  %v1670_v27 = vpack.c.bf16 %v5732_v19, %v5736_v0 }
 0x4c9   :  { %v5730_v43 = vmax.f32 %v1623_v14, 0.0 }
 0x4cb   :  { %7295 = vst [vmem:[#allocation9_spill] sm:$0xff] %v5730_v43 }
 0x4ce   :  { %v1625_v50 = vpop.f32.mrf.mxu0 }
 0x4cf   :  { %v1626_v47 = vadd.f32 %v3991_v30, %v1625_v50  ;;  %v5742_v50 = vmax.f32 %v1611_v24, 0.0 }
 0x4d1   :  { %v5726_v48 = vmax.f32 %v1626_v47, 0.0  ;;  %7299 = vst [vmem:[#allocation47_spill] sm:$0xff] %v5742_v50 }
 0x4d3   :  { %7294 = vst [vmem:[#allocation11_spill] sm:$0xff] %v5726_v48  ;;  %v1671_v38 = vpack.c.bf16 %v5726_v48, %v5730_v43 }
 0x4d6   :  { %v1628_v9 = vpop.f32.mrf.mxu0 }
 0x4d7   :  { %v1629_v58 = vadd.f32 %v3991_v30, %v1628_v9  ;;  %v1669_v9 = vpack.c.bf16 %v5738_v23, %v5742_v50 }
 0x4d9   :  { %v5724_v10 = vmax.f32 %v1629_v58, 0.0 }
 0x4db   :  { %7293 = vst [vmem:[#allocation12_spill] sm:$0xff] %v5724_v10 }
 0x4de   :  { %v1631_v15 = vpop.f32.mrf.mxu0 }
 0x4df   :  { %v1632_v25 = vadd.f32 %v3991_v30, %v1631_v15  ;;  %v5748_v15 = vmax.f32 %v1605_v56, 0.0 }
 0x4e1   :  { %v5720_v8 = vmax.f32 %v1632_v25, 0.0  ;;  %7301 = vst [vmem:[#allocation49_spill] sm:$0xff] %v5748_v15  ;;  %v1668_v33 = vpack.c.bf16 %v5744_v6, %v5748_v15 }
 0x4e3   :  { %7292 = vst [vmem:[#allocation13_spill] sm:$0xff] %v5720_v8  ;;  %v1672_v3 = vpack.c.bf16 %v5720_v8, %v5724_v10 }
 0x4e6   :  { %v1634_v21 = vpop.f32.mrf.mxu0 }
 0x4e7   :  { %v1635_v12 = vadd.f32 %v3991_v30, %v1634_v21 }
 0x4e9   :  { %v5718_v5 = vmax.f32 %v1635_v12, 0.0 }
 0x4eb   :  { %7291 = vst [vmem:[#allocation14_spill] sm:$0xff] %v5718_v5 }
 0x4ee   :  { %v1637_v44 = vpop.f32.mrf.mxu0 }
 0x4ef   :  { %v1638_v29 = vadd.f32 %v3991_v30, %v1637_v44 }
 0x4f1   :  { %v5714_v53 = vmax.f32 %v1638_v29, 0.0 }
 0x4f3   :  { %7290 = vst [vmem:[#allocation15_spill] sm:$0xff] %v5714_v53  ;;  %v1673_v49 = vpack.c.bf16 %v5714_v53, %v5718_v5 }
 0x4f6   :  { %v1640_v60 = vpop.f32.mrf.mxu0 }
 0x4f7   :  { %v1641_v62 = vadd.f32 %v3991_v30, %v1640_v60 }
 0x4f9   :  { %v5712_v61 = vmax.f32 %v1641_v62, 0.0 }
 0x4fb   :  { %7289 = vst [vmem:[#allocation16_spill] sm:$0xff] %v5712_v61 }
 0x4fe   :  { %v1643_v18 = vpop.f32.mrf.mxu0 }
 0x4ff   :  { %v1644_v22 = vadd.f32 %v3991_v30, %v1643_v18 }
 0x501   :  { %v5708_v36 = vmax.f32 %v1644_v22, 0.0 }
 0x503   :  { %7288 = vst [vmem:[#allocation17_spill] sm:$0xff] %v5708_v36  ;;  %v1674_v28 = vpack.c.bf16 %v5708_v36, %v5712_v61 }
 0x506   :  { %v1646_v54 = vpop.f32.mrf.mxu0 }
 0x507   :  { %v1647_v55 = vadd.f32 %v3991_v30, %v1646_v54 }
 0x509   :  { %v5704_v52 = vmax.f32 %v1647_v55, 0.0 }
 0x50b   :  { %7286 = vst [vmem:[#allocation19_spill] sm:$0xff] %v5704_v52 }
 0x50e   :  { %v1649_v34 = vpop.f32.mrf.mxu0 }
 0x50f   :  { %v1650_v2 = vadd.f32 %v3991_v30, %v1649_v34  ;;  %v7312_v30 = vld [vmem:[#allocation36_spill] sm:$0xff] }
 0x511   :  { %v5706_v32 = vmax.f32 %v1650_v2, 0.0 }
 0x513   :  { %7287 = vst [vmem:[#allocation18_spill] sm:$0xff] %v5706_v32  ;;  %v1675_v59 = vpack.c.bf16 %v5706_v32, %v5704_v52 }
 0x515   :  { %1676 = vmatpush.bf16.msra.mxu1 %v1675_v59 }
 0x519   :  { %1677 = vmatpush.bf16.msra.mxu1 %v1674_v28 }
 0x51d   :  { %1678 = vmatpush.bf16.msra.mxu1 %v1673_v49 }
 0x521   :  { %1679 = vmatpush.bf16.msra.mxu1 %v1672_v3 }
 0x525   :  { %1680 = vmatpush.bf16.msra.mxu1 %v1671_v38 }
 0x529   :  { %1681 = vmatpush.bf16.msra.mxu1 %v1670_v27  ;;  %v7310_v27 = vld [vmem:[#allocation34_spill] sm:$0xff] }
 0x52d   :  { %1682 = vmatpush.bf16.msra.mxu1 %v1669_v9  ;;  %v7311_v9 = vld [vmem:[#allocation35_spill] sm:$0xff] }
 0x531   :  { %1683 = vmatpush.bf16.msra.mxu1 %v1668_v33 }
 0x534   :  { %3759 = vmatmul.msk.bf16.vlgmr.msra.gmra.mxu1 %vm4880_vm2, %v7241_v41 }
 0x544   :  { %3761 = vmatmul.msk.bf16.gmra.mxu1 %vm4901_vm5, %v7241_v41 }
 0x554   :  { %3763 = vmatmul.msk.bf16.gmra.mxu1 %vm4922_vm8, %v7241_v41 }
 0x564   :  { %3765 = vmatmul.msk.bf16.gmra.mxu1 %vm4943_vm11, %v7241_v41 }
 0x574   :  { %3767 = vmatmul.msk.bf16.gmra.mxu1 %vm4964_vm14, %v7241_v41 }
 0x584   :  { %3769 = vmatmul.msk.bf16.gmra.mxu1 %vm4985_vm1, %v7241_v41 }
 0x594   :  { %3771 = vmatmul.msk.bf16.gmra.mxu1 %vm4994_vm6, %v7241_v41 }
 0x5a4   :  { %3773 = vmatmul.msk.bf16.gmra.mxu1 %vm5007_vm10, %v7241_v41 }
 0x5b1   :  { %v1685_v55 = vpop.f32.mrf.mxu1 }
 0x5b2   :  { %v1686_v1 = vadd.f32 %v1685_v55, %v5043_v20  ;;  %v7313_v55 = vld [vmem:[#allocation37_spill] sm:$0xff] }
 0x5b4   :  { %v1725_v63 = vmax.f32 %v1686_v1, 0.0 }
 0x5b9   :  { %v1687_v34 = vpop.f32.mrf.mxu1 }
 0x5ba   :  { %v1688_v13 = vadd.f32 %v1687_v34, %v5057_v45  ;;  %v7315_v45 = vld [vmem:[#allocation39_spill] sm:$0xff] }
 0x5c1   :  { %v1690_v22 = vpop.f32.mrf.mxu1 }
 0x5c2   :  { %v1691_v33 = vadd.f32 %v1690_v22, %v7311_v9  ;;  %v7317_v22 = vld [vmem:[#allocation41_spill] sm:$0xff] }
 0x5c9   :  { %v1692_v2 = vpop.f32.mrf.mxu1 }
 0x5ca   :  { %v1693_v54 = vadd.f32 %v1692_v2, %v7312_v30  ;;  %v7318_v2 = vld [vmem:[#allocation42_spill] sm:$0xff]  ;;  %v1727_v30 = vmax.f32 %v1691_v33, 0.0 }
 0x5d1   :  { %v1695_v62 = vpop.f32.mrf.mxu1 }
 0x5d2   :  { %v1696_v51 = vadd.f32 %v1695_v62, %v5051_v4  ;;  %v7316_v62 = vld [vmem:[#allocation40_spill] sm:$0xff] }
 0x5d9   :  { %v1697_v29 = vpop.f32.mrf.mxu1 }
 0x5da   :  { %v1698_v3 = vadd.f32 %v1697_v29, %v5047_v17  ;;  %v1726_v29 = vmax.f32 %v1688_v13, 0.0  ;;  %v7314_v17 = vld [vmem:[#allocation38_spill] sm:$0xff] }
 0x5dc   :  { %v1730_v18 = vmax.f32 %v1698_v3, 0.0 }
 0x5de   :  { %v5793_v13 = vadd.f32 1e-07, %v1730_v18 }
 0x5e1   :  { %v1700_v59 = vpop.f32.mrf.mxu1 }
 0x5e2   :  { %v1701_v38 = vadd.f32 %v1700_v59, %v5053_v39  ;;  %v1729_v59 = vmax.f32 %v1696_v51, 0.0 }
 0x5e4   :  { %v1731_v39 = vmax.f32 %v1701_v38, 0.0  ;;  %v1758_v38 = vstv %s3774_s7 }
 0x5e9   :  { %v1702_v12 = vpop.f32.mrf.mxu1 }
 0x5ea   :  { %v1703_v24 = vadd.f32 %v1702_v12, %v5055_v40  ;;  %v5789_v40 = vadd.f32 1e-07, %v1725_v63  ;;  %v5799_v63 = vadd.f32 1e-07, %v1731_v39 }
 0x5ec   :  { %v1732_v12 = vmax.f32 %v1703_v24, 0.0  ;;  %v5797_v24 = vadd.f32 1e-07, %v1729_v59  ;;  %v5830_v59 = vmul.f32 %v1758_v38, %v5799_v63 }
 0x5f1   :  { %v1705_v25 = vpop.f32.mrf.mxu1 }
 0x5f2   :  { %v1706_v20 = vadd.f32 %v1705_v25, %v7313_v55  ;;  %v1728_v25 = vmax.f32 %v1693_v54, 0.0  ;;  %v5805_v54 = vadd.f32 1e-07, %v1727_v30  ;;  %v5827_v30 = vmul.f32 %v1758_v38, %v5797_v24 }
 0x5f4   :  { %v5807_v18 = vadd.f32 1e-07, %v1728_v25 }
 0x5f9   :  { %v1707_v28 = vpop.f32.mrf.mxu1 }
 0x5fa   :  { %v1708_v56 = vadd.f32 %v1707_v28, %v7310_v27 }
 0x5fc   :  { %v1734_v28 = vmax.f32 %v1708_v56, 0.0  ;;  %v5801_v56 = vadd.f32 1e-07, %v1732_v12 }
 0x5fe   :  { %v5833_v12 = vmul.f32 %v1758_v38, %v5801_v56 }
 0x601   :  { %v1710_v58 = vpop.f32.mrf.mxu1 }
 0x602   :  { %v1711_v34 = vadd.f32 %v1710_v58, %v7314_v17  ;;  %v1733_v58 = vmax.f32 %v1706_v20, 0.0  ;;  %v5795_v17 = vadd.f32 1e-07, %v1726_v29  ;;  %v5810_v20 = vmul.f32 %v1758_v38, %v5793_v13 }
 0x609   :  { %v1712_v47 = vpop.f32.mrf.mxu1 }
 0x60a   :  { %v1713_v60 = vadd.f32 %v1712_v47, %v7315_v45  ;;  %v1735_v47 = vmax.f32 %v1711_v34, 0.0 }
 0x60c   :  { %v5817_v39 = vadd.f32 1e-07, %v1735_v47  ;;  %v7319_v47 = vld [vmem:[#allocation43_spill] sm:$0xff] }
 0x60e   :  { %v1769_v45 = vmul.f32 %v1758_v38, %v5817_v39 }
 0x611   :  { %v1715_v49 = vpop.f32.mrf.mxu1 }
 0x612   :  { %v1716_v9 = vadd.f32 %v1715_v49, %v7317_v22  ;;  %v5803_v49 = vadd.f32 1e-07, %v1734_v28 }
 0x619   :  { %v1717_v14 = vpop.f32.mrf.mxu1 }
 0x61a   :  { %v1718_v4 = vadd.f32 %v1717_v14, %v7316_v62  ;;  %v1736_v14 = vmax.f32 %v1713_v60, 0.0  ;;  %v5812_v60 = vadd.f32 1e-07, %v1733_v58 }
 0x61c   :  { %v1738_v51 = vmax.f32 %v1718_v4, 0.0  ;;  %v5815_v4 = vmul.f32 %v1758_v38, %v5789_v40  ;;  %v5819_v29 = vadd.f32 1e-07, %v1736_v14  ;;  %v1767_v62 = vmul.f32 %v1758_v38, %v5812_v60 }
 0x61e   :  { %v5821_v34 = vadd.f32 1e-07, %v1738_v51  ;;  %v5840_v51 = vmul.f32 %v1758_v38, %v5805_v54  ;;  %v1770_v55 = vmul.f32 %v1758_v38, %v5819_v29 }
 0x621   :  { %v1720_v1 = vpop.f32.mrf.mxu1 }
 0x622   :  { %v1721_v3 = vadd.f32 %v1720_v1, %v7318_v2  ;;  %v1737_v1 = vmax.f32 %v1716_v9, 0.0  ;;  %v5824_v9 = vmul.f32 %v1758_v38, %v5795_v17  ;;  %v5843_v2 = vmul.f32 %v1758_v38, %v5807_v18 }
 0x624   :  { %v1739_v33 = vmax.f32 %v1721_v3, 0.0  ;;  %v1768_v3 = vmul.f32 %v1758_v38, %v5803_v49  ;;  %v5836_v25 = vadd.f32 1e-07, %v1737_v1  ;;  %v1776_v22 = vmax.f32 %v5824_v9, %v5810_v20 }
 0x625   :  { %v1772_v1 = vmul.f32 %v1758_v38, %v5821_v34  ;;  %v1778_v27 = vmax.f32 %v5843_v2, %v5833_v12 }
 0x626   :  { %v1755_v58 = vadd.f32 1e-07, %v1739_v33  ;;  %v1780_v44 = vmax.f32 %v1776_v22, %v1768_v3  ;;  %v1771_v21 = vmul.f32 %v1758_v38, %v5836_v25 }
 0x627   :  { %v1782_v36 = vmax.f32 %v1778_v27, %v1770_v55 }
 0x628   :  { %v1773_v35 = vmul.f32 %v1758_v38, %v1755_v58  ;;  %v1784_v61 = vmax.f32 %v1780_v44, %v1772_v1 }
 0x629   :  { %v1722_v28 = vpop.f32.mrf.mxu1 }
 0x62a   :  { %v1723_v14 = vadd.f32 %v1722_v28, %v7319_v47  ;;  %v1775_v28 = vmax.f32 %v5815_v4, %v5827_v30  ;;  %v1777_v47 = vmax.f32 %v5840_v51, %v5830_v59 }
 0x62c   :  { %v1740_v33 = vmax.f32 %v1723_v14, 0.0  ;;  %v1779_v32 = vmax.f32 %v1775_v28, %v1767_v62  ;;  %v1781_v52 = vmax.f32 %v1777_v47, %v1769_v45 }
 0x62e   :  { %v1756_v7 = vadd.f32 1e-07, %v1740_v33  ;;  %v1783_v14 = vmax.f32 %v1779_v32, %v1771_v21  ;;  %v1785_v5 = vmax.f32 %v1781_v52, %v1773_v35 }
 0x630   :  { %v1774_v53 = vmul.f32 %v1758_v38, %v1756_v7  ;;  %v1787_v10 = vmax.f32 %v1783_v14, %v1784_v61 }
 0x632   :  { %v1786_v8 = vmax.f32 %v1782_v36, %v1774_v53 }
 0x634   :  { %v1788_v48 = vmax.f32 %v1785_v5, %v1786_v8 }
 0x636   :  { %v1789_v43 = vmax.f32 %v1787_v10, %v1788_v48 }
 0x638   :  { %v1790_v19 = vrot.slane %v1789_v43, 4 }
 0x63a   :  { %v1791_v0 = vmax.f32 %v1789_v43, %v1790_v19 }
 0x63c   :  { %v1792_v23 = vrot.slane %v1791_v0, 2 }
 0x63e   :  { %v1793_v50 = vmax.f32 %v1791_v0, %v1792_v23 }
 0x640   :  { %v1794_v22 = vrot.slane %v1793_v50, 1 }
 0x642   :  { %v5858_v6 = vmax.f32 %v1793_v50, %v1794_v22 }
 0x644   :  { %v1810_v33 = vsub.f32 %v1773_v35, %v5858_v6  ;;  %v1811_v47 = vsub.f32 %v1774_v53, %v5858_v6  ;;  %v1808_v44 = vsub.f32 %v1771_v21, %v5858_v6  ;;  %v1809_v32 = vsub.f32 %v1772_v1, %v5858_v6 }
 0x645   :  { %v1806_v52 = vsub.f32 %v1769_v45, %v5858_v6  ;;  %v1807_v36 = vsub.f32 %v1770_v55, %v5858_v6  ;;  %v1804_v43 = vsub.f32 %v1767_v62, %v5858_v6  ;;  %v1805_v53 = vsub.f32 %v1768_v3, %v5858_v6 }
 0x646   :  { %v1840_v61 = vmul.f32 1.442695, %v1810_v33  ;;  %v1842_v5 = vmul.f32 1.442695, %v1811_v47  ;;  %v1836_v8 = vmul.f32 1.442695, %v1808_v44  ;;  %v1802_v0 = vsub.f32 %v5830_v59, %v5858_v6 }
 0x647   :  { %v1838_v10 = vmul.f32 1.442695, %v1809_v32  ;;  %v1832_v48 = vmul.f32 1.442695, %v1806_v52  ;;  %v1834_v19 = vmul.f32 1.442695, %v1807_v36  ;;  %v1803_v50 = vsub.f32 %v5833_v12, %v5858_v6 }
 0x648   :  { %4096 = vpow2.f32 %v1840_v61  ;;  %v1828_v45 = vmul.f32 1.442695, %v1804_v43  ;;  %v1830_v23 = vmul.f32 1.442695, %v1805_v53  ;;  %v1796_v21 = vsub.f32 %v5815_v4, %v5858_v6 }
 0x649   :  { %4098 = vpow2.f32 %v1842_v5  ;;  %v1824_v62 = vmul.f32 1.442695, %v1802_v0  ;;  %v1797_v38 = vsub.f32 %v5824_v9, %v5858_v6  ;;  %v1800_v28 = vsub.f32 %v5827_v30, %v5858_v6 }
 0x64a   :  { %4100 = vpow2.f32 %v1836_v8  ;;  %v1826_v12 = vmul.f32 1.442695, %v1803_v50  ;;  %v1801_v22 = vsub.f32 %v5810_v20, %v5858_v6  ;;  %v1812_v47 = vmul.f32 1.442695, %v1796_v21 }
 0x64b   :  { %4102 = vpow2.f32 %v1838_v10  ;;  %v1814_v44 = vmul.f32 1.442695, %v1797_v38  ;;  %v1820_v30 = vmul.f32 1.442695, %v1800_v28  ;;  %v1798_v52 = vsub.f32 %v5840_v51, %v5858_v6 }
 0x64c   :  { %4104 = vpow2.f32 %v1832_v48  ;;  %v1822_v36 = vmul.f32 1.442695, %v1801_v22  ;;  %v1799_v20 = vsub.f32 %v5843_v2, %v5858_v6  ;;  %v3818_v22 = vld [vmem:[%s7011_s8 + $0xd8] sm:$0xff] }
 0x64d   :  { %4106 = vpow2.f32 %v1834_v19  ;;  %v1816_v48 = vmul.f32 1.442695, %v1798_v52  ;;  %v3808_v52 = vld [vmem:[%s7011_s8 + $0x88] sm:$0xff] }
 0x64e   :  { %v4097_v35 = vpop.eup %4096  ;;  %4108 = vpow2.f32 %v1828_v45  ;;  %v1818_v51 = vmul.f32 1.442695, %v1799_v20 }
 0x64f   :  { %v4099_v27 = vpop.eup %4098  ;;  %v1858_v55 = vmul.f32 %v4097_v35, %v1755_v58  ;;  %4110 = vpow2.f32 %v1830_v23 }
 0x650   :  { %v4101_v3 = vpop.eup %4100  ;;  %v1859_v1 = vmul.f32 %v4099_v27, %v1756_v7  ;;  %v1875_v59 = vpack.c.bf16 %v4099_v27, %v4097_v35  ;;  %4112 = vpow2.f32 %v1824_v62 }
 0x651   :  { %v4103_v14 = vpop.eup %4102  ;;  %v1856_v58 = vmul.f32 %v4101_v3, %v5836_v25  ;;  %4114 = vpow2.f32 %v1826_v12 }
 0x652   :  { %v4105_v4 = vpop.eup %4104  ;;  %v1874_v33 = vpack.c.bf16 %v1859_v1, %v1858_v55  ;;  %1925 = vmatpush.bf16.msrb.mxu3 %v1875_v59  ;;  %v1857_v9 = vmul.f32 %v4103_v14, %v5821_v34  ;;  %v1873_v32 = vpack.c.bf16 %v4103_v14, %v4101_v3  ;;  %4116 = vpow2.f32 %v1812_v47  ;;  %v3813_v47 = vld [vmem:[%s7011_s8 + $0xb0] sm:$0xff] }
 0x653   :  { %v4107_v7 = vpop.eup %4106  ;;  %v1854_v34 = vmul.f32 %v4105_v4, %v5817_v39  ;;  %4118 = vpow2.f32 %v1814_v44  ;;  %v3811_v44 = vld [vmem:[%s7011_s8 + $0xa0] sm:$0xff] }
 0x654   :  { %1876 = vmatpush.bf16.msra.mxu2 %v1874_v33  ;;  %v4109_v61 = vpop.eup %4108  ;;  %v1872_v25 = vpack.c.bf16 %v1857_v9, %v1856_v58  ;;  %v1855_v5 = vmul.f32 %v4107_v7, %v5819_v29  ;;  %v1871_v10 = vpack.c.bf16 %v4107_v7, %v4105_v4  ;;  %4120 = vpow2.f32 %v1820_v30  ;;  %v3817_v4 = vld [vmem:[%s7011_s8 + $0xd0] sm:$0xff]  ;;  %v3816_v33 = vld [vmem:[%s7011_s8 + $0xc8] sm:$0xff]  ;;  %v3815_v58 = vld [vmem:[%s7011_s8 + $0xc0] sm:$0xff] }
 0x655   :  { %v4111_v8 = vpop.eup %4110  ;;  %4122 = vpow2.f32 %v1822_v36  ;;  %v1852_v6 = vmul.f32 %v4109_v61, %v5812_v60  ;;  %v3814_v9 = vld [vmem:[%s7011_s8 + $0xb8] sm:$0xff]  ;;  %v3812_v7 = vld [vmem:[%s7011_s8 + $0xa8] sm:$0xff]  ;;  %v3809_v30 = vld [vmem:[%s7011_s8 + $0x90] sm:$0xff] }
 0x656   :  { %1926 = vmatpush.bf16.msrb.mxu3 %v1873_v32  ;;  %v4113_v43 = vpop.eup %4112  ;;  %v1870_v19 = vpack.c.bf16 %v1855_v5, %v1854_v34  ;;  %v1853_v2 = vmul.f32 %v4111_v8, %v5803_v49  ;;  %v1869_v29 = vpack.c.bf16 %v4111_v8, %v4109_v61  ;;  %4124 = vpow2.f32 %v1816_v48  ;;  %v3810_v32 = vld [vmem:[%s7011_s8 + $0x98] sm:$0xff]  ;;  %v3807_v36 = vld [vmem:[%s7011_s8 + $0x80] sm:$0xff] }
 0x657   :  { %v4115_v53 = vpop.eup %4114  ;;  %4126 = vpow2.f32 %v1818_v51  ;;  %v1850_v35 = vmul.f32 %v4113_v43, %v5799_v63 }
 0x658   :  { %1877 = vmatpush.bf16.msra.mxu2 %v1872_v25  ;;  %v4117_v39 = vpop.eup %4116  ;;  %v1868_v50 = vpack.c.bf16 %v1853_v2, %v1852_v6  ;;  %v1851_v21 = vmul.f32 %v4115_v53, %v5801_v56  ;;  %v1867_v49 = vpack.c.bf16 %v4115_v53, %v4113_v43 }
 0x659   :  { %v4119_v0 = vpop.eup %4118  ;;  %v1844_v45 = vmul.f32 %v4117_v39, %v5789_v40 }
 0x65a   :  { %1927 = vmatpush.bf16.msrb.mxu3 %v1871_v10  ;;  %v4121_v23 = vpop.eup %4120  ;;  %v1845_v60 = vmul.f32 %v4119_v0, %v5795_v17  ;;  %v1866_v38 = vpack.c.bf16 %v1851_v21, %v1850_v35  ;;  %v1861_v12 = vpack.c.bf16 %v4119_v0, %v4117_v39  ;;  %v7326_v39 = vld [vmem:[#allocation48_spill] sm:$0xff]  ;;  %v7327_v21 = vld [vmem:[#allocation47_spill] sm:$0xff] }
 0x65b   :  { %v4123_v27 = vpop.eup %4122  ;;  %v1848_v3 = vmul.f32 %v4121_v23, %v5797_v24  ;;  %v3821_v24 = vld [vmem:[%s7011_s8 + $0xf0] sm:$0xff] }
 0x65c   :  { %1878 = vmatpush.bf16.msra.mxu2 %v1870_v19  ;;  %v1860_v55 = vpack.c.bf16 %v1845_v60, %v1844_v45  ;;  %v4125_v62 = vpop.eup %4124  ;;  %v1849_v40 = vmul.f32 %v4123_v27, %v5793_v13  ;;  %v1865_v59 = vpack.c.bf16 %v4123_v27, %v4121_v23  ;;  %v3822_v13 = vld [vmem:[%s7011_s8 + $0xf8] sm:$0xff] }
 0x65d   :  { %v4127_v1 = vpop.eup %4126  ;;  %v1846_v56 = vmul.f32 %v4125_v62, %v5805_v54  ;;  %2060 = vmatpush.msrb.mxu0 %v3822_v13  ;;  %v3820_v54 = vld [vmem:[%s7011_s8 + $0xe8] sm:$0xff] }
 0x65e   :  { %1928 = vmatpush.bf16.msrb.mxu3 %v1869_v29  ;;  %v1864_v63 = vpack.c.bf16 %v1849_v40, %v1848_v3  ;;  %v1847_v17 = vmul.f32 %v4127_v1, %v5807_v18  ;;  %v1863_v28 = vpack.c.bf16 %v4127_v1, %v4125_v62  ;;  %v3819_v18 = vld [vmem:[%s7011_s8 + $0xe0] sm:$0xff]  ;;  %v7328_v3 = vld [vmem:[#allocation46_spill] sm:$0xff] }
 0x65f   :  { %2061 = vmatpush.msrb.mxu0 %v3821_v24 }
 0x660   :  { %1879 = vmatpush.bf16.msra.mxu2 %v1868_v50  ;;  %v1862_v14 = vpack.c.bf16 %v1847_v17, %v1846_v56 }
 0x661   :  { %2062 = vmatpush.msrb.mxu0 %v3820_v54 }
 0x662   :  { %1929 = vmatpush.bf16.msrb.mxu3 %v1867_v49 }
 0x663   :  { %2063 = vmatpush.msrb.mxu0 %v3819_v18 }
 0x664   :  { %1880 = vmatpush.bf16.msra.mxu2 %v1866_v38 }
 0x665   :  { %2064 = vmatpush.msrb.mxu0 %v3818_v22  ;;  %v7330_v22 = vld [vmem:[#allocation8_spill] sm:$0xff] }
 0x666   :  { %1930 = vmatpush.bf16.msrb.mxu3 %v1865_v59 }
 0x667   :  { %2065 = vmatpush.msrb.mxu0 %v3817_v4 }
 0x668   :  { %1881 = vmatpush.bf16.msra.mxu2 %v1864_v63 }
 0x669   :  { %2066 = vmatpush.msrb.mxu0 %v3816_v33 }
 0x66a   :  { %1931 = vmatpush.bf16.msrb.mxu3 %v1863_v28  ;;  %v7329_v28 = vld [vmem:[#allocation10_spill] sm:$0xff] }
 0x66b   :  { %2067 = vmatpush.msrb.mxu0 %v3815_v58 }
 0x66c   :  { %1882 = vmatpush.bf16.msra.mxu2 %v1862_v14 }
 0x66d   :  { %2068 = vmatpush.msrb.mxu0 %v3814_v9 }
 0x66e   :  { %1932 = vmatpush.bf16.msrb.mxu3 %v1861_v12 }
 0x66f   :  { %2069 = vmatpush.msrb.mxu0 %v3813_v47 }
 0x670   :  { %1883 = vmatpush.bf16.msra.mxu2 %v1860_v55 }
 0x671   :  { %3792 = vmatmul.msk.bf16.vlgmr.msrb.gmra.mxu3 %vm5231_vm15, %v7241_v41  ;;  %2070 = vmatpush.msrb.mxu0 %v3812_v7 }
 0x673   :  { %3776 = vmatmul.msk.bf16.vlgmr.msra.gmra.mxu2 %vm5231_vm15, %v7241_v41  ;;  %2071 = vmatpush.msrb.mxu0 %v3811_v44  ;;  %v7331_v44 = vld [vmem:[#allocation9_spill] sm:$0xff] }
 0x675   :  { %2072 = vmatpush.msrb.mxu0 %v3810_v32 }
 0x677   :  { %2073 = vmatpush.msrb.mxu0 %v3809_v30 }
 0x679   :  { %2074 = vmatpush.msrb.mxu0 %v3808_v52 }
 0x67b   :  { %2075 = vmatpush.msrb.mxu0 %v3807_v36 }
 0x681   :  { %3794 = vmatmul.msk.bf16.gmra.mxu3 %vm5245_vm4, %v7241_v41 }
 0x683   :  { %3778 = vmatmul.msk.bf16.gmra.mxu2 %vm5245_vm4, %v7241_v41 }
 0x691   :  { %3796 = vmatmul.msk.bf16.gmra.mxu3 %vm7320_vm12, %v7241_v41 }
 0x693   :  { %3780 = vmatmul.msk.bf16.gmra.mxu2 %vm7320_vm12, %v7241_v41 }
 0x6a1   :  { %3798 = vmatmul.msk.bf16.gmra.mxu3 %vm7321_vm13, %v7241_v41 }
 0x6a3   :  { %3782 = vmatmul.msk.bf16.gmra.mxu2 %vm7321_vm13, %v7241_v41 }
 0x6b1   :  { %3800 = vmatmul.msk.bf16.gmra.mxu3 %vm7322_vm0, %v7241_v41 }
 0x6b3   :  { %3784 = vmatmul.msk.bf16.gmra.mxu2 %vm7322_vm0, %v7241_v41 }
 0x6c1   :  { %3802 = vmatmul.msk.bf16.gmra.mxu3 %vm7323_vm3, %v7241_v41 }
 0x6c3   :  { %3786 = vmatmul.msk.bf16.gmra.mxu2 %vm7323_vm3, %v7241_v41 }
 0x6d1   :  { %3804 = vmatmul.msk.bf16.gmra.mxu3 %vm7324_vm7, %v7241_v41 }
 0x6d3   :  { %3788 = vmatmul.msk.bf16.gmra.mxu2 %vm7324_vm7, %v7241_v41 }
 0x6e1   :  { %3806 = vmatmul.msk.bf16.gmra.mxu3 %vm7325_vm9, %v7241_v41 }
 0x6e3   :  { %3790 = vmatmul.msk.bf16.gmra.mxu2 %vm7325_vm9, %v7241_v41 }
 0x6f4   :  { %v1934_v20 = vpop.f32.mrf.mxu3 }
 0x6f5   :  { %v1974_v61 = vmax.f32 %v1934_v20, 1e-12 }
 0x6f6   :  { %v1885_v25 = vpop.f32.mrf.mxu2 }
 0x6f7   :  { %4128 = vrcp.f32 %v1974_v61 }
 0x6fc   :  { %v1936_v34 = vpop.f32.mrf.mxu3 }
 0x6fd   :  { %v4129_v5 = vpop.eup %4128  ;;  %v1975_v8 = vmax.f32 %v1936_v34, 1e-12 }
 0x6fe   :  { %v2006_v10 = vmul.f32 %v4129_v5, %v1885_v25  ;;  %v1887_v48 = vpop.f32.mrf.mxu2  ;;  %v7332_v25 = vld [vmem:[#allocation11_spill] sm:$0xff] }
 0x6ff   :  { %4130 = vrcp.f32 %v1975_v8 }
 0x700   :  { %v2022_v51 = vadd.f32 %v2006_v10, %v5748_v15 }
 0x702   :  { %2076 = vmatmul.f32.vlgmr.msrb.gmra.mxu0 %v2022_v51 }
 0x704   :  { %v1939_v43 = vpop.f32.mrf.mxu3 }
 0x705   :  { %v4131_v19 = vpop.eup %4130  ;;  %v1976_v6 = vmax.f32 %v1939_v43, 1e-12  ;;  %v7333_v43 = vld [vmem:[#allocation12_spill] sm:$0xff] }
 0x706   :  { %v2007_v2 = vmul.f32 %v4131_v19, %v1887_v48  ;;  %v1890_v53 = vpop.f32.mrf.mxu2 }
 0x707   :  { %4132 = vrcp.f32 %v1976_v6 }
 0x708   :  { %v2023_v29 = vadd.f32 %v2007_v2, %v7326_v39 }
 0x70a   :  { %2079 = vmatmul.f32.gmra.mxu0 %v2023_v29 }
 0x70c   :  { %v1941_v0 = vpop.f32.mrf.mxu3 }
 0x70d   :  { %v4133_v45 = vpop.eup %4132  ;;  %v1977_v23 = vmax.f32 %v1941_v0, 1e-12 }
 0x70e   :  { %v2008_v50 = vmul.f32 %v4133_v45, %v1890_v53  ;;  %v1892_v35 = vpop.f32.mrf.mxu2  ;;  %v7334_v45 = vld [vmem:[#allocation13_spill] sm:$0xff] }
 0x70f   :  { %4134 = vrcp.f32 %v1977_v23 }
 0x710   :  { %v2024_v60 = vadd.f32 %v2008_v50, %v7327_v21 }
 0x712   :  { %2082 = vmatmul.f32.gmra.mxu0 %v2024_v60 }
 0x714   :  { %v1944_v27 = vpop.f32.mrf.mxu3 }
 0x715   :  { %v4135_v49 = vpop.eup %4134  ;;  %v1978_v55 = vmax.f32 %v1944_v27, 1e-12 }
 0x716   :  { %v2009_v62 = vmul.f32 %v4135_v49, %v1892_v35  ;;  %v1895_v38 = vpop.f32.mrf.mxu2 }
 0x717   :  { %4136 = vrcp.f32 %v1978_v55  ;;  %v7335_v55 = vld [vmem:[#allocation14_spill] sm:$0xff] }
 0x718   :  { %v2025_v40 = vadd.f32 %v2009_v62, %v7328_v3 }
 0x71a   :  { %2085 = vmatmul.f32.gmra.mxu0 %v2025_v40 }
 0x71c   :  { %v1946_v1 = vpop.f32.mrf.mxu3 }
 0x71d   :  { %v4137_v59 = vpop.eup %4136  ;;  %v1979_v63 = vmax.f32 %v1946_v1, 1e-12 }
 0x71e   :  { %v2010_v56 = vmul.f32 %v4137_v59, %v1895_v38  ;;  %v1897_v17 = vpop.f32.mrf.mxu2 }
 0x71f   :  { %4138 = vrcp.f32 %v1979_v63 }
 0x720   :  { %v2026_v14 = vadd.f32 %v2010_v56, %v7329_v28  ;;  %v7336_v56 = vld [vmem:[#allocation15_spill] sm:$0xff] }
 0x722   :  { %2088 = vmatmul.f32.gmra.mxu0 %v2026_v14 }
 0x724   :  { %v1949_v12 = vpop.f32.mrf.mxu3 }
 0x725   :  { %v4139_v13 = vpop.eup %4138  ;;  %v1980_v24 = vmax.f32 %v1949_v12, 1e-12 }
 0x726   :  { %v2011_v54 = vmul.f32 %v4139_v13, %v1897_v17  ;;  %v1900_v18 = vpop.f32.mrf.mxu2 }
 0x727   :  { %4140 = vrcp.f32 %v1980_v24 }
 0x728   :  { %v2027_v4 = vadd.f32 %v2011_v54, %v7330_v22  ;;  %v7337_v54 = vld [vmem:[#allocation16_spill] sm:$0xff] }
 0x72a   :  { %2091 = vmatmul.f32.gmra.mxu0 %v2027_v4 }
 0x72c   :  { %v1951_v33 = vpop.f32.mrf.mxu3 }
 0x72d   :  { %v4141_v58 = vpop.eup %4140  ;;  %v1981_v9 = vmax.f32 %v1951_v33, 1e-12 }
 0x72e   :  { %v2012_v47 = vmul.f32 %v4141_v58, %v1900_v18  ;;  %v1902_v7 = vpop.f32.mrf.mxu2 }
 0x72f   :  { %4142 = vrcp.f32 %v1981_v9 }
 0x730   :  { %v2028_v32 = vadd.f32 %v2012_v47, %v7331_v44 }
 0x732   :  { %2094 = vmatmul.f32.gmra.mxu0 %v2028_v32 }
 0x734   :  { %v1954_v30 = vpop.f32.mrf.mxu3 }
 0x735   :  { %v4143_v52 = vpop.eup %4142  ;;  %v1982_v36 = vmax.f32 %v1954_v30, 1e-12 }
 0x736   :  { %v2013_v20 = vmul.f32 %v4143_v52, %v1902_v7  ;;  %v1905_v61 = vpop.f32.mrf.mxu2  ;;  %v7338_v7 = vld [vmem:[#allocation17_spill] sm:$0xff] }
 0x737   :  { %4144 = vrcp.f32 %v1982_v36 }
 0x738   :  { %v2029_v34 = vadd.f32 %v2013_v20, %v7332_v25 }
 0x73a   :  { %2097 = vmatmul.f32.gmra.mxu0 %v2029_v34  ;;  %v7339_v34 = vld [vmem:[#allocation19_spill] sm:$0xff] }
 0x73c   :  { %v1956_v5 = vpop.f32.mrf.mxu3 }
 0x73d   :  { %v4145_v8 = vpop.eup %4144  ;;  %v1983_v10 = vmax.f32 %v1956_v5, 1e-12 }
 0x73e   :  { %v2014_v48 = vmul.f32 %v4145_v8, %v1905_v61  ;;  %v1907_v51 = vpop.f32.mrf.mxu2 }
 0x73f   :  { %4146 = vrcp.f32 %v1983_v10 }
 0x740   :  { %v2030_v19 = vadd.f32 %v2014_v48, %v7333_v43 }
 0x742   :  { %2100 = vmatmul.f32.gmra.mxu0 %v2030_v19 }
 0x744   :  { %v1959_v6 = vpop.f32.mrf.mxu3 }
 0x745   :  { %v4147_v2 = vpop.eup %4146  ;;  %v1984_v53 = vmax.f32 %v1959_v6, 1e-12  ;;  %v6013_v6 = vld [vmem:[%s7012_s9 + $0x1] ss:$0 sm:$0xff] }
 0x746   :  { %v2015_v29 = vmul.f32 %v4147_v2, %v1907_v51  ;;  %v1910_v0 = vpop.f32.mrf.mxu2  ;;  %v7340_v51 = vld [vmem:[#allocation18_spill] sm:$0xff] }
 0x747   :  { %4148 = vrcp.f32 %v1984_v53 }
 0x748   :  { %v2031_v23 = vadd.f32 %v2015_v29, %v7334_v45 }
 0x74a   :  { %2103 = vmatmul.f32.gmra.mxu0 %v2031_v23 }
 0x74c   :  { %v1961_v50 = vpop.f32.mrf.mxu3 }
 0x74d   :  { %v4149_v35 = vpop.eup %4148  ;;  %v1985_v60 = vmax.f32 %v1961_v50, 1e-12 }
 0x74e   :  { %v2016_v27 = vmul.f32 %v4149_v35, %v1910_v0  ;;  %v1912_v49 = vpop.f32.mrf.mxu2 }
 0x74f   :  { %4150 = vrcp.f32 %v1985_v60 }
 0x750   :  { %v2032_v62 = vadd.f32 %v2016_v27, %v7335_v55 }
 0x752   :  { %2106 = vmatmul.f32.gmra.mxu0 %v2032_v62 }
 0x754   :  { %v1964_v38 = vpop.f32.mrf.mxu3 }
 0x755   :  { %v4151_v40 = vpop.eup %4150  ;;  %v1986_v1 = vmax.f32 %v1964_v38, 1e-12 }
 0x756   :  { %v2017_v59 = vmul.f32 %v4151_v40, %v1912_v49  ;;  %v1915_v63 = vpop.f32.mrf.mxu2 }
 0x757   :  { %4152 = vrcp.f32 %v1986_v1 }
 0x758   :  { %v2033_v17 = vadd.f32 %v2017_v59, %v7336_v56 }
 0x75a   :  { %2109 = vmatmul.f32.gmra.mxu0 %v2033_v17 }
 0x75c   :  { %v1966_v14 = vpop.f32.mrf.mxu3 }
 0x75d   :  { %v4153_v12 = vpop.eup %4152  ;;  %v1987_v13 = vmax.f32 %v1966_v14, 1e-12 }
 0x75e   :  { %v2018_v24 = vmul.f32 %v4153_v12, %v1915_v63  ;;  %v1917_v4 = vpop.f32.mrf.mxu2 }
 0x75f   :  { %4154 = vrcp.f32 %v1987_v13 }
 0x760   :  { %v2034_v18 = vadd.f32 %v2018_v24, %v7337_v54 }
 0x762   :  { %2112 = vmatmul.f32.gmra.mxu0 %v2034_v18 }
 0x764   :  { %v1969_v33 = vpop.f32.mrf.mxu3 }
 0x765   :  { %v4155_v58 = vpop.eup %4154  ;;  %v1988_v9 = vmax.f32 %v1969_v33, 1e-12 }
 0x766   :  { %v2019_v47 = vmul.f32 %v4155_v58, %v1917_v4  ;;  %v1920_v30 = vpop.f32.mrf.mxu2 }
 0x767   :  { %4156 = vrcp.f32 %v1988_v9 }
 0x768   :  { %v2035_v32 = vadd.f32 %v2019_v47, %v7338_v7 }
 0x76a   :  { %2115 = vmatmul.f32.gmra.mxu0 %v2035_v32 }
 0x76c   :  { %v1971_v52 = vpop.f32.mrf.mxu3 }
 0x76d   :  { %v4157_v36 = vpop.eup %4156  ;;  %v1989_v20 = vmax.f32 %v1971_v52, 1e-12 }
 0x76e   :  { %v2020_v61 = vmul.f32 %v4157_v36, %v1920_v30  ;;  %v1922_v10 = vpop.f32.mrf.mxu2 }
 0x76f   :  { %4158 = vrcp.f32 %v1989_v20 }
 0x770   :  { %v2036_v5 = vadd.f32 %v2020_v61, %v7339_v34 }
 0x772   :  { %2118 = vmatmul.f32.gmra.mxu0 %v2036_v5 }
 0x775   :  { %v4159_v8 = vpop.eup %4158 }
 0x776   :  { %v2021_v48 = vmul.f32 %v4159_v8, %v1922_v10 }
 0x778   :  { %v2037_v19 = vadd.f32 %v2021_v48, %v7340_v51 }
 0x77a   :  { %2121 = vmatmul.f32.gmra.mxu0 %v2037_v19 }
 0x77f   :  { %v2077_v2 = vpop.f32.mrf.mxu0 }
 0x780   :  { %v6016_v53 = vadd.f32 %v6013_v6, %v2077_v2 }
 0x782   :  { %2125 = vadd.xlane.f32.xlu2 %v6016_v53  ;;  %v2173_v29 = vmul.f32 %v6016_v53, %v6016_v53 }
 0x784   :  { %2189 = vadd.xlane.f32.xlu0 %v2173_v29  ;;  %v3841_v29 = vld [vmem:[%s7015_s12 + $0xf8] sm:$0xff] }
 0x785   :  { %2557 = vmatpush.msrb.mxu1 %v3841_v29  ;;  %v3831_v29 = vld [vmem:[%s7015_s12 + $0xa8] sm:$0xff] }
 0x787   :  { %v2080_v0 = vpop.f32.mrf.mxu0 }
 0x788   :  { %v6022_v23 = vadd.f32 %v6013_v6, %v2080_v0 }
 0x78a   :  { %2127 = vadd.xlane.f32.xlu1 %v6022_v23  ;;  %v2174_v50 = vmul.f32 %v6022_v23, %v6022_v23 }
 0x78c   :  { %2191 = vadd.xlane.f32.xlu2 %v2174_v50 }
 0x78f   :  { %v2083_v35 = vpop.f32.mrf.mxu0 }
 0x790   :  { %v6028_v60 = vadd.f32 %v6013_v6, %v2083_v35  ;;  %v3840_v35 = vld [vmem:[%s7015_s12 + $0xf0] sm:$0xff] }
 0x791   :  { %2558 = vmatpush.msrb.mxu1 %v3840_v35 }
 0x792   :  { %2129 = vadd.xlane.f32.xlu0 %v6028_v60  ;;  %v2175_v27 = vmul.f32 %v6028_v60, %v6028_v60 }
 0x794   :  { %2193 = vadd.xlane.f32.xlu1 %v2175_v27 }
 0x797   :  { %v2086_v49 = vpop.f32.mrf.mxu0 }
 0x798   :  { %v6034_v62 = vadd.f32 %v6013_v6, %v2086_v49  ;;  %v3839_v49 = vld [vmem:[%s7015_s12 + $0xe8] sm:$0xff] }
 0x799   :  { %2559 = vmatpush.msrb.mxu1 %v3839_v49  ;;  %v3829_v49 = vld [vmem:[%s7015_s12 + $0x98] sm:$0xff] }
 0x79a   :  { %2131 = vadd.xlane.f32.xlu2 %v6034_v62  ;;  %v2176_v38 = vmul.f32 %v6034_v62, %v6034_v62 }
 0x79c   :  { %2195 = vadd.xlane.f32.xlu0 %v2176_v38  ;;  %v3838_v38 = vld [vmem:[%s7015_s12 + $0xe0] sm:$0xff] }
 0x79d   :  { %2560 = vmatpush.msrb.mxu1 %v3838_v38 }
 0x79f   :  { %v2089_v40 = vpop.f32.mrf.mxu0 }
 0x7a0   :  { %v6040_v1 = vadd.f32 %v6013_v6, %v2089_v40  ;;  %v3837_v40 = vld [vmem:[%s7015_s12 + $0xd8] sm:$0xff] }
 0x7a1   :  { %2561 = vmatpush.msrb.mxu1 %v3837_v40 }
 0x7a2   :  { %2133 = vadd.xlane.f32.xlu1 %v6040_v1  ;;  %v2177_v59 = vmul.f32 %v6040_v1, %v6040_v1 }
 0x7a4   :  { %2197 = vadd.xlane.f32.xlu2 %v2177_v59 }
 0x7a7   :  { %v2092_v63 = vpop.f32.mrf.mxu0 }
 0x7a8   :  { %v6046_v17 = vadd.f32 %v6013_v6, %v2092_v63 }
 0x7aa   :  { %2135 = vadd.xlane.f32.xlu0 %v6046_v17  ;;  %v2178_v14 = vmul.f32 %v6046_v17, %v6046_v17 }
 0x7ac   :  { %2199 = vadd.xlane.f32.xlu1 %v2178_v14  ;;  %v3836_v14 = vld [vmem:[%s7015_s12 + $0xd0] sm:$0xff] }
 0x7ad   :  { %2562 = vmatpush.msrb.mxu1 %v3836_v14  ;;  %v3828_v14 = vld [vmem:[%s7015_s12 + $0x90] sm:$0xff] }
 0x7af   :  { %v2095_v12 = vpop.f32.mrf.mxu0 }
 0x7b0   :  { %v6052_v13 = vadd.f32 %v6013_v6, %v2095_v12 }
 0x7b2   :  { %2137 = vadd.xlane.f32.xlu2 %v6052_v13  ;;  %v2179_v24 = vmul.f32 %v6052_v13, %v6052_v13 }
 0x7b4   :  { %2201 = vadd.xlane.f32.xlu0 %v2179_v24  ;;  %v3835_v24 = vld [vmem:[%s7015_s12 + $0xc8] sm:$0xff] }
 0x7b5   :  { %2563 = vmatpush.msrb.mxu1 %v3835_v24  ;;  %v3827_v24 = vld [vmem:[%s7015_s12 + $0x88] sm:$0xff] }
 0x7b7   :  { %v2098_v18 = vpop.f32.mrf.mxu0 }
 0x7b8   :  { %v6058_v4 = vadd.f32 %v6013_v6, %v2098_v18  ;;  %v3834_v18 = vld [vmem:[%s7015_s12 + $0xc0] sm:$0xff] }
 0x7b9   :  { %2564 = vmatpush.msrb.mxu1 %v3834_v18 }
 0x7ba   :  { %2139 = vadd.xlane.f32.xlu1 %v6058_v4  ;;  %v2180_v33 = vmul.f32 %v6058_v4, %v6058_v4 }
 0x7bc   :  { %2203 = vadd.xlane.f32.xlu2 %v2180_v33 }
 0x7bf   :  { %v2101_v58 = vpop.f32.mrf.mxu0 }
 0x7c0   :  { %v6064_v9 = vadd.f32 %v6013_v6, %v2101_v58 }
 0x7c2   :  { %2141 = vadd.xlane.f32.xlu0 %v6064_v9  ;;  %v2181_v47 = vmul.f32 %v6064_v9, %v6064_v9 }
 0x7c4   :  { %2205 = vadd.xlane.f32.xlu1 %v2181_v47  ;;  %v3833_v47 = vld [vmem:[%s7015_s12 + $0xb8] sm:$0xff] }
 0x7c5   :  { %2565 = vmatpush.msrb.mxu1 %v3833_v47  ;;  %v3826_v47 = vld [vmem:[%s7015_s12 + $0x80] sm:$0xff] }
 0x7c7   :  { %v2104_v32 = vpop.f32.mrf.mxu0 }
 0x7c8   :  { %v6070_v30 = vadd.f32 %v6013_v6, %v2104_v32 }
 0x7ca   :  { %2143 = vadd.xlane.f32.xlu2 %v6070_v30  ;;  %v2182_v52 = vmul.f32 %v6070_v30, %v6070_v30 }
 0x7cc   :  { %2207 = vadd.xlane.f32.xlu0 %v2182_v52 }
 0x7cf   :  { %v2107_v36 = vpop.f32.mrf.mxu0 }
 0x7d0   :  { %v6076_v20 = vadd.f32 %v6013_v6, %v2107_v36 }
 0x7d2   :  { %2145 = vadd.xlane.f32.xlu1 %v6076_v20  ;;  %v2183_v61 = vmul.f32 %v6076_v20, %v6076_v20 }
 0x7d4   :  { %2209 = vadd.xlane.f32.xlu2 %v2183_v61 }
 0x7d7   :  { %v2110_v5 = vpop.f32.mrf.mxu0 }
 0x7d8   :  { %v6082_v8 = vadd.f32 %v6013_v6, %v2110_v5 }
 0x7da   :  { %2147 = vadd.xlane.f32.xlu0 %v6082_v8  ;;  %v2184_v10 = vmul.f32 %v6082_v8, %v6082_v8 }
 0x7dc   :  { %2211 = vadd.xlane.f32.xlu1 %v2184_v10  ;;  %v3832_v10 = vld [vmem:[%s7015_s12 + $0xb0] sm:$0xff] }
 0x7dd   :  { %2566 = vmatpush.msrb.mxu1 %v3832_v10 }
 0x7df   :  { %v2113_v48 = vpop.f32.mrf.mxu0  ;;  %2567 = vmatpush.msrb.mxu1 %v3831_v29 }
 0x7e0   :  { %v6088_v19 = vadd.f32 %v6013_v6, %v2113_v48 }
 0x7e2   :  { %2149 = vadd.xlane.f32.xlu2 %v6088_v19  ;;  %v2185_v2 = vmul.f32 %v6088_v19, %v6088_v19 }
 0x7e4   :  { %2213 = vadd.xlane.f32.xlu0 %v2185_v2 }
 0x7e7   :  { %v2116_v0 = vpop.f32.mrf.mxu0 }
 0x7e8   :  { %v6097_v50 = vadd.f32 %v6013_v6, %v2116_v0 }
 0x7ea   :  { %2151 = vadd.xlane.f32.xlu1 %v6097_v50  ;;  %v2186_v27 = vmul.f32 %v6097_v50, %v6097_v50 }
 0x7ec   :  { %2215 = vadd.xlane.f32.xlu2 %v2186_v27 }
 0x7ef   :  { %v2119_v59 = vpop.f32.mrf.mxu0 }
 0x7f0   :  { %v6115_v63 = vadd.f32 %v6013_v6, %v2119_v59 }
 0x7f2   :  { %2153 = vadd.xlane.f32.xlu0 %v6115_v63  ;;  %v2187_v12 = vmul.f32 %v6115_v63, %v6115_v63 }
 0x7f4   :  { %2217 = vadd.xlane.f32.xlu1 %v2187_v12 }
 0x7f5   :  { %v2126_v33 = vpop.xlane.xlu2 %2125 }
 0x7f6   :  { %v6129_v58 = vmul.f32 0.015625, %v2126_v33 }
 0x7f7   :  { %v2190_v32 = vpop.xlane.xlu0 %2189  ;;  %v2122_v52 = vpop.f32.mrf.mxu0 }
 0x7f8   :  { %v2237_v36 = vmul.f32 %v6129_v58, %v6129_v58  ;;  %v2221_v61 = vmul.f32 0.015625, %v2190_v32  ;;  %v6137_v5 = vadd.f32 %v6013_v6, %v2122_v52  ;;  %v3830_v6 = vld [vmem:[%s7015_s12 + $0xa0] sm:$0xff] }
 0x7f9   :  { %2568 = vmatpush.msrb.mxu1 %v3830_v6 }
 0x7fa   :  { %v2253_v48 = vsub.f32 %v2221_v61, %v2237_v36  ;;  %2155 = vadd.xlane.f32.xlu2 %v6137_v5  ;;  %v2188_v2 = vmul.f32 %v6137_v5, %v6137_v5 }
 0x7fb   :  { %2569 = vmatpush.msrb.mxu1 %v3829_v49 }
 0x7fc   :  { %v2285_v0 = vadd.f32 1e-05, %v2253_v48  ;;  %2219 = vadd.xlane.f32.xlu0 %v2188_v2 }
 0x7fd   :  { %v2128_v35 = vpop.xlane.xlu1 %2127  ;;  %2570 = vmatpush.msrb.mxu1 %v3828_v14 }
 0x7fe   :  { %4160 = vrsqrt.f32 %v2285_v0  ;;  %v6151_v27 = vmul.f32 0.015625, %v2128_v35  ;;  %vm2307_vm7 = vweird.f32 %v2285_v0 }
 0x7ff   :  { %v2192_v38 = vpop.xlane.xlu2 %2191  ;;  %2571 = vmatpush.msrb.mxu1 %v3827_v24  ;;  %v6176_v24 = vld [vmem:[%s7013_s10 + $0x1] ss:$0 sm:$0xff] }
 0x800   :  { %v2238_v40 = vmul.f32 %v6151_v27, %v6151_v27  ;;  %v2222_v59 = vmul.f32 0.015625, %v2192_v38 }
 0x801   :  { %2572 = vmatpush.msrb.mxu1 %v3826_v47 }
 0x802   :  { %v2254_v12 = vsub.f32 %v2222_v59, %v2238_v40 }
 0x803   :  { %3046 = vmatpush.msra.mxu1 %v3907_v57 }
 0x804   :  { %v4161_v18 = vpop.eup %4160  ;;  %v2286_v33 = vadd.f32 1e-05, %v2254_v12  ;;  %v2269_v12 = vsub.f32 %v6016_v53, %v6129_v58  ;;  %v6185_v53 = vld [vmem:[%s7014_s11 + $0x1] ss:$0 sm:$0xff] }
 0x805   :  { %v2302_v32 = vmul.f32 %v4161_v18, %v2285_v0  ;;  %v2130_v52 = vpop.xlane.xlu0 %2129  ;;  %vm2308_vm9 = vweird.f32 %v4161_v18  ;;  %3047 = vmatpush.msra.mxu1 %v3906_v37 }
 0x806   :  { %4162 = vrsqrt.f32 %v2286_v33  ;;  %v6167_v36 = vmul.f32 0.015625, %v2130_v52  ;;  %vm2309_vm3 = vmor %vm2307_vm7, %vm2308_vm9 }
 0x807   :  { %v2303_v61 = vmul.f32 %v4161_v18, %v2302_v32  ;;  %v2194_v10 = vpop.xlane.xlu1 %2193 }
 0x808   :  { %v2239_v48 = vmul.f32 %v6167_v36, %v6167_v36  ;;  %v2223_v2 = vmul.f32 0.015625, %v2194_v10 }
 0x809   :  { %v2304_v29 = vmul.f32 0.5, %v2303_v61 }
 0x80a   :  { %v2255_v6 = vsub.f32 %v2223_v2, %v2239_v48 }
 0x80b   :  { %v2305_v35 = vsub.f32 1.5, %v2304_v29 }
 0x80c   :  { %v4163_v49 = vpop.eup %4162  ;;  %v2287_v38 = vadd.f32 1e-05, %v2255_v6 }
 0x80d   :  { %v2306_v40 = vmul.f32 %v4161_v18, %v2305_v35  ;;  %v2312_v59 = vmul.f32 %v4163_v49, %v2286_v33  ;;  %v2132_v14 = vpop.xlane.xlu2 %2131  ;;  %vm2318_vm7 = vweird.f32 %v4163_v49 }
 0x80e   :  { %4164 = vrsqrt.f32 %v2287_v38  ;;  %v6178_v47 = vmul.f32 0.015625, %v2132_v14 }
 0x80f   :  { %v2310_v32 = vsel %vm2309_vm3, %v4161_v18, %v2306_v40  ;;  %v2313_v52 = vmul.f32 %v4163_v49, %v2312_v59  ;;  %v2196_v61 = vpop.xlane.xlu0 %2195  ;;  %vm2317_vm3 = vweird.f32 %v2286_v33 }
 0x810   :  { %v2461_v10 = vmul.f32 %v2310_v32, %v2269_v12  ;;  %v2240_v0 = vmul.f32 %v6178_v47, %v6178_v47  ;;  %v2224_v48 = vmul.f32 0.015625, %v2196_v61  ;;  %v2270_v32 = vsub.f32 %v6022_v23, %v6151_v27  ;;  %vm2319_vm9 = vmor %vm2317_vm3, %vm2318_vm7 }
 0x811   :  { %v2314_v58 = vmul.f32 0.5, %v2313_v52  ;;  %vm2327_vm7 = vweird.f32 %v2287_v38 }
 0x812   :  { %v2482_v2 = vmul.f32 %v6176_v24, %v2461_v10  ;;  %v2256_v29 = vsub.f32 %v2224_v48, %v2240_v0 }
 0x813   :  { %v2315_v6 = vsub.f32 1.5, %v2314_v58 }
 0x814   :  { %v4165_v35 = vpop.eup %4164  ;;  %v2288_v18 = vadd.f32 1e-05, %v2256_v29  ;;  %v2503_v40 = vadd.f32 %v6185_v53, %v2482_v2 }
 0x815   :  { %v2316_v59 = vmul.f32 %v4163_v49, %v2315_v6  ;;  %v2322_v14 = vmul.f32 %v4165_v35, %v2287_v38  ;;  %v2134_v12 = vpop.xlane.xlu1 %2133  ;;  %vm2328_vm0 = vweird.f32 %v4165_v35 }
 0x816   :  { %4166 = vrsqrt.f32 %v2288_v18  ;;  %v6191_v61 = vmul.f32 0.015625, %v2134_v12  ;;  %v2519_v52 = vmax.f32 %v2503_v40, 0.0  ;;  %vm2329_vm3 = vmor %vm2327_vm7, %vm2328_vm0  ;;  %vm2337_vm0 = vweird.f32 %v2288_v18 }
 0x817   :  { %v2323_v10 = vmul.f32 %v4165_v35, %v2322_v14  ;;  %v2198_v0 = vpop.xlane.xlu2 %2197  ;;  %v2320_v48 = vsel %vm2319_vm9, %v4163_v49, %v2316_v59  ;;  %v2271_v59 = vsub.f32 %v6028_v60, %v6167_v36 }
 0x818   :  { %v2241_v58 = vmul.f32 %v6191_v61, %v6191_v61  ;;  %v2225_v29 = vmul.f32 0.015625, %v2198_v0  ;;  %2573 = vmatmul.f32.vlgmr.msrb.gmra.mxu1 %v2519_v52  ;;  %v2462_v2 = vmul.f32 %v2320_v48, %v2270_v32 }
 0x819   :  { %v2324_v33 = vmul.f32 0.5, %v2323_v10 }
 0x81a   :  { %v2257_v6 = vsub.f32 %v2225_v29, %v2241_v58  ;;  %v2483_v16 = vmul.f32 %v6176_v24, %v2462_v2 }
 0x81b   :  { %v2325_v31 = vsub.f32 1.5, %v2324_v33 }
 0x81c   :  { %v4167_v23 = vpop.eup %4166  ;;  %v2289_v27 = vadd.f32 1e-05, %v2257_v6  ;;  %v2504_v12 = vadd.f32 %v6185_v53, %v2483_v16 }
 0x81d   :  { %v2326_v40 = vmul.f32 %v4165_v35, %v2325_v31  ;;  %v2332_v14 = vmul.f32 %v4167_v23, %v2288_v18  ;;  %v2136_v49 = vpop.xlane.xlu0 %2135  ;;  %vm2338_vm9 = vweird.f32 %v4167_v23 }
 0x81e   :  { %4168 = vrsqrt.f32 %v2289_v27  ;;  %v6199_v32 = vmul.f32 0.015625, %v2136_v49  ;;  %v2520_v52 = vmax.f32 %v2504_v12, 0.0  ;;  %vm2339_vm7 = vmor %vm2337_vm0, %vm2338_vm9  ;;  %vm2347_vm9 = vweird.f32 %v2289_v27 }
 0x81f   :  { %v2333_v10 = vmul.f32 %v4167_v23, %v2332_v14  ;;  %v2200_v0 = vpop.xlane.xlu1 %2199  ;;  %v2330_v48 = vsel %vm2329_vm3, %v4165_v35, %v2326_v40  ;;  %v2272_v40 = vsub.f32 %v6034_v62, %v6178_v47 }
 0x820   :  { %v2242_v58 = vmul.f32 %v6199_v32, %v6199_v32  ;;  %v2226_v29 = vmul.f32 0.015625, %v2200_v0  ;;  %2576 = vmatmul.f32.gmra.mxu1 %v2520_v52  ;;  %v2463_v31 = vmul.f32 %v2330_v48, %v2271_v59 }
 0x821   :  { %v2334_v16 = vmul.f32 0.5, %v2333_v10 }
 0x822   :  { %v2258_v38 = vsub.f32 %v2226_v29, %v2242_v58  ;;  %v2484_v2 = vmul.f32 %v6176_v24, %v2463_v31 }
 0x823   :  { %v2335_v33 = vsub.f32 1.5, %v2334_v16 }
 0x824   :  { %v4169_v60 = vpop.eup %4168  ;;  %v2290_v36 = vadd.f32 1e-05, %v2258_v38  ;;  %v2505_v6 = vadd.f32 %v6185_v53, %v2484_v2 }
 0x825   :  { %v2336_v12 = vmul.f32 %v4167_v23, %v2335_v33  ;;  %v2342_v14 = vmul.f32 %v4169_v60, %v2289_v27  ;;  %v2138_v35 = vpop.xlane.xlu2 %2137  ;;  %vm2348_vm3 = vweird.f32 %v4169_v60 }
 0x826   :  { %4170 = vrsqrt.f32 %v2290_v36  ;;  %v6207_v49 = vmul.f32 0.015625, %v2138_v35  ;;  %v2521_v59 = vmax.f32 %v2505_v6, 0.0  ;;  %vm2349_vm0 = vmor %vm2347_vm9, %vm2348_vm3  ;;  %vm2357_vm3 = vweird.f32 %v2290_v36 }
 0x827   :  { %v2343_v52 = vmul.f32 %v4169_v60, %v2342_v14  ;;  %v2202_v10 = vpop.xlane.xlu0 %2201  ;;  %v2340_v0 = vsel %vm2339_vm7, %v4167_v23, %v2336_v12  ;;  %v2273_v12 = vsub.f32 %v6040_v1, %v6191_v61 }
 0x828   :  { %v2243_v48 = vmul.f32 %v6207_v49, %v6207_v49  ;;  %v2227_v58 = vmul.f32 0.015625, %v2202_v10  ;;  %2579 = vmatmul.f32.gmra.mxu1 %v2521_v59  ;;  %v2464_v29 = vmul.f32 %v2340_v0, %v2272_v40 }
 0x829   :  { %v2344_v18 = vmul.f32 0.5, %v2343_v52 }
 0x82a   :  { %v2259_v31 = vsub.f32 %v2227_v58, %v2243_v48  ;;  %v2485_v16 = vmul.f32 %v6176_v24, %v2464_v29 }
 0x82b   :  { %v2345_v38 = vsub.f32 1.5, %v2344_v18 }
 0x82c   :  { %v4171_v62 = vpop.eup %4170  ;;  %v2291_v47 = vadd.f32 1e-05, %v2259_v31  ;;  %v2506_v2 = vadd.f32 %v6185_v53, %v2485_v16 }
 0x82d   :  { %v2346_v33 = vmul.f32 %v4169_v60, %v2345_v38  ;;  %v2352_v6 = vmul.f32 %v4171_v62, %v2290_v36  ;;  %v2140_v23 = vpop.xlane.xlu1 %2139  ;;  %vm2358_vm7 = vweird.f32 %v4171_v62 }
 0x82e   :  { %4172 = vrsqrt.f32 %v2291_v47  ;;  %v6215_v14 = vmul.f32 0.015625, %v2140_v23  ;;  %v2522_v35 = vmax.f32 %v2506_v2, 0.0  ;;  %v2274_v2 = vsub.f32 %v6046_v17, %v6199_v32  ;;  %vm2359_vm9 = vmor %vm2357_vm3, %vm2358_vm7 }
 0x82f   :  { %v2353_v40 = vmul.f32 %v4171_v62, %v2352_v6  ;;  %v2204_v59 = vpop.xlane.xlu2 %2203  ;;  %v2350_v52 = vsel %vm2349_vm0, %v4169_v60, %v2346_v33  ;;  %vm2367_vm7 = vweird.f32 %v2291_v47 }
 0x830   :  { %v2244_v10 = vmul.f32 %v6215_v14, %v6215_v14  ;;  %v2228_v0 = vmul.f32 0.015625, %v2204_v59  ;;  %2582 = vmatmul.f32.gmra.mxu1 %v2522_v35  ;;  %v2465_v48 = vmul.f32 %v2350_v52, %v2273_v12 }
 0x831   :  { %v2354_v27 = vmul.f32 0.5, %v2353_v40 }
 0x832   :  { %v2260_v58 = vsub.f32 %v2228_v0, %v2244_v10  ;;  %v2486_v29 = vmul.f32 %v6176_v24, %v2465_v48 }
 0x833   :  { %v2355_v18 = vsub.f32 1.5, %v2354_v27 }
 0x834   :  { %v4173_v1 = vpop.eup %4172  ;;  %v2292_v61 = vadd.f32 1e-05, %v2260_v58  ;;  %v2507_v31 = vadd.f32 %v6185_v53, %v2486_v29 }
 0x835   :  { %v2356_v16 = vmul.f32 %v4171_v62, %v2355_v18  ;;  %v2362_v38 = vmul.f32 %v4173_v1, %v2291_v47  ;;  %v2142_v60 = vpop.xlane.xlu0 %2141  ;;  %vm2368_vm0 = vweird.f32 %v4173_v1  ;;  %v2275_v18 = vsub.f32 %v6052_v13, %v6207_v49 }
 0x836   :  { %4174 = vrsqrt.f32 %v2292_v61  ;;  %v6223_v33 = vmul.f32 0.015625, %v2142_v60  ;;  %v2523_v6 = vmax.f32 %v2507_v31, 0.0  ;;  %vm2369_vm3 = vmor %vm2367_vm7, %vm2368_vm0  ;;  %vm2377_vm0 = vweird.f32 %v2292_v61 }
 0x837   :  { %v2363_v23 = vmul.f32 %v4173_v1, %v2362_v38  ;;  %v2206_v12 = vpop.xlane.xlu1 %2205  ;;  %v2360_v35 = vsel %vm2359_vm9, %v4171_v62, %v2356_v16 }
 0x838   :  { %v2245_v40 = vmul.f32 %v6223_v33, %v6223_v33  ;;  %v2229_v59 = vmul.f32 0.015625, %v2206_v12  ;;  %2585 = vmatmul.f32.gmra.mxu1 %v2523_v6  ;;  %v2466_v52 = vmul.f32 %v2360_v35, %v2274_v2 }
 0x839   :  { %v2364_v36 = vmul.f32 0.5, %v2363_v23 }
 0x83a   :  { %v2261_v10 = vsub.f32 %v2229_v59, %v2245_v40  ;;  %v2487_v0 = vmul.f32 %v6176_v24, %v2466_v52 }
 0x83b   :  { %v2365_v48 = vsub.f32 1.5, %v2364_v36 }
 0x83c   :  { %v4175_v17 = vpop.eup %4174  ;;  %v2293_v32 = vadd.f32 1e-05, %v2261_v10  ;;  %v2508_v27 = vadd.f32 %v6185_v53, %v2487_v0  ;;  %v2276_v0 = vsub.f32 %v6058_v4, %v6215_v14 }
 0x83d   :  { %v2366_v58 = vmul.f32 %v4173_v1, %v2365_v48  ;;  %v2372_v29 = vmul.f32 %v4175_v17, %v2292_v61  ;;  %v2144_v62 = vpop.xlane.xlu2 %2143  ;;  %vm2378_vm9 = vweird.f32 %v4175_v17 }
 0x83e   :  { %4176 = vrsqrt.f32 %v2293_v32  ;;  %v6231_v31 = vmul.f32 0.015625, %v2144_v62  ;;  %v2524_v16 = vmax.f32 %v2508_v27, 0.0  ;;  %vm2379_vm7 = vmor %vm2377_vm0, %vm2378_vm9  ;;  %vm2387_vm9 = vweird.f32 %v2293_v32 }
 0x83f   :  { %v2373_v38 = vmul.f32 %v4175_v17, %v2372_v29  ;;  %v2208_v60 = vpop.xlane.xlu0 %2207  ;;  %v2370_v2 = vsel %vm2369_vm3, %v4173_v1, %v2366_v58 }
 0x840   :  { %v2246_v6 = vmul.f32 %v6231_v31, %v6231_v31  ;;  %v2230_v23 = vmul.f32 0.015625, %v2208_v60  ;;  %2588 = vmatmul.f32.gmra.mxu1 %v2524_v16  ;;  %v2467_v12 = vmul.f32 %v2370_v2, %v2275_v18 }
 0x841   :  { %v2374_v47 = vmul.f32 0.5, %v2373_v38 }
 0x842   :  { %v2262_v35 = vsub.f32 %v2230_v23, %v2246_v6  ;;  %v2488_v40 = vmul.f32 %v6176_v24, %v2467_v12 }
 0x843   :  { %v2375_v59 = vsub.f32 1.5, %v2374_v47 }
 0x844   :  { %v4177_v13 = vpop.eup %4176  ;;  %v2294_v49 = vadd.f32 1e-05, %v2262_v35  ;;  %v2509_v52 = vadd.f32 %v6185_v53, %v2488_v40  ;;  %v2277_v35 = vsub.f32 %v6064_v9, %v6223_v33 }
 0x845   :  { %v2376_v36 = vmul.f32 %v4175_v17, %v2375_v59  ;;  %v2382_v10 = vmul.f32 %v4177_v13, %v2293_v32  ;;  %v2146_v1 = vpop.xlane.xlu1 %2145  ;;  %vm2388_vm3 = vweird.f32 %v4177_v13 }
 0x846   :  { %4178 = vrsqrt.f32 %v2294_v49  ;;  %v6239_v48 = vmul.f32 0.015625, %v2146_v1  ;;  %v2525_v27 = vmax.f32 %v2509_v52, 0.0  ;;  %vm2389_vm0 = vmor %vm2387_vm9, %vm2388_vm3  ;;  %vm2397_vm3 = vweird.f32 %v2294_v49 }
 0x847   :  { %v2383_v58 = vmul.f32 %v4177_v13, %v2382_v10  ;;  %v2210_v29 = vpop.xlane.xlu2 %2209  ;;  %v2380_v62 = vsel %vm2379_vm7, %v4175_v17, %v2376_v36 }
 0x848   :  { %v2247_v18 = vmul.f32 %v6239_v48, %v6239_v48  ;;  %v2231_v16 = vmul.f32 0.015625, %v2210_v29  ;;  %2591 = vmatmul.f32.gmra.mxu1 %v2525_v27  ;;  %v2468_v38 = vmul.f32 %v2380_v62, %v2276_v0 }
 0x849   :  { %v2384_v61 = vmul.f32 0.5, %v2383_v58 }
 0x84a   :  { %v2263_v60 = vsub.f32 %v2231_v16, %v2247_v18  ;;  %v2489_v2 = vmul.f32 %v6176_v24, %v2468_v38 }
 0x84b   :  { %v2385_v6 = vsub.f32 1.5, %v2384_v61  ;;  %v2278_v61 = vsub.f32 %v6070_v30, %v6231_v31 }
 0x84c   :  { %v4179_v4 = vpop.eup %4178  ;;  %v2295_v14 = vadd.f32 1e-05, %v2263_v60  ;;  %v2510_v23 = vadd.f32 %v6185_v53, %v2489_v2 }
 0x84d   :  { %v2386_v12 = vmul.f32 %v4177_v13, %v2385_v6  ;;  %v2392_v47 = vmul.f32 %v4179_v4, %v2294_v49  ;;  %v2148_v17 = vpop.xlane.xlu0 %2147  ;;  %vm2398_vm7 = vweird.f32 %v4179_v4 }
 0x84e   :  { %4180 = vrsqrt.f32 %v2295_v14  ;;  %v6247_v40 = vmul.f32 0.015625, %v2148_v17  ;;  %v2526_v59 = vmax.f32 %v2510_v23, 0.0  ;;  %vm2399_vm9 = vmor %vm2397_vm3, %vm2398_vm7  ;;  %vm2407_vm7 = vweird.f32 %v2295_v14 }
 0x84f   :  { %v2393_v52 = vmul.f32 %v4179_v4, %v2392_v47  ;;  %v2212_v36 = vpop.xlane.xlu1 %2211  ;;  %v2390_v10 = vsel %vm2389_vm0, %v4177_v13, %v2386_v12 }
 0x850   :  { %v2248_v1 = vmul.f32 %v6247_v40, %v6247_v40  ;;  %v2232_v0 = vmul.f32 0.015625, %v2212_v36  ;;  %2594 = vmatmul.f32.gmra.mxu1 %v2526_v59  ;;  %v2469_v27 = vmul.f32 %v2390_v10, %v2277_v35 }
 0x851   :  { %v2394_v32 = vmul.f32 0.5, %v2393_v52 }
 0x852   :  { %v2264_v58 = vsub.f32 %v2232_v0, %v2248_v1  ;;  %v2490_v29 = vmul.f32 %v6176_v24, %v2469_v27  ;;  %v2279_v27 = vsub.f32 %v6076_v20, %v6239_v48 }
 0x853   :  { %v2395_v62 = vsub.f32 1.5, %v2394_v32 }
 0x854   :  { %v4181_v9 = vpop.eup %4180  ;;  %v2296_v33 = vadd.f32 1e-05, %v2264_v58  ;;  %v2511_v18 = vadd.f32 %v6185_v53, %v2490_v29 }
 0x855   :  { %v2396_v16 = vmul.f32 %v4179_v4, %v2395_v62  ;;  %v2402_v38 = vmul.f32 %v4181_v9, %v2295_v14  ;;  %v2150_v13 = vpop.xlane.xlu2 %2149  ;;  %vm2408_vm0 = vweird.f32 %v4181_v9 }
 0x856   :  { %4182 = vrsqrt.f32 %v2296_v33  ;;  %v6255_v60 = vmul.f32 0.015625, %v2150_v13  ;;  %v2527_v2 = vmax.f32 %v2511_v18, 0.0  ;;  %vm2409_vm3 = vmor %vm2407_vm7, %vm2408_vm0  ;;  %vm2417_vm0 = vweird.f32 %v2296_v33 }
 0x857   :  { %v2403_v6 = vmul.f32 %v4181_v9, %v2402_v38  ;;  %v2214_v23 = vpop.xlane.xlu0 %2213  ;;  %v2400_v12 = vsel %vm2399_vm9, %v4179_v4, %v2396_v16 }
 0x858   :  { %v2249_v47 = vmul.f32 %v6255_v60, %v6255_v60  ;;  %v2233_v17 = vmul.f32 0.015625, %v2214_v23  ;;  %2597 = vmatmul.f32.gmra.mxu1 %v2527_v2  ;;  %v2470_v35 = vmul.f32 %v2400_v12, %v2278_v61 }
 0x859   :  { %v2404_v49 = vmul.f32 0.5, %v2403_v6 }
 0x85a   :  { %v2265_v59 = vsub.f32 %v2233_v17, %v2249_v47  ;;  %v2491_v52 = vmul.f32 %v6176_v24, %v2470_v35  ;;  %v2280_v17 = vsub.f32 %v6082_v8, %v6247_v40 }
 0x85b   :  { %v2405_v36 = vsub.f32 1.5, %v2404_v49 }
 0x85c   :  { %v4183_v30 = vpop.eup %4182  ;;  %v2297_v31 = vadd.f32 1e-05, %v2265_v59  ;;  %v2512_v10 = vadd.f32 %v6185_v53, %v2491_v52 }
 0x85d   :  { %v2406_v1 = vmul.f32 %v4181_v9, %v2405_v36  ;;  %v2412_v0 = vmul.f32 %v4183_v30, %v2296_v33  ;;  %v2152_v4 = vpop.xlane.xlu1 %2151  ;;  %vm2418_vm9 = vweird.f32 %v4183_v30 }
 0x85e   :  { %4184 = vrsqrt.f32 %v2297_v31  ;;  %v6263_v32 = vmul.f32 0.015625, %v2152_v4  ;;  %v2528_v58 = vmax.f32 %v2512_v10, 0.0  ;;  %vm2419_vm7 = vmor %vm2417_vm0, %vm2418_vm9  ;;  %vm2427_vm9 = vweird.f32 %v2297_v31 }
 0x85f   :  { %v2413_v29 = vmul.f32 %v4183_v30, %v2412_v0  ;;  %v2216_v62 = vpop.xlane.xlu2 %2215  ;;  %v2410_v18 = vsel %vm2409_vm3, %v4181_v9, %v2406_v1 }
 0x860   :  { %v2250_v16 = vmul.f32 %v6263_v32, %v6263_v32  ;;  %v2234_v38 = vmul.f32 0.015625, %v2216_v62  ;;  %2600 = vmatmul.f32.gmra.mxu1 %v2528_v58  ;;  %v2471_v13 = vmul.f32 %v2410_v18, %v2279_v27 }
 0x861   :  { %v2414_v14 = vmul.f32 0.5, %v2413_v29 }
 0x862   :  { %v2266_v61 = vsub.f32 %v2234_v38, %v2250_v16  ;;  %v2492_v2 = vmul.f32 %v6176_v24, %v2471_v13  ;;  %v2281_v16 = vsub.f32 %v6088_v19, %v6255_v60 }
 0x863   :  { %v2415_v6 = vsub.f32 1.5, %v2414_v14 }
 0x864   :  { %v4185_v20 = vpop.eup %4184  ;;  %v2298_v48 = vadd.f32 1e-05, %v2266_v61  ;;  %v2513_v23 = vadd.f32 %v6185_v53, %v2492_v2 }
 0x865   :  { %v2416_v12 = vmul.f32 %v4183_v30, %v2415_v6  ;;  %v2422_v47 = vmul.f32 %v4185_v20, %v2297_v31  ;;  %v2154_v9 = vpop.xlane.xlu0 %2153  ;;  %vm2428_vm3 = vweird.f32 %v4185_v20 }
 0x866   :  { %4186 = vrsqrt.f32 %v2298_v48  ;;  %v6271_v35 = vmul.f32 0.015625, %v2154_v9  ;;  %v2529_v49 = vmax.f32 %v2513_v23, 0.0  ;;  %vm2429_vm0 = vmor %vm2427_vm9, %vm2428_vm3  ;;  %vm2437_vm3 = vweird.f32 %v2298_v48 }
 0x867   :  { %v2423_v59 = vmul.f32 %v4185_v20, %v2422_v47  ;;  %v2218_v52 = vpop.xlane.xlu1 %2217  ;;  %v2420_v36 = vsel %vm2419_vm7, %v4183_v30, %v2416_v12 }
 0x868   :  { %v2251_v10 = vmul.f32 %v6271_v35, %v6271_v35  ;;  %v2235_v1 = vmul.f32 0.015625, %v2218_v52  ;;  %2603 = vmatmul.f32.gmra.mxu1 %v2529_v49  ;;  %v2472_v0 = vmul.f32 %v2420_v36, %v2280_v17 }
 0x869   :  { %v2424_v33 = vmul.f32 0.5, %v2423_v59 }
 0x86a   :  { %v2267_v4 = vsub.f32 %v2235_v1, %v2251_v10  ;;  %v2493_v27 = vmul.f32 %v6176_v24, %v2472_v0 }
 0x86b   :  { %v2425_v58 = vsub.f32 1.5, %v2424_v33 }
 0x86c   :  { %v4187_v8 = vpop.eup %4186  ;;  %v2299_v40 = vadd.f32 1e-05, %v2267_v4  ;;  %v2514_v29 = vadd.f32 %v6185_v53, %v2493_v27 }
 0x86d   :  { %v2426_v62 = vmul.f32 %v4185_v20, %v2425_v58  ;;  %v2432_v18 = vmul.f32 %v4187_v8, %v2298_v48  ;;  %v2156_v30 = vpop.xlane.xlu2 %2155  ;;  %vm2438_vm7 = vweird.f32 %v4187_v8 }
 0x86e   :  { %4188 = vrsqrt.f32 %v2299_v40  ;;  %v2172_v38 = vmul.f32 0.015625, %v2156_v30  ;;  %v2530_v13 = vmax.f32 %v2514_v29, 0.0  ;;  %vm2439_vm9 = vmor %vm2437_vm3, %vm2438_vm7  ;;  %vm2447_vm13 = vweird.f32 %v2299_v40 }
 0x86f   :  { %v2433_v14 = vmul.f32 %v4187_v8, %v2432_v18  ;;  %v2220_v61 = vpop.xlane.xlu0 %2219  ;;  %v2430_v2 = vsel %vm2429_vm0, %v4185_v20, %v2426_v62  ;;  %v2282_v20 = vsub.f32 %v6097_v50, %v6263_v32  ;;  %v2283_v50 = vsub.f32 %v6115_v63, %v6271_v35 }
 0x870   :  { %v2252_v6 = vmul.f32 %v2172_v38, %v2172_v38  ;;  %v2236_v23 = vmul.f32 0.015625, %v2220_v61  ;;  %2606 = vmatmul.f32.gmra.mxu1 %v2530_v13  ;;  %v2473_v12 = vmul.f32 %v2430_v2, %v2281_v16 }
 0x871   :  { %v2434_v47 = vmul.f32 0.5, %v2433_v14 }
 0x872   :  { %v2268_v9 = vsub.f32 %v2236_v23, %v2252_v6  ;;  %v2494_v31 = vmul.f32 %v6176_v24, %v2473_v12 }
 0x873   :  { %v2435_v17 = vsub.f32 1.5, %v2434_v47 }
 0x874   :  { %v4189_v49 = vpop.eup %4188  ;;  %v2300_v59 = vadd.f32 1e-05, %v2268_v9  ;;  %v2515_v19 = vadd.f32 %v6185_v53, %v2494_v31 }
 0x875   :  { %v2436_v60 = vmul.f32 %v4187_v8, %v2435_v17  ;;  %v2442_v52 = vmul.f32 %v4189_v49, %v2299_v40  ;;  %vm2448_vm0 = vweird.f32 %v4189_v49  ;;  %v2284_v40 = vsub.f32 %v6137_v5, %v2172_v38 }
 0x876   :  { %4190 = vrsqrt.f32 %v2300_v59  ;;  %v2531_v36 = vmax.f32 %v2515_v19, 0.0  ;;  %vm2449_vm7 = vmor %vm2447_vm13, %vm2448_vm0 }
 0x877   :  { %v2443_v10 = vmul.f32 %v4189_v49, %v2442_v52  ;;  %v2440_v1 = vsel %vm2439_vm9, %v4187_v8, %v2436_v60  ;;  %vm2457_vm9 = vweird.f32 %v2300_v59 }
 0x878   :  { %2609 = vmatmul.f32.gmra.mxu1 %v2531_v36  ;;  %v2474_v0 = vmul.f32 %v2440_v1, %v2282_v20 }
 0x879   :  { %v2444_v33 = vmul.f32 0.5, %v2443_v10 }
 0x87a   :  { %v2495_v4 = vmul.f32 %v6176_v24, %v2474_v0 }
 0x87b   :  { %v2445_v27 = vsub.f32 1.5, %v2444_v33 }
 0x87c   :  { %v4191_v58 = vpop.eup %4190  ;;  %v2516_v29 = vadd.f32 %v6185_v53, %v2495_v4 }
 0x87d   :  { %v2446_v48 = vmul.f32 %v4189_v49, %v2445_v27  ;;  %v2452_v62 = vmul.f32 %v4191_v58, %v2300_v59  ;;  %vm2458_vm3 = vweird.f32 %v4191_v58 }
 0x87e   :  { %v2532_v32 = vmax.f32 %v2516_v29, 0.0  ;;  %vm2459_vm12 = vmor %vm2457_vm9, %vm2458_vm3 }
 0x87f   :  { %v2453_v18 = vmul.f32 %v4191_v58, %v2452_v62  ;;  %v2450_v8 = vsel %vm2449_vm7, %v4189_v49, %v2446_v48 }
 0x880   :  { %2612 = vmatmul.f32.gmra.mxu1 %v2532_v32  ;;  %v2475_v30 = vmul.f32 %v2450_v8, %v2283_v50 }
 0x881   :  { %v2454_v16 = vmul.f32 0.5, %v2453_v18 }
 0x882   :  { %v2496_v13 = vmul.f32 %v6176_v24, %v2475_v30 }
 0x883   :  { %v2455_v14 = vsub.f32 1.5, %v2454_v16 }
 0x884   :  { %v2517_v61 = vadd.f32 %v6185_v53, %v2496_v13 }
 0x885   :  { %v2456_v2 = vmul.f32 %v4191_v58, %v2455_v14 }
 0x886   :  { %v2533_v6 = vmax.f32 %v2517_v61, 0.0 }
 0x887   :  { %v2460_v63 = vsel %vm2459_vm12, %v4191_v58, %v2456_v2 }
 0x888   :  { %2615 = vmatmul.f32.gmra.mxu1 %v2533_v6  ;;  %v2476_v35 = vmul.f32 %v2460_v63, %v2284_v40 }
 0x88a   :  { %v2497_v23 = vmul.f32 %v6176_v24, %v2476_v35 }
 0x88c   :  { %v2518_v12 = vadd.f32 %v6185_v53, %v2497_v23  ;;  %v3995_v53 = vld [vmem:[%s7016_s13 + $0x1] ss:$0 sm:$0xff] }
 0x88e   :  { %v2534_v47 = vmax.f32 %v2518_v12, 0.0 }
 0x890   :  { %2618 = vmatmul.f32.gmra.mxu1 %v2534_v47 }
 0x895   :  { %v6292_v9 = vpop.f32.mrf.mxu1 }
 0x89d   :  { %v2577_v31 = vpop.f32.mrf.mxu1 }
 0x8a5   :  { %v2580_v17 = vpop.f32.mrf.mxu1 }
 0x8ad   :  { %v2583_v49 = vpop.f32.mrf.mxu1 }
 0x8b5   :  { %v2586_v19 = vpop.f32.mrf.mxu1 }
 0x8bd   :  { %v2589_v59 = vpop.f32.mrf.mxu1 }
 0x8c5   :  { %v2592_v60 = vpop.f32.mrf.mxu1 }
 0x8c6   :  { %v2593_v47 = vadd.f32 %v3995_v53, %v2592_v60  ;;  %v2584_v60 = vadd.f32 %v3995_v53, %v2583_v49 }
 0x8cd   :  { %v2595_v5 = vpop.f32.mrf.mxu1 }
 0x8ce   :  { %v2596_v63 = vadd.f32 %v3995_v53, %v2595_v5 }
 0x8d5   :  { %v2598_v38 = vpop.f32.mrf.mxu1 }
 0x8d6   :  { %v2599_v2 = vadd.f32 %v3995_v53, %v2598_v38  ;;  %v2590_v38 = vadd.f32 %v3995_v53, %v2589_v59 }
 0x8dd   :  { %v2601_v52 = vpop.f32.mrf.mxu1 }
 0x8de   :  { %v2602_v16 = vadd.f32 %v3995_v53, %v2601_v52  ;;  %v2630_v52 = vadd.f32 %v2599_v2, %v7333_v43 }
 0x8e0   :  { %v2631_v35 = vadd.f32 %v2602_v16, %v7334_v45  ;;  %v7370_v45 = vld [vmem:[#allocation36_spill] sm:$0xff] }
 0x8e5   :  { %v2604_v20 = vpop.f32.mrf.mxu1 }
 0x8e6   :  { %v2605_v32 = vadd.f32 %v3995_v53, %v2604_v20 }
 0x8e8   :  { %v2632_v40 = vadd.f32 %v2605_v32, %v7335_v55 }
 0x8ea   :  { %v6319_v20 = vmax.f32 %v2632_v40, 0.0 }
 0x8ec   :  { %7346 = vst [vmem:[#allocation55_spill] sm:$0xff] %v6319_v20 }
 0x8ed   :  { %v2607_v36 = vpop.f32.mrf.mxu1 }
 0x8ee   :  { %v2608_v48 = vadd.f32 %v3995_v53, %v2607_v36  ;;  %v2629_v36 = vadd.f32 %v2596_v63, %v7332_v25 }
 0x8f0   :  { %v2633_v13 = vadd.f32 %v2608_v48, %v7336_v56  ;;  %v2625_v48 = vadd.f32 %v2584_v60, %v7328_v3  ;;  %v7369_v56 = vld [vmem:[#allocation35_spill] sm:$0xff] }
 0x8f2   :  { %v6314_v23 = vmax.f32 %v2633_v13, 0.0  ;;  %v6347_v16 = vmax.f32 %v2625_v48, 0.0 }
 0x8f4   :  { %7345 = vst [vmem:[#allocation54_spill] sm:$0xff] %v6314_v23  ;;  %v2659_v5 = vpack.c.bf16 %v6314_v23, %v6319_v20 }
 0x8f5   :  { %v2610_v10 = vpop.f32.mrf.mxu1  ;;  %7353 = vst [vmem:[#allocation62_spill] sm:$0xff] %v6347_v16 }
 0x8f6   :  { %v2611_v27 = vadd.f32 %v3995_v53, %v2610_v10  ;;  %v6322_v10 = vmax.f32 %v2631_v35, 0.0  ;;  %v7364_v35 = vld [vmem:[#allocation33_spill] sm:$0xff] }
 0x8f8   :  { %v2634_v18 = vadd.f32 %v2611_v27, %v7337_v54  ;;  %7347 = vst [vmem:[#allocation56_spill] sm:$0xff] %v6322_v10  ;;  %v2581_v27 = vadd.f32 %v3995_v53, %v2580_v17 }
 0x8fa   :  { %v6311_v6 = vmax.f32 %v2634_v18, 0.0  ;;  %v2624_v32 = vadd.f32 %v2581_v27, %v7327_v21 }
 0x8fc   :  { %7344 = vst [vmem:[#allocation53_spill] sm:$0xff] %v6311_v6 }
 0x8fd   :  { %v2613_v1 = vpop.f32.mrf.mxu1 }
 0x8fe   :  { %v2614_v33 = vadd.f32 %v3995_v53, %v2613_v1  ;;  %v2587_v1 = vadd.f32 %v3995_v53, %v2586_v19  ;;  %v2578_v19 = vadd.f32 %v3995_v53, %v2577_v31 }
 0x900   :  { %v2635_v62 = vadd.f32 %v2614_v33, %v7338_v7  ;;  %v2627_v33 = vadd.f32 %v2590_v38, %v7330_v22  ;;  %v2623_v17 = vadd.f32 %v2578_v19, %v7326_v39  ;;  %v7366_v38 = vld [vmem:[#allocation31_spill] sm:$0xff]  ;;  %v7368_v7 = vld [vmem:[#allocation34_spill] sm:$0xff] }
 0x902   :  { %v6306_v14 = vmax.f32 %v2635_v62, 0.0  ;;  %v6338_v62 = vmax.f32 %v2627_v33, 0.0  ;;  %v6354_v2 = vmax.f32 %v2623_v17, 0.0 }
 0x904   :  { %7343 = vst [vmem:[#allocation52_spill] sm:$0xff] %v6306_v14  ;;  %v2660_v12 = vpack.c.bf16 %v6306_v14, %v6311_v6 }
 0x905   :  { %v2616_v24 = vpop.f32.mrf.mxu1  ;;  %7351 = vst [vmem:[#allocation60_spill] sm:$0xff] %v6338_v62 }
 0x906   :  { %v2617_v0 = vadd.f32 %v3995_v53, %v2616_v24  ;;  %v2628_v24 = vadd.f32 %v2593_v47, %v7331_v44  ;;  %v7365_v47 = vld [vmem:[#allocation30_spill] sm:$0xff] }
 0x908   :  { %v2636_v58 = vadd.f32 %v2617_v0, %v7339_v34  ;;  %v6327_v0 = vmax.f32 %v2630_v52, 0.0 }
 0x90a   :  { %v6301_v8 = vmax.f32 %v2636_v58, 0.0  ;;  %7348 = vst [vmem:[#allocation57_spill] sm:$0xff] %v6327_v0  ;;  %v2658_v59 = vpack.c.bf16 %v6322_v10, %v6327_v0  ;;  %v2626_v58 = vadd.f32 %v2587_v1, %v7329_v28 }
 0x90c   :  { %7341 = vst [vmem:[#allocation50_spill] sm:$0xff] %v6301_v8  ;;  %v6344_v18 = vmax.f32 %v2626_v58, 0.0 }
 0x90d   :  { %v2619_v4 = vpop.f32.mrf.mxu1 }
 0x90e   :  { %v2620_v29 = vadd.f32 %v3995_v53, %v2619_v4  ;;  %v6330_v4 = vmax.f32 %v2629_v36, 0.0  ;;  %7352 = vst [vmem:[#allocation61_spill] sm:$0xff] %v6344_v18  ;;  %v2656_v31 = vpack.c.bf16 %v6338_v62, %v6344_v18 }
 0x910   :  { %v2637_v50 = vadd.f32 %v2620_v29, %v7340_v51  ;;  %7349 = vst [vmem:[#allocation58_spill] sm:$0xff] %v6330_v4  ;;  %v6335_v29 = vmax.f32 %v2628_v24, 0.0 }
 0x912   :  { %v6303_v30 = vmax.f32 %v2637_v50, 0.0  ;;  %7350 = vst [vmem:[#allocation59_spill] sm:$0xff] %v6335_v29  ;;  %v2657_v49 = vpack.c.bf16 %v6330_v4, %v6335_v29  ;;  %v2575_v50 = vadd.f32 %v3995_v53, %v6292_v9 }
 0x914   :  { %7342 = vst [vmem:[#allocation51_spill] sm:$0xff] %v6303_v30  ;;  %v2661_v61 = vpack.c.bf16 %v6303_v30, %v6301_v8  ;;  %v2622_v13 = vadd.f32 %v2575_v50, %v5748_v15 }
 0x916   :  { %2662 = vmatpush.bf16.msrb.mxu2 %v2661_v61  ;;  %v6352_v61 = vmax.f32 %v2624_v32, 0.0  ;;  %v6358_v53 = vmax.f32 %v2622_v13, 0.0  ;;  %v7362_v13 = vld [vmem:[#allocation28_spill] sm:$0xff] }
 0x918   :  { %v2655_v9 = vpack.c.bf16 %v6347_v16, %v6352_v61  ;;  %v2654_v40 = vpack.c.bf16 %v6354_v2, %v6358_v53 }
 0x91a   :  { %2663 = vmatpush.bf16.msrb.mxu2 %v2660_v12 }
 0x91e   :  { %2664 = vmatpush.bf16.msrb.mxu2 %v2659_v5  ;;  %v7367_v5 = vld [vmem:[#allocation32_spill] sm:$0xff] }
 0x922   :  { %2665 = vmatpush.bf16.msrb.mxu2 %v2658_v59 }
 0x926   :  { %2666 = vmatpush.bf16.msrb.mxu2 %v2657_v49 }
 0x92a   :  { %2667 = vmatpush.bf16.msrb.mxu2 %v2656_v31 }
 0x92e   :  { %2668 = vmatpush.bf16.msrb.mxu2 %v2655_v9 }
 0x932   :  { %2669 = vmatpush.bf16.msrb.mxu2 %v2654_v40  ;;  %v7363_v40 = vld [vmem:[#allocation29_spill] sm:$0xff] }
 0x935   :  { %3844 = vmatmul.msk.bf16.vlgmr.msrb.gmra.mxu2 %vm4880_vm2, %v7241_v41  ;;  %vm7378_vm2 = vnez %v7245_v46  ;;  %v3905_v46 = vld [vmem:[%s7011_s8 + $0x168] sm:$0xff] }
 0x936   :  { %3048 = vmatpush.msra.mxu1 %v3905_v46 }
 0x945   :  { %3846 = vmatmul.msk.bf16.gmra.mxu2 %vm4901_vm5, %v7241_v41  ;;  %vm7379_vm5 = vnez %v7247_v42  ;;  %v3904_v42 = vld [vmem:[%s7011_s8 + $0x160] sm:$0xff] }
 0x946   :  { %3049 = vmatpush.msra.mxu1 %v3904_v42  ;;  %v7389_v42 = vld [vmem:[#allocation59_spill] sm:$0xff] }
 0x955   :  { %3848 = vmatmul.msk.bf16.gmra.mxu2 %vm4922_vm8, %v7241_v41  ;;  %vm7380_vm8 = vnez %v7249_v26  ;;  %v3903_v26 = vld [vmem:[%s7011_s8 + $0x158] sm:$0xff] }
 0x956   :  { %3050 = vmatpush.msra.mxu1 %v3903_v26 }
 0x965   :  { %3850 = vmatmul.msk.bf16.gmra.mxu2 %vm4943_vm11, %v7241_v41  ;;  %vm7381_vm11 = vnez %v7251_v11  ;;  %v3900_v11 = vld [vmem:[%s7011_s8 + $0x140] sm:$0xff] }
 0x975   :  { %3852 = vmatmul.msk.bf16.gmra.mxu2 %vm4964_vm14, %v7241_v41 }
 0x985   :  { %3854 = vmatmul.msk.bf16.gmra.mxu2 %vm4985_vm1, %v7241_v41 }
 0x995   :  { %3856 = vmatmul.msk.bf16.gmra.mxu2 %vm4994_vm6, %v7241_v41 }
 0x9a5   :  { %3858 = vmatmul.msk.bf16.gmra.mxu2 %vm5007_vm10, %v7241_v41 }
 0x9b8   :  { %v2671_v1 = vpop.f32.mrf.mxu2 }
 0x9b9   :  { %v2672_v9 = vadd.f32 %v2671_v1, %v7362_v13  ;;  %v7371_v1 = vld [vmem:[#allocation37_spill] sm:$0xff] }
 0x9bb   :  { %v2711_v34 = vmax.f32 %v2672_v9, 0.0 }
 0x9c0   :  { %v2673_v24 = vpop.f32.mrf.mxu2 }
 0x9c1   :  { %v2674_v12 = vadd.f32 %v2673_v24, %v7364_v35  ;;  %v7373_v35 = vld [vmem:[#allocation39_spill] sm:$0xff] }
 0x9c8   :  { %v2676_v60 = vpop.f32.mrf.mxu2 }
 0x9c9   :  { %v2677_v55 = vadd.f32 %v2676_v60, %v7369_v56  ;;  %v7375_v56 = vld [vmem:[#allocation41_spill] sm:$0xff] }
 0x9d0   :  { %v2678_v33 = vpop.f32.mrf.mxu2 }
 0x9d1   :  { %v2679_v43 = vadd.f32 %v2678_v33, %v7370_v45  ;;  %v7376_v45 = vld [vmem:[#allocation42_spill] sm:$0xff] }
 0x9d8   :  { %v2681_v59 = vpop.f32.mrf.mxu2 }
 0x9d9   :  { %v2682_v52 = vadd.f32 %v2681_v59, %v7365_v47  ;;  %v7374_v59 = vld [vmem:[#allocation40_spill] sm:$0xff] }
 0x9e0   :  { %v2683_v27 = vpop.f32.mrf.mxu2 }
 0x9e1   :  { %v2684_v63 = vadd.f32 %v2683_v27, %v7363_v40  ;;  %v2712_v27 = vmax.f32 %v2674_v12, 0.0  ;;  %v7372_v40 = vld [vmem:[#allocation38_spill] sm:$0xff] }
 0x9e3   :  { %v2716_v25 = vmax.f32 %v2684_v63, 0.0  ;;  %v6405_v12 = vadd.f32 1e-07, %v2712_v27 }
 0x9e5   :  { %v6403_v63 = vadd.f32 1e-07, %v2716_v25 }
 0x9e8   :  { %v2686_v58 = vpop.f32.mrf.mxu2 }
 0x9e9   :  { %v2687_v36 = vadd.f32 %v2686_v58, %v7366_v38  ;;  %v2715_v58 = vmax.f32 %v2682_v52, 0.0 }
 0x9eb   :  { %v2717_v38 = vmax.f32 %v2687_v36, 0.0  ;;  %v2744_v36 = vstv %s3859_s17 }
 0x9f0   :  { %v2688_v19 = vpop.f32.mrf.mxu2 }
 0x9f1   :  { %v2689_v51 = vadd.f32 %v2688_v19, %v7367_v5  ;;  %v6399_v5 = vadd.f32 1e-07, %v2711_v34  ;;  %v6409_v34 = vadd.f32 1e-07, %v2717_v38 }
 0x9f3   :  { %v2718_v19 = vmax.f32 %v2689_v51, 0.0  ;;  %v6407_v51 = vadd.f32 1e-07, %v2715_v58  ;;  %v6425_v27 = vmul.f32 %v2744_v36, %v6399_v5  ;;  %v6440_v58 = vmul.f32 %v2744_v36, %v6409_v34 }
 0x9f8   :  { %v2691_v48 = vpop.f32.mrf.mxu2 }
 0x9f9   :  { %v2692_v13 = vadd.f32 %v2691_v48, %v7371_v1  ;;  %v2714_v48 = vmax.f32 %v2679_v43, 0.0 }
 0x9fb   :  { %v6417_v25 = vadd.f32 1e-07, %v2714_v48 }
 0xa00   :  { %v2693_v49 = vpop.f32.mrf.mxu2 }
 0xa01   :  { %v2694_v54 = vadd.f32 %v2693_v49, %v7368_v7  ;;  %v2713_v49 = vmax.f32 %v2677_v55, 0.0 }
 0xa03   :  { %v2720_v7 = vmax.f32 %v2694_v54, 0.0  ;;  %v6411_v54 = vadd.f32 1e-07, %v2718_v19  ;;  %v6415_v43 = vadd.f32 1e-07, %v2713_v49  ;;  %v6453_v49 = vmul.f32 %v2744_v36, %v6417_v25 }
 0xa05   :  { %v6443_v38 = vmul.f32 %v2744_v36, %v6411_v54 }
 0xa08   :  { %v2696_v50 = vpop.f32.mrf.mxu2 }
 0xa09   :  { %v2697_v24 = vadd.f32 %v2696_v50, %v7372_v40  ;;  %v2719_v50 = vmax.f32 %v2692_v13, 0.0  ;;  %v6420_v13 = vmul.f32 %v2744_v36, %v6403_v63 }
 0xa10   :  { %v2698_v32 = vpop.f32.mrf.mxu2 }
 0xa11   :  { %v2699_v44 = vadd.f32 %v2698_v32, %v7373_v35  ;;  %v2721_v32 = vmax.f32 %v2697_v24, 0.0 }
 0xa13   :  { %v6427_v40 = vadd.f32 1e-07, %v2721_v32 }
 0xa15   :  { %v2755_v32 = vmul.f32 %v2744_v36, %v6427_v40 }
 0xa18   :  { %v2701_v17 = vpop.f32.mrf.mxu2 }
 0xa19   :  { %v2702_v60 = vadd.f32 %v2701_v17, %v7375_v56  ;;  %v6413_v17 = vadd.f32 1e-07, %v2720_v7 }
 0xa1b   :  { %v2723_v1 = vmax.f32 %v2702_v60, 0.0  ;;  %v7377_v60 = vld [vmem:[#allocation43_spill] sm:$0xff] }
 0xa1d   :  { %v6446_v7 = vadd.f32 1e-07, %v2723_v1 }
 0xa1f   :  { %v2757_v28 = vmul.f32 %v2744_v36, %v6446_v7 }
 0xa20   :  { %v2703_v31 = vpop.f32.mrf.mxu2 }
 0xa21   :  { %v2704_v47 = vadd.f32 %v2703_v31, %v7374_v59  ;;  %v2722_v31 = vmax.f32 %v2699_v44, 0.0  ;;  %v6422_v44 = vadd.f32 1e-07, %v2719_v50  ;;  %v6434_v59 = vmul.f32 %v2744_v36, %v6405_v12 }
 0xa23   :  { %v2724_v52 = vmax.f32 %v2704_v47, 0.0  ;;  %v6429_v24 = vadd.f32 1e-07, %v2722_v31  ;;  %v6437_v47 = vmul.f32 %v2744_v36, %v6407_v51  ;;  %v2762_v48 = vmax.f32 %v6434_v59, %v6420_v13 }
 0xa24   :  { %v2753_v50 = vmul.f32 %v2744_v36, %v6422_v44 }
 0xa25   :  { %v6431_v35 = vadd.f32 1e-07, %v2724_v52  ;;  %v2756_v31 = vmul.f32 %v2744_v36, %v6429_v24 }
 0xa27   :  { %v2758_v52 = vmul.f32 %v2744_v36, %v6431_v35 }
 0xa28   :  { %v2706_v9 = vpop.f32.mrf.mxu2 }
 0xa29   :  { %v2707_v33 = vadd.f32 %v2706_v9, %v7376_v45  ;;  %v2754_v9 = vmul.f32 %v2744_v36, %v6413_v17 }
 0xa2b   :  { %v2725_v55 = vmax.f32 %v2707_v33, 0.0  ;;  %v6450_v33 = vmul.f32 %v2744_v36, %v6415_v43  ;;  %v2766_v22 = vmax.f32 %v2762_v48, %v2754_v9 }
 0xa2d   :  { %v2741_v56 = vadd.f32 1e-07, %v2725_v55  ;;  %v2761_v55 = vmax.f32 %v6425_v27, %v6437_v47  ;;  %v2770_v8 = vmax.f32 %v2766_v22, %v2758_v52 }
 0xa2f   :  { %v2759_v3 = vmul.f32 %v2744_v36, %v2741_v56  ;;  %v2765_v39 = vmax.f32 %v2761_v55, %v2753_v50 }
 0xa30   :  { %v2708_v19 = vpop.f32.mrf.mxu2 }
 0xa31   :  { %v2709_v45 = vadd.f32 %v2708_v19, %v7377_v60  ;;  %v2763_v19 = vmax.f32 %v6450_v33, %v6440_v58  ;;  %v2764_v60 = vmax.f32 %v6453_v49, %v6443_v38 }
 0xa33   :  { %v2726_v1 = vmax.f32 %v2709_v45, 0.0  ;;  %v2767_v15 = vmax.f32 %v2763_v19, %v2755_v32  ;;  %v2768_v30 = vmax.f32 %v2764_v60, %v2756_v31  ;;  %v2769_v45 = vmax.f32 %v2765_v39, %v2757_v28 }
 0xa35   :  { %v2742_v21 = vadd.f32 1e-07, %v2726_v1  ;;  %v2771_v6 = vmax.f32 %v2767_v15, %v2759_v3  ;;  %v2773_v20 = vmax.f32 %v2769_v45, %v2770_v8 }
 0xa37   :  { %v2760_v14 = vmul.f32 %v2744_v36, %v2742_v21 }
 0xa39   :  { %v2772_v23 = vmax.f32 %v2768_v30, %v2760_v14 }
 0xa3b   :  { %v2774_v10 = vmax.f32 %v2771_v6, %v2772_v23 }
 0xa3d   :  { %v2775_v0 = vmax.f32 %v2773_v20, %v2774_v10 }
 0xa3f   :  { %v2776_v4 = vrot.slane %v2775_v0, 4 }
 0xa41   :  { %v2777_v29 = vmax.f32 %v2775_v0, %v2776_v4 }
 0xa43   :  { %v2778_v62 = vrot.slane %v2777_v29, 2 }
 0xa45   :  { %v2779_v18 = vmax.f32 %v2777_v29, %v2778_v62 }
 0xa47   :  { %v2780_v48 = vrot.slane %v2779_v18, 1 }
 0xa49   :  { %v6468_v16 = vmax.f32 %v2779_v18, %v2780_v48 }
 0xa4b   :  { %v2796_v1 = vsub.f32 %v2759_v3, %v6468_v16  ;;  %v2797_v55 = vsub.f32 %v2760_v14, %v6468_v16  ;;  %v2794_v22 = vsub.f32 %v2757_v28, %v6468_v16  ;;  %v2795_v39 = vsub.f32 %v2758_v52, %v6468_v16 }
 0xa4c   :  { %v2792_v15 = vsub.f32 %v2755_v32, %v6468_v16  ;;  %v2793_v8 = vsub.f32 %v2756_v31, %v6468_v16  ;;  %v2790_v0 = vsub.f32 %v2753_v50, %v6468_v16  ;;  %v2791_v14 = vsub.f32 %v2754_v9, %v6468_v16 }
 0xa4d   :  { %v2826_v30 = vmul.f32 1.442695, %v2796_v1  ;;  %v2828_v6 = vmul.f32 1.442695, %v2797_v55  ;;  %v2822_v23 = vmul.f32 1.442695, %v2794_v22  ;;  %v2788_v28 = vsub.f32 %v6440_v58, %v6468_v16 }
 0xa4e   :  { %v2824_v20 = vmul.f32 1.442695, %v2795_v39  ;;  %v2818_v10 = vmul.f32 1.442695, %v2792_v15  ;;  %v2820_v3 = vmul.f32 1.442695, %v2793_v8  ;;  %v2789_v62 = vsub.f32 %v6443_v38, %v6468_v16 }
 0xa4f   :  { %4192 = vpow2.f32 %v2826_v30  ;;  %v2814_v4 = vmul.f32 1.442695, %v2790_v0  ;;  %v2816_v29 = vmul.f32 1.442695, %v2791_v14  ;;  %v2782_v36 = vsub.f32 %v6425_v27, %v6468_v16 }
 0xa50   :  { %4194 = vpow2.f32 %v2828_v6  ;;  %v2810_v31 = vmul.f32 1.442695, %v2788_v28  ;;  %v2783_v9 = vsub.f32 %v6434_v59, %v6468_v16  ;;  %v2786_v60 = vsub.f32 %v6437_v47, %v6468_v16 }
 0xa51   :  { %4196 = vpow2.f32 %v2822_v23  ;;  %v2812_v38 = vmul.f32 1.442695, %v2789_v62  ;;  %v2787_v48 = vsub.f32 %v6420_v13, %v6468_v16  ;;  %v2798_v55 = vmul.f32 1.442695, %v2782_v36 }
 0xa52   :  { %4198 = vpow2.f32 %v2824_v20  ;;  %v2800_v22 = vmul.f32 1.442695, %v2783_v9  ;;  %v2806_v47 = vmul.f32 1.442695, %v2786_v60  ;;  %v2784_v15 = vsub.f32 %v6450_v33, %v6468_v16 }
 0xa53   :  { %4200 = vpow2.f32 %v2818_v10  ;;  %v2808_v8 = vmul.f32 1.442695, %v2787_v48  ;;  %v2785_v13 = vsub.f32 %v6453_v49, %v6468_v16  ;;  %v3898_v48 = vld [vmem:[%s7011_s8 + $0x130] sm:$0xff] }
 0xa54   :  { %4202 = vpow2.f32 %v2820_v3  ;;  %v2802_v10 = vmul.f32 1.442695, %v2784_v15 }
 0xa55   :  { %v4193_v18 = vpop.eup %4192  ;;  %4204 = vpow2.f32 %v2814_v4  ;;  %v2804_v33 = vmul.f32 1.442695, %v2785_v13 }
 0xa56   :  { %v4195_v50 = vpop.eup %4194  ;;  %v2844_v32 = vmul.f32 %v4193_v18, %v2741_v56  ;;  %4206 = vpow2.f32 %v2816_v29 }
 0xa57   :  { %v4197_v52 = vpop.eup %4196  ;;  %v2845_v19 = vmul.f32 %v4195_v50, %v2742_v21  ;;  %v2861_v58 = vpack.c.bf16 %v4195_v50, %v4193_v18  ;;  %4208 = vpow2.f32 %v2810_v31 }
 0xa58   :  { %v4199_v45 = vpop.eup %4198  ;;  %v2842_v56 = vmul.f32 %v4197_v52, %v6446_v7  ;;  %4210 = vpow2.f32 %v2812_v38 }
 0xa59   :  { %v4201_v27 = vpop.eup %4200  ;;  %v2860_v1 = vpack.c.bf16 %v2845_v19, %v2844_v32  ;;  %2911 = vmatpush.bf16.msra.mxu0 %v2861_v58  ;;  %v2843_v59 = vmul.f32 %v4199_v45, %v6431_v35  ;;  %v2859_v39 = vpack.c.bf16 %v4199_v45, %v4197_v52  ;;  %4212 = vpow2.f32 %v2798_v55  ;;  %v3893_v55 = vld [vmem:[%s7011_s8 + $0x108] sm:$0xff] }
 0xa5a   :  { %v4203_v21 = vpop.eup %4202  ;;  %v2840_v35 = vmul.f32 %v4201_v27, %v6427_v40  ;;  %4214 = vpow2.f32 %v2800_v22  ;;  %v7384_v22 = vld [vmem:[#allocation45_spill] sm:$0xff] }
 0xa5b   :  { %2862 = vmatpush.bf16.msra.mxu3 %v2860_v1  ;;  %v4205_v30 = vpop.eup %4204  ;;  %v2858_v7 = vpack.c.bf16 %v2843_v59, %v2842_v56  ;;  %v2841_v6 = vmul.f32 %v4203_v21, %v6429_v24  ;;  %v2857_v20 = vpack.c.bf16 %v4203_v21, %v4201_v27  ;;  %4216 = vpow2.f32 %v2806_v47  ;;  %v3897_v27 = vld [vmem:[%s7011_s8 + $0x128] sm:$0xff]  ;;  %v3896_v1 = vld [vmem:[%s7011_s8 + $0x120] sm:$0xff]  ;;  %v3895_v56 = vld [vmem:[%s7011_s8 + $0x118] sm:$0xff] }
 0xa5c   :  { %v4207_v23 = vpop.eup %4206  ;;  %4218 = vpow2.f32 %v2808_v8  ;;  %v2838_v16 = vmul.f32 %v4205_v30, %v6422_v44  ;;  %v3894_v59 = vld [vmem:[%s7011_s8 + $0x110] sm:$0xff]  ;;  %v3892_v21 = vld [vmem:[%s7011_s8 + $0x100] sm:$0xff]  ;;  %vm7385_vm1 = vnez %v7384_v22  ;;  %v7391_v22 = vld [vmem:[#allocation57_spill] sm:$0xff] }
 0xa5d   :  { %2912 = vmatpush.bf16.msra.mxu0 %v2859_v39  ;;  %v4209_v0 = vpop.eup %4208  ;;  %v2856_v3 = vpack.c.bf16 %v2841_v6, %v2840_v35  ;;  %v2839_v49 = vmul.f32 %v4207_v23, %v6413_v17  ;;  %v2855_v24 = vpack.c.bf16 %v4207_v23, %v4205_v30  ;;  %4220 = vpow2.f32 %v2802_v10 }
 0xa5e   :  { %v4211_v14 = vpop.eup %4210  ;;  %4222 = vpow2.f32 %v2804_v33  ;;  %v2836_v18 = vmul.f32 %v4209_v0, %v6409_v34 }
 0xa5f   :  { %2863 = vmatpush.bf16.msra.mxu3 %v2858_v7  ;;  %v4213_v40 = vpop.eup %4212  ;;  %v2854_v62 = vpack.c.bf16 %v2839_v49, %v2838_v16  ;;  %v2837_v36 = vmul.f32 %v4211_v14, %v6411_v54  ;;  %v2853_v17 = vpack.c.bf16 %v4211_v14, %v4209_v0 }
 0xa60   :  { %v4215_v28 = vpop.eup %4214  ;;  %v2830_v4 = vmul.f32 %v4213_v40, %v6399_v5 }
 0xa61   :  { %2913 = vmatpush.bf16.msra.mxu0 %v2857_v20  ;;  %v4217_v29 = vpop.eup %4216  ;;  %v2831_v44 = vmul.f32 %v4215_v28, %v6405_v12  ;;  %v2852_v9 = vpack.c.bf16 %v2837_v36, %v2836_v18  ;;  %v2847_v38 = vpack.c.bf16 %v4215_v28, %v4213_v40  ;;  %v7386_v18 = vld [vmem:[#allocation62_spill] sm:$0xff] }
 0xa62   :  { %v4219_v50 = vpop.eup %4218  ;;  %v2834_v52 = vmul.f32 %v4217_v29, %v6407_v51  ;;  %v3901_v51 = vld [vmem:[%s7011_s8 + $0x148] sm:$0xff] }
 0xa63   :  { %2864 = vmatpush.bf16.msra.mxu3 %v2856_v3  ;;  %v2846_v32 = vpack.c.bf16 %v2831_v44, %v2830_v4  ;;  %v4221_v31 = vpop.eup %4220  ;;  %v2835_v5 = vmul.f32 %v4219_v50, %v6403_v63  ;;  %v2851_v58 = vpack.c.bf16 %v4219_v50, %v4217_v29  ;;  %v3902_v63 = vld [vmem:[%s7011_s8 + $0x150] sm:$0xff] }
 0xa64   :  { %v4223_v19 = vpop.eup %4222  ;;  %v2832_v54 = vmul.f32 %v4221_v31, %v6415_v43  ;;  %3051 = vmatpush.msra.mxu1 %v3902_v63  ;;  %v3899_v43 = vld [vmem:[%s7011_s8 + $0x138] sm:$0xff] }
 0xa65   :  { %2914 = vmatpush.bf16.msra.mxu0 %v2855_v24  ;;  %v2850_v34 = vpack.c.bf16 %v2835_v5, %v2834_v52  ;;  %v2833_v12 = vmul.f32 %v4223_v19, %v6417_v25  ;;  %v2849_v60 = vpack.c.bf16 %v4223_v19, %v4221_v31  ;;  %v7382_v25 = vld [vmem:[#allocation44_spill] sm:$0xff] }
 0xa66   :  { %3052 = vmatpush.msra.mxu1 %v3901_v51  ;;  %vm7383_vm14 = vnez %v7382_v25 }
 0xa67   :  { %2865 = vmatpush.bf16.msra.mxu3 %v2854_v62  ;;  %v2848_v45 = vpack.c.bf16 %v2833_v12, %v2832_v54  ;;  %v7388_v12 = vld [vmem:[#allocation60_spill] sm:$0xff] }
 0xa68   :  { %3053 = vmatpush.msra.mxu1 %v3900_v11 }
 0xa69   :  { %2915 = vmatpush.bf16.msra.mxu0 %v2853_v17 }
 0xa6a   :  { %3054 = vmatpush.msra.mxu1 %v3899_v43 }
 0xa6b   :  { %2866 = vmatpush.bf16.msra.mxu3 %v2852_v9  ;;  %v7387_v9 = vld [vmem:[#allocation61_spill] sm:$0xff] }
 0xa6c   :  { %3055 = vmatpush.msra.mxu1 %v3898_v48  ;;  %v7390_v48 = vld [vmem:[#allocation58_spill] sm:$0xff] }
 0xa6d   :  { %2916 = vmatpush.bf16.msra.mxu0 %v2851_v58 }
 0xa6e   :  { %3056 = vmatpush.msra.mxu1 %v3897_v27 }
 0xa6f   :  { %2867 = vmatpush.bf16.msra.mxu3 %v2850_v34 }
 0xa70   :  { %3057 = vmatpush.msra.mxu1 %v3896_v1 }
 0xa71   :  { %2917 = vmatpush.bf16.msra.mxu0 %v2849_v60 }
 0xa72   :  { %3058 = vmatpush.msra.mxu1 %v3895_v56 }
 0xa73   :  { %2868 = vmatpush.bf16.msra.mxu3 %v2848_v45 }
 0xa74   :  { %3059 = vmatpush.msra.mxu1 %v3894_v59 }
 0xa75   :  { %2918 = vmatpush.bf16.msra.mxu0 %v2847_v38 }
 0xa76   :  { %3060 = vmatpush.msra.mxu1 %v3893_v55 }
 0xa77   :  { %2869 = vmatpush.bf16.msra.mxu3 %v2846_v32 }
 0xa78   :  { %3877 = vmatmul.msk.bf16.vlgmr.msra.gmra.mxu0 %vm5231_vm15, %v7241_v41  ;;  %3061 = vmatpush.msra.mxu1 %v3892_v21 }
 0xa7a   :  { %3861 = vmatmul.msk.bf16.vlgmr.msra.gmra.mxu3 %vm5231_vm15, %v7241_v41 }
 0xa88   :  { %3879 = vmatmul.msk.bf16.gmra.mxu0 %vm5245_vm4, %v7241_v41 }
 0xa8a   :  { %3863 = vmatmul.msk.bf16.gmra.mxu3 %vm5245_vm4, %v7241_v41 }
 0xa98   :  { %3881 = vmatmul.msk.bf16.gmra.mxu0 %vm7378_vm2, %v7241_v41 }
 0xa9a   :  { %3865 = vmatmul.msk.bf16.gmra.mxu3 %vm7378_vm2, %v7241_v41 }
 0xaa8   :  { %3883 = vmatmul.msk.bf16.gmra.mxu0 %vm7379_vm5, %v7241_v41 }
 0xaaa   :  { %3867 = vmatmul.msk.bf16.gmra.mxu3 %vm7379_vm5, %v7241_v41 }
 0xab8   :  { %3885 = vmatmul.msk.bf16.gmra.mxu0 %vm7380_vm8, %v7241_v41 }
 0xaba   :  { %3869 = vmatmul.msk.bf16.gmra.mxu3 %vm7380_vm8, %v7241_v41 }
 0xac8   :  { %3887 = vmatmul.msk.bf16.gmra.mxu0 %vm7381_vm11, %v7241_v41 }
 0xaca   :  { %3871 = vmatmul.msk.bf16.gmra.mxu3 %vm7381_vm11, %v7241_v41 }
 0xad8   :  { %3889 = vmatmul.msk.bf16.gmra.mxu0 %vm7383_vm14, %v7241_v41 }
 0xada   :  { %3873 = vmatmul.msk.bf16.gmra.mxu3 %vm7383_vm14, %v7241_v41 }
 0xae8   :  { %3891 = vmatmul.msk.bf16.gmra.mxu0 %vm7385_vm1, %v7241_v41 }
 0xaea   :  { %3875 = vmatmul.msk.bf16.gmra.mxu3 %vm7385_vm1, %v7241_v41 }
 0xaf5   :  { %v2920_v39 = vpop.f32.mrf.mxu0 }
 0xaf6   :  { %v2960_v47 = vmax.f32 %v2920_v39, 1e-12 }
 0xaf8   :  { %4224 = vrcp.f32 %v2960_v47 }
 0xafd   :  { %v2922_v15 = vpop.f32.mrf.mxu0  ;;  %v2871_v8 = vpop.f32.mrf.mxu3 }
 0xafe   :  { %v4225_v13 = vpop.eup %4224  ;;  %v2961_v30 = vmax.f32 %v2922_v15, 1e-12 }
 0xaff   :  { %v2992_v7 = vmul.f32 %v4225_v13, %v2871_v8 }
 0xb00   :  { %4226 = vrcp.f32 %v2961_v30 }
 0xb01   :  { %v3008_v35 = vadd.f32 %v2992_v7, %v6358_v53  ;;  %v7392_v7 = vld [vmem:[#allocation56_spill] sm:$0xff] }
 0xb03   :  { %3062 = vmatmul.f32.vlgmr.msra.gmra.mxu1 %v3008_v35 }
 0xb05   :  { %v2925_v6 = vpop.f32.mrf.mxu0  ;;  %v2873_v23 = vpop.f32.mrf.mxu3 }
 0xb06   :  { %v4227_v20 = vpop.eup %4226  ;;  %v2962_v10 = vmax.f32 %v2925_v6, 1e-12 }
 0xb07   :  { %v2993_v33 = vmul.f32 %v4227_v20, %v2873_v23 }
 0xb08   :  { %4228 = vrcp.f32 %v2962_v10 }
 0xb09   :  { %v3009_v41 = vadd.f32 %v2993_v33, %v6354_v2 }
 0xb0b   :  { %3065 = vmatmul.f32.gmra.mxu1 %v3009_v41  ;;  %v7393_v41 = vld [vmem:[#allocation55_spill] sm:$0xff] }
 0xb0d   :  { %v2927_v0 = vpop.f32.mrf.mxu0  ;;  %v2876_v3 = vpop.f32.mrf.mxu3 }
 0xb0e   :  { %v4229_v16 = vpop.eup %4228  ;;  %v2963_v49 = vmax.f32 %v2927_v0, 1e-12 }
 0xb0f   :  { %v2994_v14 = vmul.f32 %v4229_v16, %v2876_v3 }
 0xb10   :  { %4230 = vrcp.f32 %v2963_v49 }
 0xb11   :  { %v3010_v40 = vadd.f32 %v2994_v14, %v6352_v61 }
 0xb13   :  { %3068 = vmatmul.f32.gmra.mxu1 %v3010_v40 }
 0xb15   :  { %v2930_v24 = vpop.f32.mrf.mxu0  ;;  %v2878_v28 = vpop.f32.mrf.mxu3 }
 0xb16   :  { %v4231_v4 = vpop.eup %4230  ;;  %v2964_v29 = vmax.f32 %v2930_v24, 1e-12  ;;  %v7394_v24 = vld [vmem:[#allocation54_spill] sm:$0xff] }
 0xb17   :  { %v2995_v62 = vmul.f32 %v4231_v4, %v2878_v28 }
 0xb18   :  { %4232 = vrcp.f32 %v2964_v29 }
 0xb19   :  { %v3011_v36 = vadd.f32 %v2995_v62, %v7386_v18 }
 0xb1b   :  { %3071 = vmatmul.f32.gmra.mxu1 %v3011_v36 }
 0xb1d   :  { %v2932_v44 = vpop.f32.mrf.mxu0  ;;  %v2881_v50 = vpop.f32.mrf.mxu3 }
 0xb1e   :  { %v4233_v17 = vpop.eup %4232  ;;  %v2965_v32 = vmax.f32 %v2932_v44, 1e-12 }
 0xb1f   :  { %v2996_v31 = vmul.f32 %v4233_v17, %v2881_v50  ;;  %v7395_v50 = vld [vmem:[#allocation53_spill] sm:$0xff] }
 0xb20   :  { %4234 = vrcp.f32 %v2965_v32 }
 0xb21   :  { %v3012_v52 = vadd.f32 %v2996_v31, %v7387_v9 }
 0xb23   :  { %3074 = vmatmul.f32.gmra.mxu1 %v3012_v52 }
 0xb25   :  { %v2935_v5 = vpop.f32.mrf.mxu0  ;;  %v2883_v19 = vpop.f32.mrf.mxu3 }
 0xb26   :  { %v4235_v58 = vpop.eup %4234  ;;  %v2966_v34 = vmax.f32 %v2935_v5, 1e-12 }
 0xb27   :  { %v2997_v54 = vmul.f32 %v4235_v58, %v2883_v19  ;;  %v7396_v58 = vld [vmem:[#allocation52_spill] sm:$0xff] }
 0xb28   :  { %4236 = vrcp.f32 %v2966_v34 }
 0xb29   :  { %v3013_v60 = vadd.f32 %v2997_v54, %v7388_v12 }
 0xb2b   :  { %3077 = vmatmul.f32.gmra.mxu1 %v3013_v60 }
 0xb2d   :  { %v2937_v45 = vpop.f32.mrf.mxu0  ;;  %v2886_v38 = vpop.f32.mrf.mxu3 }
 0xb2e   :  { %v4237_v57 = vpop.eup %4236  ;;  %v2967_v37 = vmax.f32 %v2937_v45, 1e-12 }
 0xb2f   :  { %v2998_v46 = vmul.f32 %v4237_v57, %v2886_v38 }
 0xb30   :  { %4238 = vrcp.f32 %v2967_v37  ;;  %v7397_v37 = vld [vmem:[#allocation50_spill] sm:$0xff] }
 0xb31   :  { %v3014_v26 = vadd.f32 %v2998_v46, %v7389_v42 }
 0xb33   :  { %3080 = vmatmul.f32.gmra.mxu1 %v3014_v26 }
 0xb35   :  { %v2940_v63 = vpop.f32.mrf.mxu0  ;;  %v2888_v51 = vpop.f32.mrf.mxu3 }
 0xb36   :  { %v4239_v11 = vpop.eup %4238  ;;  %v2968_v43 = vmax.f32 %v2940_v63, 1e-12 }
 0xb37   :  { %v2999_v25 = vmul.f32 %v4239_v11, %v2888_v51  ;;  %v7398_v11 = vld [vmem:[#allocation51_spill] sm:$0xff] }
 0xb38   :  { %4240 = vrcp.f32 %v2968_v43 }
 0xb39   :  { %v3015_v27 = vadd.f32 %v2999_v25, %v7390_v48  ;;  %v6623_v25 = vld [vmem:[%s7012_s9 + $0x2] ss:$0 sm:$0xff] }
 0xb3b   :  { %3083 = vmatmul.f32.gmra.mxu1 %v3015_v27 }
 0xb3d   :  { %v2942_v1 = vpop.f32.mrf.mxu0  ;;  %v2891_v56 = vpop.f32.mrf.mxu3 }
 0xb3e   :  { %v4241_v59 = vpop.eup %4240  ;;  %v2969_v55 = vmax.f32 %v2942_v1, 1e-12 }
 0xb3f   :  { %v3000_v21 = vmul.f32 %v4241_v59, %v2891_v56 }
 0xb40   :  { %4242 = vrcp.f32 %v2969_v55 }
 0xb41   :  { %v3016_v39 = vadd.f32 %v3000_v21, %v7391_v22 }
 0xb43   :  { %3086 = vmatmul.f32.gmra.mxu1 %v3016_v39 }
 0xb45   :  { %v2945_v47 = vpop.f32.mrf.mxu0  ;;  %v2893_v15 = vpop.f32.mrf.mxu3 }
 0xb46   :  { %v4243_v8 = vpop.eup %4242  ;;  %v2970_v13 = vmax.f32 %v2945_v47, 1e-12 }
 0xb47   :  { %v3001_v30 = vmul.f32 %v4243_v8, %v2893_v15 }
 0xb48   :  { %4244 = vrcp.f32 %v2970_v13 }
 0xb49   :  { %v3017_v35 = vadd.f32 %v3001_v30, %v7392_v7 }
 0xb4b   :  { %3089 = vmatmul.f32.gmra.mxu1 %v3017_v35 }
 0xb4d   :  { %v2947_v6 = vpop.f32.mrf.mxu0  ;;  %v2896_v23 = vpop.f32.mrf.mxu3 }
 0xb4e   :  { %v4245_v20 = vpop.eup %4244  ;;  %v2971_v10 = vmax.f32 %v2947_v6, 1e-12 }
 0xb4f   :  { %v3002_v33 = vmul.f32 %v4245_v20, %v2896_v23 }
 0xb50   :  { %4246 = vrcp.f32 %v2971_v10 }
 0xb51   :  { %v3018_v0 = vadd.f32 %v3002_v33, %v7393_v41 }
 0xb53   :  { %3092 = vmatmul.f32.gmra.mxu1 %v3018_v0 }
 0xb55   :  { %v2950_v3 = vpop.f32.mrf.mxu0  ;;  %v2898_v16 = vpop.f32.mrf.mxu3 }
 0xb56   :  { %v4247_v49 = vpop.eup %4246  ;;  %v2972_v14 = vmax.f32 %v2950_v3, 1e-12 }
 0xb57   :  { %v3003_v40 = vmul.f32 %v4247_v49, %v2898_v16 }
 0xb58   :  { %4248 = vrcp.f32 %v2972_v14 }
 0xb59   :  { %v3019_v28 = vadd.f32 %v3003_v40, %v7394_v24 }
 0xb5b   :  { %3095 = vmatmul.f32.gmra.mxu1 %v3019_v28 }
 0xb5d   :  { %v2952_v4 = vpop.f32.mrf.mxu0  ;;  %v2901_v29 = vpop.f32.mrf.mxu3 }
 0xb5e   :  { %v4249_v62 = vpop.eup %4248  ;;  %v2973_v36 = vmax.f32 %v2952_v4, 1e-12 }
 0xb5f   :  { %v3004_v44 = vmul.f32 %v4249_v62, %v2901_v29 }
 0xb60   :  { %4250 = vrcp.f32 %v2973_v36 }
 0xb61   :  { %v3020_v17 = vadd.f32 %v3004_v44, %v7395_v50 }
 0xb63   :  { %3098 = vmatmul.f32.gmra.mxu1 %v3020_v17 }
 0xb65   :  { %v2955_v32 = vpop.f32.mrf.mxu0  ;;  %v2903_v31 = vpop.f32.mrf.mxu3 }
 0xb66   :  { %v4251_v52 = vpop.eup %4250  ;;  %v2974_v5 = vmax.f32 %v2955_v32, 1e-12 }
 0xb67   :  { %v3005_v19 = vmul.f32 %v4251_v52, %v2903_v31 }
 0xb68   :  { %4252 = vrcp.f32 %v2974_v5 }
 0xb69   :  { %v3021_v34 = vadd.f32 %v3005_v19, %v7396_v58 }
 0xb6b   :  { %3101 = vmatmul.f32.gmra.mxu1 %v3021_v34 }
 0xb6d   :  { %v2957_v54 = vpop.f32.mrf.mxu0  ;;  %v2906_v60 = vpop.f32.mrf.mxu3 }
 0xb6e   :  { %v4253_v45 = vpop.eup %4252  ;;  %v2975_v38 = vmax.f32 %v2957_v54, 1e-12 }
 0xb6f   :  { %v3006_v57 = vmul.f32 %v4253_v45, %v2906_v60  ;;  %v3926_v45 = vld [vmem:[%s7015_s12 + $0x178] sm:$0xff] }
 0xb70   :  { %4254 = vrcp.f32 %v2975_v38  ;;  %3543 = vmatpush.msra.mxu2 %v3926_v45 }
 0xb71   :  { %v3022_v46 = vadd.f32 %v3006_v57, %v7397_v37 }
 0xb73   :  { %3104 = vmatmul.f32.gmra.mxu1 %v3022_v46  ;;  %v3925_v46 = vld [vmem:[%s7015_s12 + $0x170] sm:$0xff] }
 0xb74   :  { %3544 = vmatpush.msra.mxu2 %v3925_v46 }
 0xb75   :  { %v2908_v26 = vpop.f32.mrf.mxu3 }
 0xb76   :  { %v4255_v63 = vpop.eup %4254 }
 0xb77   :  { %v3007_v51 = vmul.f32 %v4255_v63, %v2908_v26  ;;  %v3924_v63 = vld [vmem:[%s7015_s12 + $0x168] sm:$0xff] }
 0xb78   :  { %3545 = vmatpush.msra.mxu2 %v3924_v63  ;;  %v3911_v63 = vld [vmem:[%s7015_s12 + $0x100] sm:$0xff] }
 0xb79   :  { %v3023_v43 = vadd.f32 %v3007_v51, %v7398_v11  ;;  %v3923_v51 = vld [vmem:[%s7015_s12 + $0x160] sm:$0xff] }
 0xb7a   :  { %3546 = vmatpush.msra.mxu2 %v3923_v51 }
 0xb7b   :  { %3107 = vmatmul.f32.gmra.mxu1 %v3023_v43  ;;  %v3922_v43 = vld [vmem:[%s7015_s12 + $0x158] sm:$0xff] }
 0xb7c   :  { %3547 = vmatpush.msra.mxu2 %v3922_v43 }
 0xb80   :  { %v3063_v27 = vpop.f32.mrf.mxu1 }
 0xb81   :  { %v6626_v1 = vadd.f32 %v6623_v25, %v3063_v27 }
 0xb83   :  { %3111 = vadd.xlane.f32.xlu1 %v6626_v1  ;;  %v3159_v56 = vmul.f32 %v6626_v1, %v6626_v1 }
 0xb85   :  { %3175 = vadd.xlane.f32.xlu2 %v3159_v56 }
 0xb88   :  { %v3066_v59 = vpop.f32.mrf.mxu1 }
 0xb89   :  { %v6632_v55 = vadd.f32 %v6623_v25, %v3066_v59  ;;  %v3921_v59 = vld [vmem:[%s7015_s12 + $0x150] sm:$0xff] }
 0xb8a   :  { %3548 = vmatpush.msra.mxu2 %v3921_v59 }
 0xb8b   :  { %3113 = vadd.xlane.f32.xlu0 %v6632_v55  ;;  %v3160_v21 = vmul.f32 %v6632_v55, %v6632_v55 }
 0xb8d   :  { %3177 = vadd.xlane.f32.xlu1 %v3160_v21 }
 0xb90   :  { %v3069_v39 = vpop.f32.mrf.mxu1 }
 0xb91   :  { %v6638_v47 = vadd.f32 %v6623_v25, %v3069_v39  ;;  %v3920_v39 = vld [vmem:[%s7015_s12 + $0x148] sm:$0xff] }
 0xb92   :  { %3549 = vmatpush.msra.mxu2 %v3920_v39 }
 0xb93   :  { %3115 = vadd.xlane.f32.xlu2 %v6638_v47  ;;  %v3161_v15 = vmul.f32 %v6638_v47, %v6638_v47 }
 0xb95   :  { %3179 = vadd.xlane.f32.xlu0 %v3161_v15  ;;  %v3919_v15 = vld [vmem:[%s7015_s12 + $0x140] sm:$0xff] }
 0xb96   :  { %3550 = vmatpush.msra.mxu2 %v3919_v15 }
 0xb98   :  { %v3072_v8 = vpop.f32.mrf.mxu1 }
 0xb99   :  { %v6644_v13 = vadd.f32 %v6623_v25, %v3072_v8 }
 0xb9b   :  { %3117 = vadd.xlane.f32.xlu1 %v6644_v13  ;;  %v3162_v30 = vmul.f32 %v6644_v13, %v6644_v13 }
 0xb9d   :  { %3181 = vadd.xlane.f32.xlu2 %v3162_v30 }
 0xba0   :  { %v3075_v35 = vpop.f32.mrf.mxu1 }
 0xba1   :  { %v6650_v6 = vadd.f32 %v6623_v25, %v3075_v35  ;;  %v3918_v35 = vld [vmem:[%s7015_s12 + $0x138] sm:$0xff] }
 0xba2   :  { %3551 = vmatpush.msra.mxu2 %v3918_v35 }
 0xba3   :  { %3119 = vadd.xlane.f32.xlu0 %v6650_v6  ;;  %v3163_v23 = vmul.f32 %v6650_v6, %v6650_v6 }
 0xba5   :  { %3183 = vadd.xlane.f32.xlu1 %v3163_v23 }
 0xba8   :  { %v3078_v20 = vpop.f32.mrf.mxu1 }
 0xba9   :  { %v6656_v10 = vadd.f32 %v6623_v25, %v3078_v20 }
 0xbab   :  { %3121 = vadd.xlane.f32.xlu2 %v6656_v10  ;;  %v3164_v33 = vmul.f32 %v6656_v10, %v6656_v10 }
 0xbad   :  { %3185 = vadd.xlane.f32.xlu0 %v3164_v33 }
 0xbb0   :  { %v3081_v0 = vpop.f32.mrf.mxu1 }
 0xbb1   :  { %v6662_v3 = vadd.f32 %v6623_v25, %v3081_v0 }
 0xbb3   :  { %3123 = vadd.xlane.f32.xlu1 %v6662_v3  ;;  %v3165_v16 = vmul.f32 %v6662_v3, %v6662_v3 }
 0xbb5   :  { %3187 = vadd.xlane.f32.xlu2 %v3165_v16 }
 0xbb8   :  { %v3084_v49 = vpop.f32.mrf.mxu1 }
 0xbb9   :  { %v6668_v14 = vadd.f32 %v6623_v25, %v3084_v49  ;;  %v3917_v49 = vld [vmem:[%s7015_s12 + $0x130] sm:$0xff] }
 0xbba   :  { %3552 = vmatpush.msra.mxu2 %v3917_v49 }
 0xbbb   :  { %3125 = vadd.xlane.f32.xlu0 %v6668_v14  ;;  %v3166_v40 = vmul.f32 %v6668_v14, %v6668_v14 }
 0xbbd   :  { %3189 = vadd.xlane.f32.xlu1 %v3166_v40 }
 0xbc0   :  { %v3087_v28 = vpop.f32.mrf.mxu1 }
 0xbc1   :  { %v6674_v4 = vadd.f32 %v6623_v25, %v3087_v28 }
 0xbc3   :  { %3127 = vadd.xlane.f32.xlu2 %v6674_v4  ;;  %v3167_v29 = vmul.f32 %v6674_v4, %v6674_v4 }
 0xbc5   :  { %3191 = vadd.xlane.f32.xlu0 %v3167_v29  ;;  %v3916_v29 = vld [vmem:[%s7015_s12 + $0x128] sm:$0xff] }
 0xbc6   :  { %3553 = vmatpush.msra.mxu2 %v3916_v29  ;;  %v6786_v29 = vld [vmem:[%s7013_s10 + $0x2] ss:$0 sm:$0xff] }
 0xbc8   :  { %v3090_v62 = vpop.f32.mrf.mxu1 }
 0xbc9   :  { %v6680_v36 = vadd.f32 %v6623_v25, %v3090_v62 }
 0xbcb   :  { %3129 = vadd.xlane.f32.xlu1 %v6680_v36  ;;  %v3168_v44 = vmul.f32 %v6680_v36, %v6680_v36 }
 0xbcd   :  { %3193 = vadd.xlane.f32.xlu2 %v3168_v44 }
 0xbd0   :  { %v3093_v17 = vpop.f32.mrf.mxu1 }
 0xbd1   :  { %v6686_v32 = vadd.f32 %v6623_v25, %v3093_v17 }
 0xbd3   :  { %3131 = vadd.xlane.f32.xlu0 %v6686_v32  ;;  %v3169_v31 = vmul.f32 %v6686_v32, %v6686_v32 }
 0xbd5   :  { %3195 = vadd.xlane.f32.xlu1 %v3169_v31  ;;  %v3914_v31 = vld [vmem:[%s7015_s12 + $0x118] sm:$0xff] }
 0xbd8   :  { %v3096_v52 = vpop.f32.mrf.mxu1 }
 0xbd9   :  { %v6692_v5 = vadd.f32 %v6623_v25, %v3096_v52 }
 0xbdb   :  { %3133 = vadd.xlane.f32.xlu2 %v6692_v5  ;;  %v3170_v19 = vmul.f32 %v6692_v5, %v6692_v5 }
 0xbdd   :  { %3197 = vadd.xlane.f32.xlu0 %v3170_v19 }
 0xbe0   :  { %v3099_v34 = vpop.f32.mrf.mxu1 }
 0xbe1   :  { %v6698_v54 = vadd.f32 %v6623_v25, %v3099_v34 }
 0xbe3   :  { %3135 = vadd.xlane.f32.xlu1 %v6698_v54  ;;  %v3171_v60 = vmul.f32 %v6698_v54, %v6698_v54 }
 0xbe5   :  { %3199 = vadd.xlane.f32.xlu2 %v3171_v60  ;;  %v3913_v60 = vld [vmem:[%s7015_s12 + $0x110] sm:$0xff] }
 0xbe8   :  { %v3102_v38 = vpop.f32.mrf.mxu1 }
 0xbe9   :  { %v6707_v57 = vadd.f32 %v6623_v25, %v3102_v38  ;;  %v3912_v38 = vld [vmem:[%s7015_s12 + $0x108] sm:$0xff] }
 0xbeb   :  { %3137 = vadd.xlane.f32.xlu0 %v6707_v57  ;;  %v3172_v26 = vmul.f32 %v6707_v57, %v6707_v57 }
 0xbed   :  { %3201 = vadd.xlane.f32.xlu1 %v3172_v26 }
 0xbf0   :  { %v3105_v27 = vpop.f32.mrf.mxu1 }
 0xbf1   :  { %v6725_v56 = vadd.f32 %v6623_v25, %v3105_v27 }
 0xbf3   :  { %3139 = vadd.xlane.f32.xlu2 %v6725_v56  ;;  %v3173_v21 = vmul.f32 %v6725_v56, %v6725_v56 }
 0xbf5   :  { %3203 = vadd.xlane.f32.xlu0 %v3173_v21 }
 0xbf6   :  { %v3112_v8 = vpop.xlane.xlu1 %3111 }
 0xbf7   :  { %v6739_v30 = vmul.f32 0.015625, %v3112_v8 }
 0xbf8   :  { %v3176_v23 = vpop.xlane.xlu2 %3175  ;;  %v3108_v20 = vpop.f32.mrf.mxu1 }
 0xbf9   :  { %v3223_v33 = vmul.f32 %v6739_v30, %v6739_v30  ;;  %v3207_v0 = vmul.f32 0.015625, %v3176_v23  ;;  %v6747_v16 = vadd.f32 %v6623_v25, %v3108_v20  ;;  %v3915_v25 = vld [vmem:[%s7015_s12 + $0x120] sm:$0xff] }
 0xbfa   :  { %3554 = vmatpush.msra.mxu2 %v3915_v25 }
 0xbfb   :  { %v3239_v40 = vsub.f32 %v3207_v0, %v3223_v33  ;;  %3141 = vadd.xlane.f32.xlu1 %v6747_v16  ;;  %v3174_v28 = vmul.f32 %v6747_v16, %v6747_v16 }
 0xbfc   :  { %3555 = vmatpush.msra.mxu2 %v3914_v31 }
 0xbfd   :  { %v3271_v62 = vadd.f32 1e-05, %v3239_v40  ;;  %3205 = vadd.xlane.f32.xlu2 %v3174_v28  ;;  %v3255_v28 = vsub.f32 %v6626_v1, %v6739_v30  ;;  %v6795_v1 = vld [vmem:[%s7014_s11 + $0x2] ss:$0 sm:$0xff] }
 0xbfe   :  { %v3114_v44 = vpop.xlane.xlu0 %3113  ;;  %3556 = vmatpush.msra.mxu2 %v3913_v60 }
 0xbff   :  { %4256 = vrsqrt.f32 %v3271_v62  ;;  %v6761_v17 = vmul.f32 0.015625, %v3114_v44  ;;  %vm3293_vm10 = vweird.f32 %v3271_v62 }
 0xc00   :  { %v3178_v52 = vpop.xlane.xlu1 %3177  ;;  %3557 = vmatpush.msra.mxu2 %v3912_v38 }
 0xc01   :  { %v3224_v19 = vmul.f32 %v6761_v17, %v6761_v17  ;;  %v3208_v34 = vmul.f32 0.015625, %v3178_v52 }
 0xc02   :  { %3558 = vmatpush.msra.mxu2 %v3911_v63 }
 0xc03   :  { %v3240_v45 = vsub.f32 %v3208_v34, %v3224_v19 }
 0xc05   :  { %v4257_v46 = vpop.eup %4256  ;;  %v3272_v26 = vadd.f32 1e-05, %v3240_v45 }
 0xc06   :  { %v3288_v51 = vmul.f32 %v4257_v46, %v3271_v62  ;;  %v3116_v43 = vpop.xlane.xlu2 %3115  ;;  %vm3294_vm6 = vweird.f32 %v4257_v46 }
 0xc07   :  { %4258 = vrsqrt.f32 %v3272_v26  ;;  %v6777_v27 = vmul.f32 0.015625, %v3116_v43  ;;  %vm3295_vm15 = vmor %vm3293_vm10, %vm3294_vm6  ;;  %vm3303_vm12 = vweird.f32 %v3272_v26 }
 0xc08   :  { %v3289_v59 = vmul.f32 %v4257_v46, %v3288_v51  ;;  %v3180_v21 = vpop.xlane.xlu0 %3179 }
 0xc09   :  { %v3225_v39 = vmul.f32 %v6777_v27, %v6777_v27  ;;  %v3209_v15 = vmul.f32 0.015625, %v3180_v21 }
 0xc0a   :  { %v3290_v8 = vmul.f32 0.5, %v3289_v59 }
 0xc0b   :  { %v3241_v35 = vsub.f32 %v3209_v15, %v3225_v39  ;;  %v3256_v39 = vsub.f32 %v6632_v55, %v6761_v17 }
 0xc0c   :  { %v3291_v23 = vsub.f32 1.5, %v3290_v8 }
 0xc0d   :  { %v4259_v20 = vpop.eup %4258  ;;  %v3273_v33 = vadd.f32 1e-05, %v3241_v35 }
 0xc0e   :  { %v3292_v0 = vmul.f32 %v4257_v46, %v3291_v23  ;;  %v3298_v49 = vmul.f32 %v4259_v20, %v3272_v26  ;;  %v3118_v40 = vpop.xlane.xlu1 %3117  ;;  %vm3304_vm4 = vweird.f32 %v4259_v20 }
 0xc0f   :  { %4260 = vrsqrt.f32 %v3273_v33  ;;  %v6788_v25 = vmul.f32 0.015625, %v3118_v40  ;;  %vm3305_vm13 = vmor %vm3303_vm12, %vm3304_vm4  ;;  %vm3313_vm7 = vweird.f32 %v3273_v33 }
 0xc10   :  { %v3296_v44 = vsel %vm3295_vm15, %v4257_v46, %v3292_v0  ;;  %v3299_v31 = vmul.f32 %v4259_v20, %v3298_v49  ;;  %v3182_v52 = vpop.xlane.xlu2 %3181 }
 0xc11   :  { %v3447_v19 = vmul.f32 %v3296_v44, %v3255_v28  ;;  %v3226_v62 = vmul.f32 %v6788_v25, %v6788_v25  ;;  %v3210_v34 = vmul.f32 0.015625, %v3182_v52 }
 0xc12   :  { %v3300_v30 = vmul.f32 0.5, %v3299_v31 }
 0xc13   :  { %v3468_v60 = vmul.f32 %v6786_v29, %v3447_v19  ;;  %v3242_v45 = vsub.f32 %v3210_v34, %v3226_v62 }
 0xc14   :  { %v3301_v38 = vsub.f32 1.5, %v3300_v30  ;;  %v3257_v30 = vsub.f32 %v6638_v47, %v6777_v27 }
 0xc15   :  { %v4261_v63 = vpop.eup %4260  ;;  %v3274_v46 = vadd.f32 1e-05, %v3242_v45  ;;  %v3489_v51 = vadd.f32 %v6795_v1, %v3468_v60 }
 0xc16   :  { %v3302_v43 = vmul.f32 %v4259_v20, %v3301_v38  ;;  %v3308_v59 = vmul.f32 %v4261_v63, %v3273_v33  ;;  %v3120_v21 = vpop.xlane.xlu0 %3119  ;;  %vm3314_vm0 = vweird.f32 %v4261_v63 }
 0xc17   :  { %4262 = vrsqrt.f32 %v3274_v46  ;;  %v6801_v15 = vmul.f32 0.015625, %v3120_v21  ;;  %v3505_v8 = vmax.f32 %v3489_v51, 0.0  ;;  %vm3315_vm3 = vmor %vm3313_vm7, %vm3314_vm0  ;;  %vm3323_vm2 = vweird.f32 %v3274_v46 }
 0xc18   :  { %v3309_v35 = vmul.f32 %v4261_v63, %v3308_v59  ;;  %v3184_v23 = vpop.xlane.xlu1 %3183  ;;  %v3306_v0 = vsel %vm3305_vm13, %v4259_v20, %v3302_v43 }
 0xc19   :  { %v3227_v49 = vmul.f32 %v6801_v15, %v6801_v15  ;;  %v3211_v40 = vmul.f32 0.015625, %v3184_v23  ;;  %3559 = vmatmul.f32.vlgmr.msra.gmra.mxu2 %v3505_v8  ;;  %v3448_v28 = vmul.f32 %v3306_v0, %v3256_v39 }
 0xc1a   :  { %v3310_v26 = vmul.f32 0.5, %v3309_v35 }
 0xc1b   :  { %v3243_v44 = vsub.f32 %v3211_v40, %v3227_v49  ;;  %v3469_v31 = vmul.f32 %v6786_v29, %v3448_v28  ;;  %v3258_v28 = vsub.f32 %v6644_v13, %v6788_v25 }
 0xc1c   :  { %v3311_v52 = vsub.f32 1.5, %v3310_v26 }
 0xc1d   :  { %v4263_v55 = vpop.eup %4262  ;;  %v3275_v17 = vadd.f32 1e-05, %v3243_v44  ;;  %v3490_v19 = vadd.f32 %v6795_v1, %v3469_v31 }
 0xc1e   :  { %v3312_v62 = vmul.f32 %v4261_v63, %v3311_v52  ;;  %v3318_v34 = vmul.f32 %v4263_v55, %v3274_v46  ;;  %v3122_v20 = vpop.xlane.xlu2 %3121  ;;  %vm3324_vm9 = vweird.f32 %v4263_v55 }
 0xc1f   :  { %4264 = vrsqrt.f32 %v3275_v17  ;;  %v6809_v60 = vmul.f32 0.015625, %v3122_v20  ;;  %v3506_v45 = vmax.f32 %v3490_v19, 0.0  ;;  %vm3325_vm5 = vmor %vm3323_vm2, %vm3324_vm9  ;;  %vm3333_vm11 = vweird.f32 %v3275_v17 }
 0xc20   :  { %v3319_v38 = vmul.f32 %v4263_v55, %v3318_v34  ;;  %v3186_v51 = vpop.xlane.xlu0 %3185  ;;  %v3316_v43 = vsel %vm3315_vm3, %v4261_v63, %v3312_v62 }
 0xc21   :  { %v3228_v59 = vmul.f32 %v6809_v60, %v6809_v60  ;;  %v3212_v21 = vmul.f32 0.015625, %v3186_v51  ;;  %3562 = vmatmul.f32.gmra.mxu2 %v3506_v45  ;;  %v3449_v39 = vmul.f32 %v3316_v43, %v3257_v30 }
 0xc22   :  { %v3320_v33 = vmul.f32 0.5, %v3319_v38 }
 0xc23   :  { %v3244_v8 = vsub.f32 %v3212_v21, %v3228_v59  ;;  %v3470_v35 = vmul.f32 %v6786_v29, %v3449_v39  ;;  %v3259_v21 = vsub.f32 %v6650_v6, %v6801_v15 }
 0xc24   :  { %v3321_v23 = vsub.f32 1.5, %v3320_v33 }
 0xc25   :  { %v4265_v47 = vpop.eup %4264  ;;  %v3276_v27 = vadd.f32 1e-05, %v3244_v8  ;;  %v3491_v0 = vadd.f32 %v6795_v1, %v3470_v35 }
 0xc26   :  { %v3322_v49 = vmul.f32 %v4263_v55, %v3321_v23  ;;  %v3328_v40 = vmul.f32 %v4265_v47, %v3275_v17  ;;  %v3124_v63 = vpop.xlane.xlu1 %3123  ;;  %vm3334_vm8 = vweird.f32 %v4265_v47 }
 0xc27   :  { %4266 = vrsqrt.f32 %v3276_v27  ;;  %v6817_v26 = vmul.f32 0.015625, %v3124_v63  ;;  %v3507_v44 = vmax.f32 %v3491_v0, 0.0  ;;  %vm3335_vm14 = vmor %vm3333_vm11, %vm3334_vm8  ;;  %vm3343_vm6 = vweird.f32 %v3276_v27 }
 0xc28   :  { %v3329_v31 = vmul.f32 %v4265_v47, %v3328_v40  ;;  %v3188_v52 = vpop.xlane.xlu2 %3187  ;;  %v3326_v19 = vsel %vm3325_vm5, %v4263_v55, %v3322_v49 }
 0xc29   :  { %v3229_v62 = vmul.f32 %v6817_v26, %v6817_v26  ;;  %v3213_v34 = vmul.f32 0.015625, %v3188_v52  ;;  %3565 = vmatmul.f32.gmra.mxu2 %v3507_v44  ;;  %v3450_v20 = vmul.f32 %v3326_v19, %v3258_v28 }
 0xc2a   :  { %v3330_v46 = vmul.f32 0.5, %v3329_v31 }
 0xc2b   :  { %v3245_v30 = vsub.f32 %v3213_v34, %v3229_v62  ;;  %v3471_v45 = vmul.f32 %v6786_v29, %v3450_v20  ;;  %v3260_v62 = vsub.f32 %v6656_v10, %v6809_v60 }
 0xc2c   :  { %v3331_v38 = vsub.f32 1.5, %v3330_v46 }
 0xc2d   :  { %v4267_v13 = vpop.eup %4266  ;;  %v3277_v25 = vadd.f32 1e-05, %v3245_v30  ;;  %v3492_v51 = vadd.f32 %v6795_v1, %v3471_v45 }
 0xc2e   :  { %v3332_v43 = vmul.f32 %v4265_v47, %v3331_v38  ;;  %v3338_v59 = vmul.f32 %v4267_v13, %v3276_v27  ;;  %v3126_v55 = vpop.xlane.xlu0 %3125  ;;  %vm3344_vm1 = vweird.f32 %v4267_v13 }
 0xc2f   :  { %4268 = vrsqrt.f32 %v3277_v25  ;;  %v6825_v39 = vmul.f32 0.015625, %v3126_v55  ;;  %v3508_v33 = vmax.f32 %v3492_v51, 0.0  ;;  %vm3345_vm10 = vmor %vm3343_vm6, %vm3344_vm1  ;;  %vm3353_vm4 = vweird.f32 %v3277_v25 }
 0xc30   :  { %v3339_v8 = vmul.f32 %v4267_v13, %v3338_v59  ;;  %v3190_v35 = vpop.xlane.xlu1 %3189  ;;  %v3336_v23 = vsel %vm3335_vm14, %v4265_v47, %v3332_v43 }
 0xc31   :  { %v3230_v0 = vmul.f32 %v6825_v39, %v6825_v39  ;;  %v3214_v49 = vmul.f32 0.015625, %v3190_v35  ;;  %3568 = vmatmul.f32.gmra.mxu2 %v3508_v33  ;;  %v3451_v40 = vmul.f32 %v3336_v23, %v3259_v21  ;;  %v3261_v23 = vsub.f32 %v6662_v3, %v6817_v26 }
 0xc32   :  { %v3340_v17 = vmul.f32 0.5, %v3339_v8 }
 0xc33   :  { %v3246_v63 = vsub.f32 %v3214_v49, %v3230_v0  ;;  %v3472_v28 = vmul.f32 %v6786_v29, %v3451_v40 }
 0xc34   :  { %v3341_v44 = vsub.f32 1.5, %v3340_v17 }
 0xc35   :  { %v4269_v6 = vpop.eup %4268  ;;  %v3278_v15 = vadd.f32 1e-05, %v3246_v63  ;;  %v3493_v31 = vadd.f32 %v6795_v1, %v3472_v28 }
 0xc36   :  { %v3342_v52 = vmul.f32 %v4267_v13, %v3341_v44  ;;  %v3348_v19 = vmul.f32 %v4269_v6, %v3277_v25  ;;  %v3128_v47 = vpop.xlane.xlu2 %3127  ;;  %vm3354_vm15 = vweird.f32 %v4269_v6 }
 0xc37   :  { %4270 = vrsqrt.f32 %v3278_v15  ;;  %v6833_v34 = vmul.f32 0.015625, %v3128_v47  ;;  %v3509_v20 = vmax.f32 %v3493_v31, 0.0  ;;  %vm3355_vm12 = vmor %vm3353_vm4, %vm3354_vm15  ;;  %vm3363_vm0 = vweird.f32 %v3278_v15 }
 0xc38   :  { %v3349_v46 = vmul.f32 %v4269_v6, %v3348_v19  ;;  %v3192_v30 = vpop.xlane.xlu0 %3191  ;;  %v3346_v45 = vsel %vm3345_vm10, %v4267_v13, %v3342_v52 }
 0xc39   :  { %v3231_v38 = vmul.f32 %v6833_v34, %v6833_v34  ;;  %v3215_v51 = vmul.f32 0.015625, %v3192_v30  ;;  %3571 = vmatmul.f32.gmra.mxu2 %v3509_v20  ;;  %v3452_v43 = vmul.f32 %v3346_v45, %v3260_v62  ;;  %v3262_v30 = vsub.f32 %v6668_v14, %v6825_v39 }
 0xc3a   :  { %v3350_v27 = vmul.f32 0.5, %v3349_v46 }
 0xc3b   :  { %v3247_v59 = vsub.f32 %v3215_v51, %v3231_v38  ;;  %v3473_v55 = vmul.f32 %v6786_v29, %v3452_v43 }
 0xc3c   :  { %v3351_v21 = vsub.f32 1.5, %v3350_v27 }
 0xc3d   :  { %v4271_v10 = vpop.eup %4270  ;;  %v3279_v60 = vadd.f32 1e-05, %v3247_v59  ;;  %v3494_v33 = vadd.f32 %v6795_v1, %v3473_v55 }
 0xc3e   :  { %v3352_v8 = vmul.f32 %v4269_v6, %v3351_v21  ;;  %v3358_v35 = vmul.f32 %v4271_v10, %v3278_v15  ;;  %v3130_v13 = vpop.xlane.xlu1 %3129  ;;  %vm3364_vm13 = vweird.f32 %v4271_v10 }
 0xc3f   :  { %4272 = vrsqrt.f32 %v3279_v60  ;;  %v6841_v0 = vmul.f32 0.015625, %v3130_v13  ;;  %v3510_v49 = vmax.f32 %v3494_v33, 0.0  ;;  %vm3365_vm7 = vmor %vm3363_vm0, %vm3364_vm13  ;;  %vm3373_vm9 = vweird.f32 %v3279_v60 }
 0xc40   :  { %v3359_v40 = vmul.f32 %v4271_v10, %v3358_v35  ;;  %v3194_v17 = vpop.xlane.xlu2 %3193  ;;  %v3356_v63 = vsel %vm3355_vm12, %v4269_v6, %v3352_v8 }
 0xc41   :  { %v3232_v28 = vmul.f32 %v6841_v0, %v6841_v0  ;;  %v3216_v44 = vmul.f32 0.015625, %v3194_v17  ;;  %3574 = vmatmul.f32.gmra.mxu2 %v3510_v49  ;;  %v3453_v31 = vmul.f32 %v3356_v63, %v3261_v23 }
 0xc42   :  { %v3360_v25 = vmul.f32 0.5, %v3359_v40  ;;  %v3263_v40 = vsub.f32 %v6674_v4, %v6833_v34 }
 0xc43   :  { %v3248_v52 = vsub.f32 %v3216_v44, %v3232_v28  ;;  %v3474_v19 = vmul.f32 %v6786_v29, %v3453_v31 }
 0xc44   :  { %v3361_v47 = vsub.f32 1.5, %v3360_v25 }
 0xc45   :  { %v4273_v3 = vpop.eup %4272  ;;  %v3280_v26 = vadd.f32 1e-05, %v3248_v52  ;;  %v3495_v62 = vadd.f32 %v6795_v1, %v3474_v19 }
 0xc46   :  { %v3362_v20 = vmul.f32 %v4271_v10, %v3361_v47  ;;  %v3368_v46 = vmul.f32 %v4273_v3, %v3279_v60  ;;  %v3132_v6 = vpop.xlane.xlu0 %3131  ;;  %vm3374_vm3 = vweird.f32 %v4273_v3 }
 0xc47   :  { %4274 = vrsqrt.f32 %v3280_v26  ;;  %v6849_v45 = vmul.f32 0.015625, %v3132_v6  ;;  %v3511_v38 = vmax.f32 %v3495_v62, 0.0  ;;  %vm3375_vm2 = vmor %vm3373_vm9, %vm3374_vm3  ;;  %vm3383_vm8 = vweird.f32 %v3280_v26 }
 0xc48   :  { %v3369_v51 = vmul.f32 %v4273_v3, %v3368_v46  ;;  %v3196_v43 = vpop.xlane.xlu1 %3195  ;;  %v3366_v27 = vsel %vm3365_vm7, %v4271_v10, %v3362_v20 }
 0xc49   :  { %v3233_v59 = vmul.f32 %v6849_v45, %v6849_v45  ;;  %v3217_v55 = vmul.f32 0.015625, %v3196_v43  ;;  %3577 = vmatmul.f32.gmra.mxu2 %v3511_v38  ;;  %v3454_v21 = vmul.f32 %v3366_v27, %v3262_v30  ;;  %v3264_v38 = vsub.f32 %v6680_v36, %v6841_v0 }
 0xc4a   :  { %v3370_v15 = vmul.f32 0.5, %v3369_v51 }
 0xc4b   :  { %v3249_v33 = vsub.f32 %v3217_v55, %v3233_v59  ;;  %v3475_v8 = vmul.f32 %v6786_v29, %v3454_v21 }
 0xc4c   :  { %v3371_v35 = vsub.f32 1.5, %v3370_v15 }
 0xc4d   :  { %v4275_v14 = vpop.eup %4274  ;;  %v3281_v39 = vadd.f32 1e-05, %v3249_v33  ;;  %v3496_v13 = vadd.f32 %v6795_v1, %v3475_v8 }
 0xc4e   :  { %v3372_v23 = vmul.f32 %v4273_v3, %v3371_v35  ;;  %v3378_v49 = vmul.f32 %v4275_v14, %v3280_v26  ;;  %v3134_v10 = vpop.xlane.xlu2 %3133  ;;  %vm3384_vm5 = vweird.f32 %v4275_v14 }
 0xc4f   :  { %4276 = vrsqrt.f32 %v3281_v39  ;;  %v6857_v17 = vmul.f32 0.015625, %v3134_v10  ;;  %v3512_v63 = vmax.f32 %v3496_v13, 0.0  ;;  %vm3385_vm11 = vmor %vm3383_vm8, %vm3384_vm5  ;;  %vm3393_vm1 = vweird.f32 %v3281_v39 }
 0xc50   :  { %v3379_v28 = vmul.f32 %v4275_v14, %v3378_v49  ;;  %v3198_v44 = vpop.xlane.xlu0 %3197  ;;  %v3376_v31 = vsel %vm3375_vm2, %v4273_v3, %v3372_v23 }
 0xc51   :  { %v3234_v25 = vmul.f32 %v6857_v17, %v6857_v17  ;;  %v3218_v52 = vmul.f32 0.015625, %v3198_v44  ;;  %3580 = vmatmul.f32.gmra.mxu2 %v3512_v63  ;;  %v3455_v19 = vmul.f32 %v3376_v31, %v3263_v40  ;;  %v3265_v40 = vsub.f32 %v6686_v32, %v6849_v45 }
 0xc52   :  { %v3380_v60 = vmul.f32 0.5, %v3379_v28 }
 0xc53   :  { %v3250_v47 = vsub.f32 %v3218_v52, %v3234_v25  ;;  %v3476_v62 = vmul.f32 %v6786_v29, %v3455_v19 }
 0xc54   :  { %v3381_v20 = vsub.f32 1.5, %v3380_v60 }
 0xc55   :  { %v4277_v4 = vpop.eup %4276  ;;  %v3282_v34 = vadd.f32 1e-05, %v3250_v47  ;;  %v3497_v46 = vadd.f32 %v6795_v1, %v3476_v62 }
 0xc56   :  { %v3382_v6 = vmul.f32 %v4275_v14, %v3381_v20  ;;  %v3388_v30 = vmul.f32 %v4277_v4, %v3281_v39  ;;  %v3136_v3 = vpop.xlane.xlu1 %3135  ;;  %vm3394_vm14 = vweird.f32 %v4277_v4 }
 0xc57   :  { %4278 = vrsqrt.f32 %v3282_v34  ;;  %v6865_v51 = vmul.f32 0.015625, %v3136_v3  ;;  %v3513_v43 = vmax.f32 %v3497_v46, 0.0  ;;  %vm3395_vm6 = vmor %vm3393_vm1, %vm3394_vm14  ;;  %vm3403_vm15 = vweird.f32 %v3282_v34 }
 0xc58   :  { %v3389_v27 = vmul.f32 %v4277_v4, %v3388_v30  ;;  %v3200_v59 = vpop.xlane.xlu2 %3199  ;;  %v3386_v55 = vsel %vm3385_vm11, %v4275_v14, %v3382_v6  ;;  %v3266_v3 = vsub.f32 %v6692_v5, %v6857_v17 }
 0xc59   :  { %v3235_v21 = vmul.f32 %v6865_v51, %v6865_v51  ;;  %v3219_v15 = vmul.f32 0.015625, %v3200_v59  ;;  %3583 = vmatmul.f32.gmra.mxu2 %v3513_v43  ;;  %v3456_v33 = vmul.f32 %v3386_v55, %v3264_v38 }
 0xc5a   :  { %v3390_v26 = vmul.f32 0.5, %v3389_v27 }
 0xc5b   :  { %v3251_v8 = vsub.f32 %v3219_v15, %v3235_v21  ;;  %v3477_v35 = vmul.f32 %v6786_v29, %v3456_v33 }
 0xc5c   :  { %v3391_v13 = vsub.f32 1.5, %v3390_v26 }
 0xc5d   :  { %v4279_v36 = vpop.eup %4278  ;;  %v3283_v0 = vadd.f32 1e-05, %v3251_v8  ;;  %v3498_v23 = vadd.f32 %v6795_v1, %v3477_v35 }
 0xc5e   :  { %v3392_v49 = vmul.f32 %v4277_v4, %v3391_v13  ;;  %v3398_v10 = vmul.f32 %v4279_v36, %v3282_v34  ;;  %v3138_v14 = vpop.xlane.xlu0 %3137  ;;  %vm3404_vm10 = vweird.f32 %v4279_v36 }
 0xc5f   :  { %4280 = vrsqrt.f32 %v3283_v0  ;;  %v6873_v63 = vmul.f32 0.015625, %v3138_v14  ;;  %v3514_v28 = vmax.f32 %v3498_v23, 0.0  ;;  %vm3405_vm4 = vmor %vm3403_vm15, %vm3404_vm10  ;;  %vm3413_vm13 = vweird.f32 %v3283_v0 }
 0xc60   :  { %v3399_v44 = vmul.f32 %v4279_v36, %v3398_v10  ;;  %v3202_v31 = vpop.xlane.xlu1 %3201  ;;  %v3396_v25 = vsel %vm3395_vm6, %v4277_v4, %v3392_v49  ;;  %v3267_v10 = vsub.f32 %v6698_v54, %v6865_v51 }
 0xc61   :  { %v3236_v52 = vmul.f32 %v6873_v63, %v6873_v63  ;;  %v3220_v19 = vmul.f32 0.015625, %v3202_v31  ;;  %3586 = vmatmul.f32.gmra.mxu2 %v3514_v28  ;;  %v3457_v60 = vmul.f32 %v3396_v25, %v3265_v40 }
 0xc62   :  { %v3400_v39 = vmul.f32 0.5, %v3399_v44 }
 0xc63   :  { %v3252_v47 = vsub.f32 %v3220_v19, %v3236_v52  ;;  %v3478_v62 = vmul.f32 %v6786_v29, %v3457_v60 }
 0xc64   :  { %v3401_v20 = vsub.f32 1.5, %v3400_v39 }
 0xc65   :  { %v4281_v32 = vpop.eup %4280  ;;  %v3284_v45 = vadd.f32 1e-05, %v3252_v47  ;;  %v3499_v46 = vadd.f32 %v6795_v1, %v3478_v62 }
 0xc66   :  { %v3402_v6 = vmul.f32 %v4279_v36, %v3401_v20  ;;  %v3408_v30 = vmul.f32 %v4281_v32, %v3283_v0  ;;  %v3140_v4 = vpop.xlane.xlu2 %3139  ;;  %vm3414_vm12 = vweird.f32 %v4281_v32 }
 0xc67   :  { %4282 = vrsqrt.f32 %v3284_v45  ;;  %v6881_v38 = vmul.f32 0.015625, %v3140_v4  ;;  %v3515_v43 = vmax.f32 %v3499_v46, 0.0  ;;  %vm3415_vm0 = vmor %vm3413_vm13, %vm3414_vm12  ;;  %vm3423_vm3 = vweird.f32 %v3284_v45 }
 0xc68   :  { %v3409_v27 = vmul.f32 %v4281_v32, %v3408_v30  ;;  %v3204_v59 = vpop.xlane.xlu0 %3203  ;;  %v3406_v55 = vsel %vm3405_vm4, %v4279_v36, %v3402_v6 }
 0xc69   :  { %v3237_v21 = vmul.f32 %v6881_v38, %v6881_v38  ;;  %v3221_v15 = vmul.f32 0.015625, %v3204_v59  ;;  %3589 = vmatmul.f32.gmra.mxu2 %v3515_v43  ;;  %v3458_v33 = vmul.f32 %v3406_v55, %v3266_v3 }
 0xc6a   :  { %v3410_v34 = vmul.f32 0.5, %v3409_v27 }
 0xc6b   :  { %v3253_v26 = vsub.f32 %v3221_v15, %v3237_v21  ;;  %v3479_v8 = vmul.f32 %v6786_v29, %v3458_v33 }
 0xc6c   :  { %v3411_v35 = vsub.f32 1.5, %v3410_v34 }
 0xc6d   :  { %v4283_v5 = vpop.eup %4282  ;;  %v3285_v17 = vadd.f32 1e-05, %v3253_v26  ;;  %v3500_v13 = vadd.f32 %v6795_v1, %v3479_v8 }
 0xc6e   :  { %v3412_v23 = vmul.f32 %v4281_v32, %v3411_v35  ;;  %v3418_v49 = vmul.f32 %v4283_v5, %v3284_v45  ;;  %v3142_v36 = vpop.xlane.xlu1 %3141  ;;  %vm3424_vm7 = vweird.f32 %v4283_v5 }
 0xc6f   :  { %4284 = vrsqrt.f32 %v3285_v17  ;;  %v3158_v14 = vmul.f32 0.015625, %v3142_v36  ;;  %v3516_v40 = vmax.f32 %v3500_v13, 0.0  ;;  %vm3425_vm9 = vmor %vm3423_vm3, %vm3424_vm7  ;;  %vm3433_vm5 = vweird.f32 %v3285_v17 }
 0xc70   :  { %v3419_v28 = vmul.f32 %v4283_v5, %v3418_v49  ;;  %v3206_v44 = vpop.xlane.xlu2 %3205  ;;  %v3416_v31 = vsel %vm3415_vm0, %v4281_v32, %v3412_v23  ;;  %v3268_v32 = vsub.f32 %v6707_v57, %v6873_v63  ;;  %v3269_v57 = vsub.f32 %v6725_v56, %v6881_v38 }
 0xc71   :  { %v3238_v25 = vmul.f32 %v3158_v14, %v3158_v14  ;;  %v3222_v52 = vmul.f32 0.015625, %v3206_v44  ;;  %3592 = vmatmul.f32.gmra.mxu2 %v3516_v40  ;;  %v3459_v19 = vmul.f32 %v3416_v31, %v3267_v10 }
 0xc72   :  { %v3420_v60 = vmul.f32 0.5, %v3419_v28  ;;  %v6905_v28 = vld [vmem:[%s7016_s13 + $0x2] ss:$0 sm:$0xff] }
 0xc73   :  { %v3254_v39 = vsub.f32 %v3222_v52, %v3238_v25  ;;  %v3480_v0 = vmul.f32 %v6786_v29, %v3459_v19 }
 0xc74   :  { %v3421_v47 = vsub.f32 1.5, %v3420_v60  ;;  %v7400_v60 = vld [vmem:[#allocation48_spill] sm:$0xff] }
 0xc75   :  { %v4285_v62 = vpop.eup %4284  ;;  %v3286_v20 = vadd.f32 1e-05, %v3254_v39  ;;  %v3501_v54 = vadd.f32 %v6795_v1, %v3480_v0 }
 0xc76   :  { %v3422_v51 = vmul.f32 %v4283_v5, %v3421_v47  ;;  %v3428_v46 = vmul.f32 %v4285_v62, %v3285_v17  ;;  %vm3434_vm2 = vweird.f32 %v4285_v62  ;;  %v3270_v17 = vsub.f32 %v6747_v16, %v3158_v14  ;;  %v7399_v14 = vld [vmem:[#allocation49_spill] sm:$0xff] }
 0xc77   :  { %4286 = vrsqrt.f32 %v3286_v20  ;;  %v3517_v6 = vmax.f32 %v3501_v54, 0.0  ;;  %vm3435_vm8 = vmor %vm3433_vm5, %vm3434_vm2  ;;  %vm3443_vm14 = vweird.f32 %v3286_v20 }
 0xc78   :  { %v3429_v30 = vmul.f32 %v4285_v62, %v3428_v46  ;;  %v3426_v4 = vsel %vm3425_vm9, %v4283_v5, %v3422_v51 }
 0xc79   :  { %3595 = vmatmul.f32.gmra.mxu2 %v3517_v6  ;;  %v3460_v3 = vmul.f32 %v3426_v4, %v3268_v32  ;;  %v7402_v6 = vld [vmem:[#allocation46_spill] sm:$0xff] }
 0xc7a   :  { %v3430_v43 = vmul.f32 0.5, %v3429_v30 }
 0xc7b   :  { %v3481_v27 = vmul.f32 %v6786_v29, %v3460_v3 }
 0xc7c   :  { %v3431_v59 = vsub.f32 1.5, %v3430_v43 }
 0xc7d   :  { %v4287_v55 = vpop.eup %4286  ;;  %v3502_v21 = vadd.f32 %v6795_v1, %v3481_v27  ;;  %v7403_v27 = vld [vmem:[#allocation10_spill] sm:$0xff] }
 0xc7e   :  { %v3432_v45 = vmul.f32 %v4285_v62, %v3431_v59  ;;  %v3438_v15 = vmul.f32 %v4287_v55, %v3286_v20  ;;  %vm3444_vm11 = vweird.f32 %v4287_v55  ;;  %v7401_v20 = vld [vmem:[#allocation47_spill] sm:$0xff] }
 0xc7f   :  { %v3518_v63 = vmax.f32 %v3502_v21, 0.0  ;;  %vm3445_vm1 = vmor %vm3443_vm14, %vm3444_vm11 }
 0xc80   :  { %v3439_v33 = vmul.f32 %v4287_v55, %v3438_v15  ;;  %v3436_v34 = vsel %vm3435_vm8, %v4285_v62, %v3432_v45  ;;  %v7404_v15 = vld [vmem:[#allocation8_spill] sm:$0xff] }
 0xc81   :  { %3598 = vmatmul.f32.gmra.mxu2 %v3518_v63  ;;  %v3461_v26 = vmul.f32 %v3436_v34, %v3269_v57 }
 0xc82   :  { %v3440_v8 = vmul.f32 0.5, %v3439_v33 }
 0xc83   :  { %v3482_v35 = vmul.f32 %v6786_v29, %v3461_v26  ;;  %v7405_v26 = vld [vmem:[#allocation9_spill] sm:$0xff] }
 0xc84   :  { %v3441_v5 = vsub.f32 1.5, %v3440_v8 }
 0xc85   :  { %v3503_v13 = vadd.f32 %v6795_v1, %v3482_v35 }
 0xc86   :  { %v3442_v23 = vmul.f32 %v4287_v55, %v3441_v5 }
 0xc87   :  { %v3519_v49 = vmax.f32 %v3503_v13, 0.0 }
 0xc88   :  { %v3446_v56 = vsel %vm3445_vm1, %v4287_v55, %v3442_v23  ;;  %v7406_v23 = vld [vmem:[#allocation11_spill] sm:$0xff] }
 0xc89   :  { %3601 = vmatmul.f32.gmra.mxu2 %v3519_v49  ;;  %v3462_v38 = vmul.f32 %v3446_v56, %v3270_v17 }
 0xc8b   :  { %v3483_v36 = vmul.f32 %v6786_v29, %v3462_v38 }
 0xc8d   :  { %v3504_v10 = vadd.f32 %v6795_v1, %v3483_v36  ;;  %v7407_v36 = vld [vmem:[#allocation12_spill] sm:$0xff] }
 0xc8f   :  { %v3520_v40 = vmax.f32 %v3504_v10, 0.0 }
 0xc91   :  { %3604 = vmatmul.f32.gmra.mxu2 %v3520_v40 }
 0xc9c   :  { %v3560_v44 = vpop.f32.mrf.mxu2 }
 0xc9d   :  { %v3561_v31 = vadd.f32 %v6905_v28, %v3560_v44 }
 0xc9f   :  { %v3608_v16 = vadd.f32 %v3561_v31, %v6358_v53 }
 0xca1   :  { %v3624_v25 = vadd.f32 %v3608_v16, %v7399_v14  ;;  %v7408_v16 = vld [vmem:[#allocation13_spill] sm:$0xff] }
 0xca3   :  { %v3640_v52 = vmax.f32 %v3624_v25, 0.0 }
 0xca4   :  { %v3563_v19 = vpop.f32.mrf.mxu2 }
 0xca5   :  { %3656 = vst [vmem:[%s7018_s15] sm:$0xff] %v3640_v52  ;;  %v3564_v29 = vadd.f32 %v6905_v28, %v3563_v19 }
 0xca7   :  { %v3609_v1 = vadd.f32 %v3564_v29, %v6354_v2  ;;  %v7409_v29 = vld [vmem:[#allocation14_spill] sm:$0xff] }
 0xca9   :  { %v3625_v39 = vadd.f32 %v3609_v1, %v7400_v60 }
 0xcab   :  { %v3641_v0 = vmax.f32 %v3625_v39, 0.0 }
 0xcac   :  { %v3566_v47 = vpop.f32.mrf.mxu2 }
 0xcad   :  { %3657 = vst [vmem:[%s7018_s15 + $0x8] sm:$0xff] %v3641_v0  ;;  %v3567_v53 = vadd.f32 %v6905_v28, %v3566_v47  ;;  %v7410_v47 = vld [vmem:[#allocation15_spill] sm:$0xff] }
 0xcaf   :  { %v3610_v62 = vadd.f32 %v3567_v53, %v6352_v61 }
 0xcb1   :  { %v3626_v54 = vadd.f32 %v3610_v62, %v7401_v20 }
 0xcb3   :  { %v3642_v51 = vmax.f32 %v3626_v54, 0.0 }
 0xcb4   :  { %v3569_v46 = vpop.f32.mrf.mxu2 }
 0xcb5   :  { %3658 = vst [vmem:[%s7018_s15 + $0x10] sm:$0xff] %v3642_v51  ;;  %v3570_v2 = vadd.f32 %v6905_v28, %v3569_v46  ;;  %v7411_v51 = vld [vmem:[#allocation16_spill] sm:$0xff] }
 0xcb7   :  { %v3611_v32 = vadd.f32 %v3570_v2, %v7386_v18 }
 0xcb9   :  { %v3627_v30 = vadd.f32 %v3611_v32, %v7402_v6 }
 0xcbb   :  { %v3643_v4 = vmax.f32 %v3627_v30, 0.0  ;;  %v7412_v30 = vld [vmem:[#allocation17_spill] sm:$0xff] }
 0xcbc   :  { %v3572_v3 = vpop.f32.mrf.mxu2 }
 0xcbd   :  { %3659 = vst [vmem:[%s7018_s15 + $0x18] sm:$0xff] %v3643_v4  ;;  %v3573_v61 = vadd.f32 %v6905_v28, %v3572_v3 }
 0xcbf   :  { %v3612_v43 = vadd.f32 %v3573_v61, %v7387_v9 }
 0xcc1   :  { %v3628_v59 = vadd.f32 %v3612_v43, %v7403_v27  ;;  %v7413_v27 = vld [vmem:[#allocation19_spill] sm:$0xff] }
 0xcc3   :  { %v3644_v55 = vmax.f32 %v3628_v59, 0.0 }
 0xcc4   :  { %v3575_v21 = vpop.f32.mrf.mxu2 }
 0xcc5   :  { %3660 = vst [vmem:[%s7018_s15 + $0x20] sm:$0xff] %v3644_v55  ;;  %v3576_v18 = vadd.f32 %v6905_v28, %v3575_v21 }
 0xcc7   :  { %v3613_v45 = vadd.f32 %v3576_v18, %v7388_v12 }
 0xcc9   :  { %v3629_v57 = vadd.f32 %v3613_v45, %v7404_v15  ;;  %v7414_v45 = vld [vmem:[#allocation18_spill] sm:$0xff] }
 0xccb   :  { %v3645_v63 = vmax.f32 %v3629_v57, 0.0 }
 0xccc   :  { %v3578_v33 = vpop.f32.mrf.mxu2 }
 0xccd   :  { %3661 = vst [vmem:[%s7018_s15 + $0x28] sm:$0xff] %v3645_v63  ;;  %v3579_v9 = vadd.f32 %v6905_v28, %v3578_v33 }
 0xccf   :  { %v3614_v34 = vadd.f32 %v3579_v9, %v7389_v42 }
 0xcd1   :  { %v3630_v8 = vadd.f32 %v3614_v34, %v7405_v26 }
 0xcd3   :  { %v3646_v35 = vmax.f32 %v3630_v8, 0.0 }
 0xcd4   :  { %v3581_v5 = vpop.f32.mrf.mxu2 }
 0xcd5   :  { %3662 = vst [vmem:[%s7018_s15 + $0x30] sm:$0xff] %v3646_v35  ;;  %v3582_v12 = vadd.f32 %v6905_v28, %v3581_v5 }
 0xcd7   :  { %v3615_v13 = vadd.f32 %v3582_v12, %v7390_v48 }
 0xcd9   :  { %v3631_v17 = vadd.f32 %v3615_v13, %v7406_v23 }
 0xcdb   :  { %v3647_v49 = vmax.f32 %v3631_v17, 0.0 }
 0xcdc   :  { %v3584_v56 = vpop.f32.mrf.mxu2 }
 0xcdd   :  { %3663 = vst [vmem:[%s7018_s15 + $0x38] sm:$0xff] %v3647_v49  ;;  %v3585_v42 = vadd.f32 %v6905_v28, %v3584_v56 }
 0xcdf   :  { %v3616_v38 = vadd.f32 %v3585_v42, %v7391_v22 }
 0xce1   :  { %v3632_v10 = vadd.f32 %v3616_v38, %v7407_v36 }
 0xce3   :  { %v3648_v40 = vmax.f32 %v3632_v10, 0.0 }
 0xce4   :  { %v3587_v44 = vpop.f32.mrf.mxu2 }
 0xce5   :  { %3664 = vst [vmem:[%s7018_s15 + $0x40] sm:$0xff] %v3648_v40  ;;  %v3588_v48 = vadd.f32 %v6905_v28, %v3587_v44 }
 0xce7   :  { %v3617_v31 = vadd.f32 %v3588_v48, %v7392_v7 }
 0xce9   :  { %v3633_v14 = vadd.f32 %v3617_v31, %v7408_v16 }
 0xceb   :  { %v3649_v25 = vmax.f32 %v3633_v14, 0.0 }
 0xcec   :  { %v3590_v52 = vpop.f32.mrf.mxu2 }
 0xced   :  { %3665 = vst [vmem:[%s7018_s15 + $0x48] sm:$0xff] %v3649_v25  ;;  %v3591_v22 = vadd.f32 %v6905_v28, %v3590_v52 }
 0xcef   :  { %v3618_v19 = vadd.f32 %v3591_v22, %v7393_v41 }
 0xcf1   :  { %v3634_v1 = vadd.f32 %v3618_v19, %v7409_v29 }
 0xcf3   :  { %v3650_v60 = vmax.f32 %v3634_v1, 0.0 }
 0xcf4   :  { %v3593_v39 = vpop.f32.mrf.mxu2 }
 0xcf5   :  { %3666 = vst [vmem:[%s7018_s15 + $0x50] sm:$0xff] %v3650_v60  ;;  %v3594_v7 = vadd.f32 %v6905_v28, %v3593_v39 }
 0xcf7   :  { %v3619_v0 = vadd.f32 %v3594_v7, %v7394_v24 }
 0xcf9   :  { %v3635_v53 = vadd.f32 %v3619_v0, %v7410_v47 }
 0xcfb   :  { %v3651_v62 = vmax.f32 %v3635_v53, 0.0 }
 0xcfc   :  { %v3596_v20 = vpop.f32.mrf.mxu2 }
 0xcfd   :  { %3667 = vst [vmem:[%s7018_s15 + $0x58] sm:$0xff] %v3651_v62  ;;  %v3597_v41 = vadd.f32 %v6905_v28, %v3596_v20 }
 0xcff   :  { %v3620_v54 = vadd.f32 %v3597_v41, %v7395_v50 }
 0xd01   :  { %v3636_v46 = vadd.f32 %v3620_v54, %v7411_v51 }
 0xd03   :  { %v3652_v2 = vmax.f32 %v3636_v46, 0.0 }
 0xd04   :  { %v3599_v32 = vpop.f32.mrf.mxu2 }
 0xd05   :  { %3668 = vst [vmem:[%s7018_s15 + $0x60] sm:$0xff] %v3652_v2  ;;  %v3600_v24 = vadd.f32 %v6905_v28, %v3599_v32 }
 0xd07   :  { %v3621_v6 = vadd.f32 %v3600_v24, %v7396_v58 }
 0xd09   :  { %v3637_v4 = vadd.f32 %v3621_v6, %v7412_v30 }
 0xd0b   :  { %v3653_v3 = vmax.f32 %v3637_v4, 0.0 }
 0xd0c   :  { %v3602_v61 = vpop.f32.mrf.mxu2 }
 0xd0d   :  { %3669 = vst [vmem:[%s7018_s15 + $0x68] sm:$0xff] %v3653_v3  ;;  %v3603_v50 = vadd.f32 %v6905_v28, %v3602_v61 }
 0xd0f   :  { %v3622_v43 = vadd.f32 %v3603_v50, %v7397_v37 }
 0xd11   :  { %v3638_v59 = vadd.f32 %v3622_v43, %v7413_v27 }
 0xd13   :  { %v3654_v55 = vmax.f32 %v3638_v59, 0.0 }
 0xd14   :  { %v3605_v21 = vpop.f32.mrf.mxu2 }
 0xd15   :  { %3670 = vst [vmem:[%s7018_s15 + $0x70] sm:$0xff] %v3654_v55  ;;  %v3606_v58 = vadd.f32 %v6905_v28, %v3605_v21 }
 0xd17   :  { %v3623_v18 = vadd.f32 %v3606_v58, %v7398_v11 }
 0xd19   :  { %v3639_v15 = vadd.f32 %v3623_v18, %v7414_v45 }
 0xd1b   :  { %v3655_v57 = vmax.f32 %v3639_v15, 0.0 }
 0xd1d   :  { %3671 = vst [vmem:[%s7018_s15 + $0x78] sm:$0xff] %v3655_v57 }
 0xd1e   :  { %3676 = vsyncpa [#allocation3], 1 }
 0xd1f   :  { %3677 = vsyncpa [#allocation4], 1 }

</bundles_post_ra>
